<compile_context>
chip_gen: v7x
topology: tpu7x:2x2x1
jax: 0.10.0
libtpu: 0.0.40
codegen_flags: <defaults>
</compile_context>

<pallas_src>
import numpy as np

import jax
import jax.numpy as jnp
from jax.experimental import pallas as pl
from jax.experimental.pallas import tpu as pltpu


# per-image padded grids: encoder 16x16 -> 18x18, 8x8 stage -> 10x10,
# decoder dilated grids 10x10 (dec1) and 20x20 (dec2).
_W1, _W2, _W4 = 18, 10, 20
_PAD1, _PAD2, _PAD4 = _W1 + 1, _W2 + 1, _W4 + 1   # max |tap shift| per grid


# --------------------------------------------------------------------------
# in-kernel building blocks
# --------------------------------------------------------------------------

def _stacked_conv3x3(cbuf, pad, L, grid_w, wslab, w_ref, b_ref):
    """3x3 stride-1 conv as ONE MXU matmul over K-concatenated shifted windows.

    cbuf : (Cin, pad + L + pad) f32 scratch, activation at [pad, pad+L),
           pad columns zeroed (row-padded layout -> no boundary masks).
    wslab: (9*Cin, L) bf16 scratch, filled here with the 9 shifted windows.
    w_ref: (Cout, 9*Cin) bf16 weights, tap-major (t = ky*3 + kx).
    b_ref: (Cout, 1) f32 bias.
    """
    cin = cbuf.shape[0]
    for ky in range(3):
        for kx in range(3):
            t = ky * 3 + kx
            d = (ky - 1) * grid_w + (kx - 1)
            wslab[t * cin:(t + 1) * cin, :] = (
                cbuf[:, pl.ds(pad + d, L)].astype(jnp.bfloat16))
    return jnp.dot(w_ref[...], wslab[...],
                   preferred_element_type=jnp.float32) + b_ref[...]


def _autoencoder_kernel(x_ref,
                        e1w_ref, e1b_ref, p1_ref,
                        e2w_ref, e2b_ref, m2_ref,
                        d1w_ref, d1b_ref, p3_ref,
                        d2w_ref, d2b_ref,
                        out_ref,
                        cbuf1, pbuf1, cbuf2, wbuf2, pbuf2,
                        cbuf3, wbuf3, cbuf4, wbuf4):
    f32 = jnp.float32
    L1 = p1_ref.shape[0]          # G * 18*18
    L2 = p1_ref.shape[1]          # G * 10*10
    L4 = p3_ref.shape[1]          # G * 20*20

    # ---- encoder conv1 (1->16, 3x3, pad=1) + ReLU : VPU outer products ----
    cbuf1[:, :_PAD1] = jnp.zeros((1, _PAD1), f32)
    cbuf1[:, _PAD1 + L1:] = jnp.zeros((1, _PAD1), f32)
    cbuf1[:, pl.ds(_PAD1, L1)] = x_ref[0]
    acc = jnp.zeros((16, L1), f32)
    for ky in range(3):
        for kx in range(3):
            d = (ky - 1) * _W1 + (kx - 1)
            acc = acc + e1w_ref[ky * 3 + kx] * cbuf1[:, pl.ds(_PAD1 + d, L1)]
    y = jnp.maximum(acc + e1b_ref[...], 0.0)                       # (16, L1)

    # ---- maxpool 2x2/2 + 0/1 projection onto the padded 10x10 grid --------
    pbuf1[:, pl.ds(0, L1)] = y
    pbuf1[:, L1:] = jnp.zeros((16, _PAD1), f32)
    m = jnp.maximum(
        jnp.maximum(pbuf1[:, pl.ds(0, L1)], pbuf1[:, pl.ds(1, L1)]),
        jnp.maximum(pbuf1[:, pl.ds(_W1, L1)], pbuf1[:, pl.ds(_W1 + 1, L1)]))
    h = jnp.dot(m.astype(jnp.bfloat16), p1_ref[...],
                preferred_element_type=f32)                        # (16, L2)

    # ---- encoder conv2 (16->8, 3x3, pad=1) + ReLU : one K=144 matmul ------
    cbuf2[:, :_PAD2] = jnp.zeros((16, _PAD2), f32)
    cbuf2[:, _PAD2 + L2:] = jnp.zeros((16, _PAD2), f32)
    cbuf2[:, pl.ds(_PAD2, L2)] = h
    y = jnp.maximum(
        _stacked_conv3x3(cbuf2, _PAD2, L2, _W2, wbuf2, e2w_ref, e2b_ref), 0.0)

    # ---- maxpool 2x2/2 fused with decoder zero-dilation: max + lane mask --
    pbuf2[:, pl.ds(0, L2)] = y
    pbuf2[:, L2:] = jnp.zeros((8, _PAD2), f32)
    m = jnp.maximum(
        jnp.maximum(pbuf2[:, pl.ds(0, L2)], pbuf2[:, pl.ds(1, L2)]),
        jnp.maximum(pbuf2[:, pl.ds(_W2, L2)], pbuf2[:, pl.ds(_W2 + 1, L2)]))
    h = m * m2_ref[...]                                            # (8, L2)

    # ---- convT1 (8->16, s=2, p=1, op=1) == 3x3 conv on the dilated grid ---
    cbuf3[:, :_PAD2] = jnp.zeros((8, _PAD2), f32)
    cbuf3[:, _PAD2 + L2:] = jnp.zeros((8, _PAD2), f32)
    cbuf3[:, pl.ds(_PAD2, L2)] = h
    y = jnp.maximum(
        _stacked_conv3x3(cbuf3, _PAD2, L2, _W2, wbuf3, d1w_ref, d1b_ref), 0.0)

    # ---- fused crop(valid 8x8) + zero-dilation onto the 20x20 dec2 grid ---
    h = jnp.dot(y.astype(jnp.bfloat16), p3_ref[...],
                preferred_element_type=f32)                        # (16, L4)

    # ---- convT2 (16->1, s=2, p=0, op=1) == 3x3 conv + sigmoid -------------
    cbuf4[:, :_PAD4] = jnp.zeros((16, _PAD4), f32)
    cbuf4[:, _PAD4 + L4:] = jnp.zeros((16, _PAD4), f32)
    cbuf4[:, pl.ds(_PAD4, L4)] = h
    z = _stacked_conv3x3(cbuf4, _PAD4, L4, _W4, wbuf4, d2w_ref, d2b_ref)
    s = pl.reciprocal(1.0 + jnp.exp(-z), approx=True)   # exp + recip on EUP
    out_ref[0] = jnp.clip(s, 0.0, 1.0)                  # (1, L4)


# --------------------------------------------------------------------------
# trace-time constants (numpy, per image-GROUP -> O(1) in batch size)
# --------------------------------------------------------------------------

def _flat(n, y, x, h, w):
    return (n * h + y) * w + x


def _pool1_projection(g):
    """Gather conv1 pool maxima at 18-grid (1+2u,1+2v), place them at the
    interior (1+u,1+v) of conv2's padded 10x10 grid."""
    p = np.zeros((g * _W1 * _W1, g * _W2 * _W2), np.float32)
    for n in range(g):
        for u in range(8):
            for v in range(8):
                p[_flat(n, 1 + 2 * u, 1 + 2 * v, _W1, _W1),
                  _flat(n, 1 + u, 1 + v, _W2, _W2)] = 1.0
    return p


def _pool2_mask(g):
    """conv2's pool maxima land at 10-grid (1+2i,1+2j) - exactly where dec1's
    dilated+padded grid needs them -> lane mask instead of a matmul."""
    m = np.zeros((1, g * _W2 * _W2), np.float32)
    for n in range(g):
        for i in range(4):
            for j in range(4):
                m[0, _flat(n, 1 + 2 * i, 1 + 2 * j, _W2, _W2)] = 1.0
    return m


def _crop_dilate_projection(g):
    """Fused: crop dec1's valid 8x8 output (10-grid (1+r,1+c)) and zero-dilate
    it onto the dec2 20x20 grid at (2+2r, 2+2c) (convT2: s=2, p=0, op=1)."""
    p = np.zeros((g * _W2 * _W2, g * _W4 * _W4), np.float32)
    for n in range(g):
        for r in range(8):
            for c in range(8):
                p[_flat(n, 1 + r, 1 + c, _W2, _W2),
                  _flat(n, 2 + 2 * r, 2 + 2 * c, _W4, _W4)] = 1.0
    return p


def _conv1_taps(w):
    # (16, 1, 3, 3) -> (9, 16, 1) tap-major; Cin == 1 stays f32 on the VPU.
    return jnp.transpose(w, (2, 3, 0, 1)).reshape(9, 16, 1).astype(jnp.float32)


def _conv_w_flat(w, dtype=jnp.bfloat16):
    # (Cout, Cin, 3, 3) -> (Cout, 9*Cin), tap-major (t = ky*3 + kx).
    co, ci = w.shape[0], w.shape[1]
    return jnp.transpose(w, (0, 2, 3, 1)).reshape(co, 9 * ci).astype(dtype)


def _convT_w_flat(w, dtype=jnp.bfloat16):
    # ConvTranspose2d weight (Cin, Cout, 3, 3) -> equivalent forward conv
    # (flip spatial, swap channels), then tap-major flattening.
    w_eq = jnp.flip(w, axis=(2, 3)).transpose(1, 0, 2, 3)
    return _conv_w_flat(w_eq, dtype)


# --------------------------------------------------------------------------
# forward
# --------------------------------------------------------------------------

def autoencoder_forward(params, x, *, group_size=2):
    """x: (N, 1, 16, 16) -> (N, 1, 18, 18), same semantics as the PyTorch module."""
    n = x.shape[0]
    g = group_size
    pad_n = (-n) % g
    if pad_n:
        x = jnp.concatenate([x, jnp.zeros((pad_n,) + x.shape[1:], x.dtype)], 0)
    nb = (n + pad_n) // g

    l1, l2, l4 = g * _W1 * _W1, g * _W2 * _W2, g * _W4 * _W4
    f32, bf16 = jnp.float32, jnp.bfloat16

    # weights (tap-major) and biases
    e1w = _conv1_taps(params["enc1_w"])
    e2w = _conv_w_flat(params["enc2_w"], bf16)
    d1w = _convT_w_flat(params["dec1_w"], bf16)
    d2w = _convT_w_flat(params["dec2_w"], bf16)
    e1b = params["enc1_b"].reshape(-1, 1).astype(f32)
    e2b = params["enc2_b"].reshape(-1, 1).astype(f32)
    d1b = params["dec1_b"].reshape(-1, 1).astype(f32)
    d2b = params["dec2_b"].reshape(-1, 1).astype(f32)

    # per-group 0/1 constants (exact in bf16)
    p1 = jnp.asarray(_pool1_projection(g), dtype=bf16)
    m2 = jnp.asarray(_pool2_mask(g), dtype=f32)
    p3 = jnp.asarray(_crop_dilate_projection(g), dtype=bf16)

    # row-padded, lane-dense input layout: (NB, 1, G*18*18)
    xg = jnp.pad(x.reshape(nb * g, 16, 16).astype(f32),
                 ((0, 0), (1, 1), (1, 1)))
    xg = xg.reshape(nb, 1, l1)

    out_flat = pl.pallas_call(
        _autoencoder_kernel,
        out_shape=jax.ShapeDtypeStruct((nb, 1, l4), f32),
        grid=(nb,),
        in_specs=[
            pl.BlockSpec((1, 1, l1), lambda i: (i, 0, 0)),    # x (per group)
            pl.BlockSpec((9, 16, 1), lambda i: (0, 0, 0)),    # enc1 taps
            pl.BlockSpec((16, 1), lambda i: (0, 0)),          # enc1 bias
            pl.BlockSpec((l1, l2), lambda i: (0, 0)),         # pool1 projection
            pl.BlockSpec((8, 144), lambda i: (0, 0)),         # enc2 weights
            pl.BlockSpec((8, 1), lambda i: (0, 0)),           # enc2 bias
            pl.BlockSpec((1, l2), lambda i: (0, 0)),          # pool2/dilate mask
            pl.BlockSpec((16, 72), lambda i: (0, 0)),         # dec1 weights
            pl.BlockSpec((16, 1), lambda i: (0, 0)),          # dec1 bias
            pl.BlockSpec((l2, l4), lambda i: (0, 0)),         # crop+dilate proj
            pl.BlockSpec((1, 144), lambda i: (0, 0)),         # dec2 weights
            pl.BlockSpec((1, 1), lambda i: (0, 0)),           # dec2 bias
        ],
        out_specs=pl.BlockSpec((1, 1, l4), lambda i: (i, 0, 0)),
        scratch_shapes=[
            pltpu.VMEM((1, l1 + 2 * _PAD1), f32),    # conv1 padded input slab
            pltpu.VMEM((16, l1 + _PAD1), f32),       # pool1 window buffer
            pltpu.VMEM((16, l2 + 2 * _PAD2), f32),   # conv2 padded input slab
            pltpu.VMEM((144, l2), bf16),             # conv2 stacked windows
            pltpu.VMEM((8, l2 + _PAD2), f32),        # pool2 window buffer
            pltpu.VMEM((8, l2 + 2 * _PAD2), f32),    # dec1 dilated input slab
            pltpu.VMEM((72, l2), bf16),              # dec1 stacked windows
            pltpu.VMEM((16, l4 + 2 * _PAD4), f32),   # dec2 dilated input slab
            pltpu.VMEM((144, l4), bf16),             # dec2 stacked windows
        ],
        compiler_params=pltpu.CompilerParams(
            dimension_semantics=("parallel",)),
    )(xg, e1w, e1b, p1, e2w, e2b, m2, d1w, d1b, p3, d2w, d2b)

    # valid 18x18 output = interior of each 20x20 decoder grid
    out = out_flat.reshape(nb * g, _W4, _W4)[:n, 1:19, 1:19]
    return out[:, None, :, :]


# --------------------------------------------------------------------------
# parameters + pure-JAX reference (self-check)
# --------------------------------------------------------------------------

def _uinit(key, shape, fan_in):
    bound = 1.0 / float(fan_in) ** 0.5
    return jax.random.uniform(key, shape, jnp.float32, -bound, bound)


def init_params(key):
    ks = jax.random.split(key, 8)
    p = {}
    p["enc1_w"] = _uinit(ks[0], (16, 1, 3, 3), 1 * 9)
    p["enc1_b"] = _uinit(ks[1], (16,), 1 * 9)
    p["enc2_w"] = _uinit(ks[2], (8, 16, 3, 3), 16 * 9)
    p["enc2_b"] = _uinit(ks[3], (8,), 16 * 9)
    p["dec1_w"] = _uinit(ks[4], (8, 16, 3, 3), 16 * 9)   # ConvTranspose layout
    p["dec1_b"] = _uinit(ks[5], (16,), 16 * 9)
    p["dec2_w"] = _uinit(ks[6], (16, 1, 3, 3), 1 * 9)
    p["dec2_b"] = _uinit(ks[7], (1,), 1 * 9)
    return p


def _reference_forward(p, x):
    dn = ("NCHW", "OIHW", "NCHW")

    def conv(x, w, b, pad):
        y = jax.lax.conv_general_dilated(x, w, (1, 1), [(pad, pad), (pad, pad)],
                                         dimension_numbers=dn)
        return y + b.reshape(1, -1, 1, 1)

    def convT(x, w, b, stride, pad, out_pad):
        w_eq = jnp.flip(w, axis=(2, 3)).transpose(1, 0, 2, 3)
        lo = w.shape[2] - 1 - pad
        hi = lo + out_pad
        y = jax.lax.conv_general_dilated(x, w_eq, (1, 1), [(lo, hi), (lo, hi)],
                                         lhs_dilation=(stride, stride),
                                         dimension_numbers=dn)
        return y + b.reshape(1, -1, 1, 1)

    def pool(x):
        return jax.lax.reduce_window(x, -jnp.inf, jax.lax.max,
                                     (1, 1, 2, 2), (1, 1, 2, 2), "VALID")

    h = pool(jax.nn.relu(conv(x, p["enc1_w"], p["enc1_b"], 1)))
    h = pool(jax.nn.relu(conv(h, p["enc2_w"], p["enc2_b"], 1)))
    h = jax.nn.relu(convT(h, p["dec1_w"], p["dec1_b"], 2, 1, 1))
    h = jax.nn.sigmoid(convT(h, p["dec2_w"], p["dec2_b"], 2, 0, 1))
    return h


if __name__ == "__main__":
    key = jax.random.PRNGKey(0)
    kx, kp = jax.random.split(key)
    x = jax.random.uniform(kx, (2, 1, 16, 16), jnp.float32)
    params = init_params(kp)

    fwd = jax.jit(autoencoder_forward)
    y = fwd(params, x)
    jax.block_until_ready(y)

    # 16x16 -> pool -> 8x8 -> pool -> 4x4 -> convT(s2,p1,op1) -> 8x8
    # -> convT(s2,p0,op1) -> 18x18
    assert y.shape == (2, 1, 18, 18), y.shape
    assert bool(jnp.all(jnp.isfinite(y)))
    assert bool(jnp.all((y >= 0.0) & (y <= 1.0)))     # sigmoid output

    y_ref = _reference_forward(params, x)
    err = float(jnp.max(jnp.abs(y - y_ref)))
    assert err < 2e-2, f"max abs error vs reference = {err}"
    print("KERNEL_OK")
</pallas_src>

<mosaic_0001>
module attributes {stable_mosaic.version = 11 : i64} {
  func.func @_autoencoder_kernel(%arg0: i32, %arg1: memref<1x1x648xf32, #tpu.memory_space<vmem>>, %arg2: memref<9x16x1xf32, #tpu.memory_space<vmem>>, %arg3: memref<16x1xf32, #tpu.memory_space<vmem>>, %arg4: memref<648x200xbf16, #tpu.memory_space<vmem>>, %arg5: memref<8x144xbf16, #tpu.memory_space<vmem>>, %arg6: memref<8x1xf32, #tpu.memory_space<vmem>>, %arg7: memref<1x200xf32, #tpu.memory_space<vmem>>, %arg8: memref<16x72xbf16, #tpu.memory_space<vmem>>, %arg9: memref<16x1xf32, #tpu.memory_space<vmem>>, %arg10: memref<200x800xbf16, #tpu.memory_space<vmem>>, %arg11: memref<1x144xbf16, #tpu.memory_space<vmem>>, %arg12: memref<1x1xf32, #tpu.memory_space<vmem>>, %arg13: memref<1x1x800xf32, #tpu.memory_space<vmem>>, %arg14: memref<1x686xf32, #tpu.memory_space<vmem>>, %arg15: memref<16x667xf32, #tpu.memory_space<vmem>>, %arg16: memref<16x222xf32, #tpu.memory_space<vmem>>, %arg17: memref<144x200xbf16, #tpu.memory_space<vmem>>, %arg18: memref<8x211xf32, #tpu.memory_space<vmem>>, %arg19: memref<8x222xf32, #tpu.memory_space<vmem>>, %arg20: memref<72x200xbf16, #tpu.memory_space<vmem>>, %arg21: memref<16x842xf32, #tpu.memory_space<vmem>>, %arg22: memref<144x800xbf16, #tpu.memory_space<vmem>>) attributes {dimension_semantics = [#tpu.dimension_semantics<parallel>], iteration_bounds = array<i64: 1>, scalar_prefetch = 0 : i64, scratch_operands = 9 : i64, tpu.core_type = #tpu.core_type<tc>, window_params = [{transform_indices = @transform_0, window_bounds = array<i64: 1, 1, 648>}, {pipeline_mode = #tpu.pipeline_mode<synchronous>, transform_indices = @transform_1, window_bounds = array<i64: 9, 16, 1>}, {pipeline_mode = #tpu.pipeline_mode<synchronous>, transform_indices = @transform_2, window_bounds = array<i64: 16, 1>}, {pipeline_mode = #tpu.pipeline_mode<synchronous>, transform_indices = @transform_3, window_bounds = array<i64: 648, 200>}, {pipeline_mode = #tpu.pipeline_mode<synchronous>, transform_indices = @transform_4, window_bounds = array<i64: 8, 144>}, {pipeline_mode = #tpu.pipeline_mode<synchronous>, transform_indices = @transform_5, window_bounds = array<i64: 8, 1>}, {pipeline_mode = #tpu.pipeline_mode<synchronous>, transform_indices = @transform_6, window_bounds = array<i64: 1, 200>}, {pipeline_mode = #tpu.pipeline_mode<synchronous>, transform_indices = @transform_7, window_bounds = array<i64: 16, 72>}, {pipeline_mode = #tpu.pipeline_mode<synchronous>, transform_indices = @transform_8, window_bounds = array<i64: 16, 1>}, {pipeline_mode = #tpu.pipeline_mode<synchronous>, transform_indices = @transform_9, window_bounds = array<i64: 200, 800>}, {pipeline_mode = #tpu.pipeline_mode<synchronous>, transform_indices = @transform_10, window_bounds = array<i64: 1, 144>}, {pipeline_mode = #tpu.pipeline_mode<synchronous>, transform_indices = @transform_11, window_bounds = array<i64: 1, 1>}, {transform_indices = @transform_12, window_bounds = array<i64: 1, 1, 800>}]} {
    %cst = arith.constant 0.000000e+00 : f32
    %0 = vector.broadcast %cst : f32 to vector<1x19xf32>
    %c0 = arith.constant 0 : index
    %c0_0 = arith.constant 0 : index
    %1 = vector.load %arg14[%c0, %c0_0] : memref<1x686xf32, #tpu.memory_space<vmem>>, vector<1x19xf32>
    tpu.vector_store %arg14[%c0, %c0_0], %0 {strides = array<i32>} : memref<1x686xf32, #tpu.memory_space<vmem>>, vector<1x19xf32>,
    %cst_1 = arith.constant 0.000000e+00 : f32
    %2 = vector.broadcast %cst_1 : f32 to vector<1x19xf32>
    %c0_2 = arith.constant 0 : index
    %c667 = arith.constant 667 : index
    %3 = vector.load %arg14[%c0_2, %c667] : memref<1x686xf32, #tpu.memory_space<vmem>>, vector<1x19xf32>
    tpu.vector_store %arg14[%c0_2, %c667], %2 {strides = array<i32>} : memref<1x686xf32, #tpu.memory_space<vmem>>, vector<1x19xf32>,
    %c0_3 = arith.constant 0 : index
    %c0_4 = arith.constant 0 : index
    %c0_5 = arith.constant 0 : index
    %4 = vector.load %arg1[%c0_3, %c0_4, %c0_5] : memref<1x1x648xf32, #tpu.memory_space<vmem>>, vector<1x1x648xf32>
    %5 = vector.shape_cast %4 : vector<1x1x648xf32> to vector<1x648xf32>
    %c0_6 = arith.constant 0 : index
    %c19 = arith.constant 19 : index
    %6 = vector.load %arg14[%c0_6, %c19] : memref<1x686xf32, #tpu.memory_space<vmem>>, vector<1x648xf32>
    tpu.vector_store %arg14[%c0_6, %c19], %5 {strides = array<i32>} : memref<1x686xf32, #tpu.memory_space<vmem>>, vector<1x648xf32>,
    %cst_7 = arith.constant 0.000000e+00 : f32
    %7 = vector.broadcast %cst_7 : f32 to vector<16x648xf32>
    %c0_8 = arith.constant 0 : index
    %c0_9 = arith.constant 0 : index
    %c0_10 = arith.constant 0 : index
    %8 = vector.load %arg2[%c0_8, %c0_9, %c0_10] : memref<9x16x1xf32, #tpu.memory_space<vmem>>, vector<1x16x1xf32>
    %9 = vector.shape_cast %8 : vector<1x16x1xf32> to vector<16x1xf32>
    %c0_11 = arith.constant 0 : index
    %c0_12 = arith.constant 0 : index
    %10 = vector.load %arg14[%c0_11, %c0_12] : memref<1x686xf32, #tpu.memory_space<vmem>>, vector<1x648xf32>
    %11 = vector.broadcast %9 : vector<16x1xf32> to vector<16x648xf32>
    %12 = vector.broadcast %10 : vector<1x648xf32> to vector<16x648xf32>
    %13 = arith.mulf %11, %12 : vector<16x648xf32>
    %14 = arith.addf %7, %13 : vector<16x648xf32>
    %c1 = arith.constant 1 : index
    %c0_13 = arith.constant 0 : index
    %c0_14 = arith.constant 0 : index
    %15 = vector.load %arg2[%c1, %c0_13, %c0_14] : memref<9x16x1xf32, #tpu.memory_space<vmem>>, vector<1x16x1xf32>
    %16 = vector.shape_cast %15 : vector<1x16x1xf32> to vector<16x1xf32>
    %c0_15 = arith.constant 0 : index
    %c1_16 = arith.constant 1 : index
    %17 = vector.load %arg14[%c0_15, %c1_16] : memref<1x686xf32, #tpu.memory_space<vmem>>, vector<1x648xf32>
    %18 = vector.broadcast %16 : vector<16x1xf32> to vector<16x648xf32>
    %19 = vector.broadcast %17 : vector<1x648xf32> to vector<16x648xf32>
    %20 = arith.mulf %18, %19 : vector<16x648xf32>
    %21 = arith.addf %14, %20 : vector<16x648xf32>
    %c2 = arith.constant 2 : index
    %c0_17 = arith.constant 0 : index
    %c0_18 = arith.constant 0 : index
    %22 = vector.load %arg2[%c2, %c0_17, %c0_18] : memref<9x16x1xf32, #tpu.memory_space<vmem>>, vector<1x16x1xf32>
    %23 = vector.shape_cast %22 : vector<1x16x1xf32> to vector<16x1xf32>
    %c0_19 = arith.constant 0 : index
    %c2_20 = arith.constant 2 : index
    %24 = vector.load %arg14[%c0_19, %c2_20] : memref<1x686xf32, #tpu.memory_space<vmem>>, vector<1x648xf32>
    %25 = vector.broadcast %23 : vector<16x1xf32> to vector<16x648xf32>
    %26 = vector.broadcast %24 : vector<1x648xf32> to vector<16x648xf32>
    %27 = arith.mulf %25, %26 : vector<16x648xf32>
    %28 = arith.addf %21, %27 : vector<16x648xf32>
    %c3 = arith.constant 3 : index
    %c0_21 = arith.constant 0 : index
    %c0_22 = arith.constant 0 : index
    %29 = vector.load %arg2[%c3, %c0_21, %c0_22] : memref<9x16x1xf32, #tpu.memory_space<vmem>>, vector<1x16x1xf32>
    %30 = vector.shape_cast %29 : vector<1x16x1xf32> to vector<16x1xf32>
    %c0_23 = arith.constant 0 : index
    %c18 = arith.constant 18 : index
    %31 = vector.load %arg14[%c0_23, %c18] : memref<1x686xf32, #tpu.memory_space<vmem>>, vector<1x648xf32>
    %32 = vector.broadcast %30 : vector<16x1xf32> to vector<16x648xf32>
    %33 = vector.broadcast %31 : vector<1x648xf32> to vector<16x648xf32>
    %34 = arith.mulf %32, %33 : vector<16x648xf32>
    %35 = arith.addf %28, %34 : vector<16x648xf32>
    %c4 = arith.constant 4 : index
    %c0_24 = arith.constant 0 : index
    %c0_25 = arith.constant 0 : index
    %36 = vector.load %arg2[%c4, %c0_24, %c0_25] : memref<9x16x1xf32, #tpu.memory_space<vmem>>, vector<1x16x1xf32>
    %37 = vector.shape_cast %36 : vector<1x16x1xf32> to vector<16x1xf32>
    %c0_26 = arith.constant 0 : index
    %c19_27 = arith.constant 19 : index
    %38 = vector.load %arg14[%c0_26, %c19_27] : memref<1x686xf32, #tpu.memory_space<vmem>>, vector<1x648xf32>
    %39 = vector.broadcast %37 : vector<16x1xf32> to vector<16x648xf32>
    %40 = vector.broadcast %38 : vector<1x648xf32> to vector<16x648xf32>
    %41 = arith.mulf %39, %40 : vector<16x648xf32>
    %42 = arith.addf %35, %41 : vector<16x648xf32>
    %c5 = arith.constant 5 : index
    %c0_28 = arith.constant 0 : index
    %c0_29 = arith.constant 0 : index
    %43 = vector.load %arg2[%c5, %c0_28, %c0_29] : memref<9x16x1xf32, #tpu.memory_space<vmem>>, vector<1x16x1xf32>
    %44 = vector.shape_cast %43 : vector<1x16x1xf32> to vector<16x1xf32>
    %c0_30 = arith.constant 0 : index
    %c20 = arith.constant 20 : index
    %45 = vector.load %arg14[%c0_30, %c20] : memref<1x686xf32, #tpu.memory_space<vmem>>, vector<1x648xf32>
    %46 = vector.broadcast %44 : vector<16x1xf32> to vector<16x648xf32>
    %47 = vector.broadcast %45 : vector<1x648xf32> to vector<16x648xf32>
    %48 = arith.mulf %46, %47 : vector<16x648xf32>
    %49 = arith.addf %42, %48 : vector<16x648xf32>
    %c6 = arith.constant 6 : index
    %c0_31 = arith.constant 0 : index
    %c0_32 = arith.constant 0 : index
    %50 = vector.load %arg2[%c6, %c0_31, %c0_32] : memref<9x16x1xf32, #tpu.memory_space<vmem>>, vector<1x16x1xf32>
    %51 = vector.shape_cast %50 : vector<1x16x1xf32> to vector<16x1xf32>
    %c0_33 = arith.constant 0 : index
    %c36 = arith.constant 36 : index
    %52 = vector.load %arg14[%c0_33, %c36] : memref<1x686xf32, #tpu.memory_space<vmem>>, vector<1x648xf32>
    %53 = vector.broadcast %51 : vector<16x1xf32> to vector<16x648xf32>
    %54 = vector.broadcast %52 : vector<1x648xf32> to vector<16x648xf32>
    %55 = arith.mulf %53, %54 : vector<16x648xf32>
    %56 = arith.addf %49, %55 : vector<16x648xf32>
    %c7 = arith.constant 7 : index
    %c0_34 = arith.constant 0 : index
    %c0_35 = arith.constant 0 : index
    %57 = vector.load %arg2[%c7, %c0_34, %c0_35] : memref<9x16x1xf32, #tpu.memory_space<vmem>>, vector<1x16x1xf32>
    %58 = vector.shape_cast %57 : vector<1x16x1xf32> to vector<16x1xf32>
    %c0_36 = arith.constant 0 : index
    %c37 = arith.constant 37 : index
    %59 = vector.load %arg14[%c0_36, %c37] : memref<1x686xf32, #tpu.memory_space<vmem>>, vector<1x648xf32>
    %60 = vector.broadcast %58 : vector<16x1xf32> to vector<16x648xf32>
    %61 = vector.broadcast %59 : vector<1x648xf32> to vector<16x648xf32>
    %62 = arith.mulf %60, %61 : vector<16x648xf32>
    %63 = arith.addf %56, %62 : vector<16x648xf32>
    %c8 = arith.constant 8 : index
    %c0_37 = arith.constant 0 : index
    %c0_38 = arith.constant 0 : index
    %64 = vector.load %arg2[%c8, %c0_37, %c0_38] : memref<9x16x1xf32, #tpu.memory_space<vmem>>, vector<1x16x1xf32>
    %65 = vector.shape_cast %64 : vector<1x16x1xf32> to vector<16x1xf32>
    %c0_39 = arith.constant 0 : index
    %c38 = arith.constant 38 : index
    %66 = vector.load %arg14[%c0_39, %c38] : memref<1x686xf32, #tpu.memory_space<vmem>>, vector<1x648xf32>
    %67 = vector.broadcast %65 : vector<16x1xf32> to vector<16x648xf32>
    %68 = vector.broadcast %66 : vector<1x648xf32> to vector<16x648xf32>
    %69 = arith.mulf %67, %68 : vector<16x648xf32>
    %70 = arith.addf %63, %69 : vector<16x648xf32>
    %c0_40 = arith.constant 0 : index
    %c0_41 = arith.constant 0 : index
    %71 = vector.load %arg3[%c0_40, %c0_41] : memref<16x1xf32, #tpu.memory_space<vmem>>, vector<16x1xf32>
    %72 = vector.broadcast %71 : vector<16x1xf32> to vector<16x648xf32>
    %73 = arith.addf %70, %72 : vector<16x648xf32>
    %cst_42 = arith.constant 0.000000e+00 : f32
    %74 = vector.broadcast %cst_42 : f32 to vector<16x648xf32>
    %75 = arith.maximumf %73, %74 : vector<16x648xf32>
    %c0_43 = arith.constant 0 : index
    %c0_44 = arith.constant 0 : index
    %76 = vector.load %arg15[%c0_43, %c0_44] : memref<16x667xf32, #tpu.memory_space<vmem>>, vector<16x648xf32>
    tpu.vector_store %arg15[%c0_43, %c0_44], %75 {strides = array<i32>} : memref<16x667xf32, #tpu.memory_space<vmem>>, vector<16x648xf32>,
    %cst_45 = arith.constant 0.000000e+00 : f32
    %77 = vector.broadcast %cst_45 : f32 to vector<16x19xf32>
    %c0_46 = arith.constant 0 : index
    %c648 = arith.constant 648 : index
    %78 = vector.load %arg15[%c0_46, %c648] : memref<16x667xf32, #tpu.memory_space<vmem>>, vector<16x19xf32>
    tpu.vector_store %arg15[%c0_46, %c648], %77 {strides = array<i32>} : memref<16x667xf32, #tpu.memory_space<vmem>>, vector<16x19xf32>,
    %c0_47 = arith.constant 0 : index
    %c0_48 = arith.constant 0 : index
    %79 = vector.load %arg15[%c0_47, %c0_48] : memref<16x667xf32, #tpu.memory_space<vmem>>, vector<16x648xf32>
    %c0_49 = arith.constant 0 : index
    %c1_50 = arith.constant 1 : index
    %80 = vector.load %arg15[%c0_49, %c1_50] : memref<16x667xf32, #tpu.memory_space<vmem>>, vector<16x648xf32>
    %81 = arith.maximumf %79, %80 : vector<16x648xf32>
    %c0_51 = arith.constant 0 : index
    %c18_52 = arith.constant 18 : index
    %82 = vector.load %arg15[%c0_51, %c18_52] : memref<16x667xf32, #tpu.memory_space<vmem>>, vector<16x648xf32>
    %c0_53 = arith.constant 0 : index
    %c19_54 = arith.constant 19 : index
    %83 = vector.load %arg15[%c0_53, %c19_54] : memref<16x667xf32, #tpu.memory_space<vmem>>, vector<16x648xf32>
    %84 = arith.maximumf %82, %83 : vector<16x648xf32>
    %85 = arith.maximumf %81, %84 : vector<16x648xf32>
    %86 = arith.truncf %85 : vector<16x648xf32> to vector<16x648xbf16>
    %c0_55 = arith.constant 0 : index
    %c0_56 = arith.constant 0 : index
    %87 = vector.load %arg4[%c0_55, %c0_56] : memref<648x200xbf16, #tpu.memory_space<vmem>>, vector<648x200xbf16>
    %cst_57 = arith.constant dense<0.000000e+00> : vector<16x200xf32>
    %88 = tpu.matmul %86, %87, %cst_57 {dimension_numbers = #tpu.dot_dimension_numbers<[1], [0], [0], [1], [0, 0, 1, 1], [], []>} : vector<16x648xbf16>, vector<648x200xbf16>, vector<16x200xf32> -> vector<16x200xf32>
    %cst_58 = arith.constant 0.000000e+00 : f32
    %89 = vector.broadcast %cst_58 : f32 to vector<16x11xf32>
    %c0_59 = arith.constant 0 : index
    %c0_60 = arith.constant 0 : index
    %90 = vector.load %arg16[%c0_59, %c0_60] : memref<16x222xf32, #tpu.memory_space<vmem>>, vector<16x11xf32>
    tpu.vector_store %arg16[%c0_59, %c0_60], %89 {strides = array<i32>} : memref<16x222xf32, #tpu.memory_space<vmem>>, vector<16x11xf32>,
    %cst_61 = arith.constant 0.000000e+00 : f32
    %91 = vector.broadcast %cst_61 : f32 to vector<16x11xf32>
    %c0_62 = arith.constant 0 : index
    %c211 = arith.constant 211 : index
    %92 = vector.load %arg16[%c0_62, %c211] : memref<16x222xf32, #tpu.memory_space<vmem>>, vector<16x11xf32>
    tpu.vector_store %arg16[%c0_62, %c211], %91 {strides = array<i32>} : memref<16x222xf32, #tpu.memory_space<vmem>>, vector<16x11xf32>,
    %c0_63 = arith.constant 0 : index
    %c11 = arith.constant 11 : index
    %93 = vector.load %arg16[%c0_63, %c11] : memref<16x222xf32, #tpu.memory_space<vmem>>, vector<16x200xf32>
    tpu.vector_store %arg16[%c0_63, %c11], %88 {strides = array<i32>} : memref<16x222xf32, #tpu.memory_space<vmem>>, vector<16x200xf32>,
    %c0_64 = arith.constant 0 : index
    %c0_65 = arith.constant 0 : index
    %94 = vector.load %arg16[%c0_64, %c0_65] : memref<16x222xf32, #tpu.memory_space<vmem>>, vector<16x200xf32>
    %95 = arith.truncf %94 : vector<16x200xf32> to vector<16x200xbf16>
    %c0_66 = arith.constant 0 : index
    %c0_67 = arith.constant 0 : index
    %96 = vector.load %arg17[%c0_66, %c0_67] : memref<144x200xbf16, #tpu.memory_space<vmem>>, vector<16x200xbf16>
    tpu.vector_store %arg17[%c0_66, %c0_67], %95 {strides = array<i32>} : memref<144x200xbf16, #tpu.memory_space<vmem>>, vector<16x200xbf16>,
    %c0_68 = arith.constant 0 : index
    %c1_69 = arith.constant 1 : index
    %97 = vector.load %arg16[%c0_68, %c1_69] : memref<16x222xf32, #tpu.memory_space<vmem>>, vector<16x200xf32>
    %98 = arith.truncf %97 : vector<16x200xf32> to vector<16x200xbf16>
    %c16 = arith.constant 16 : index
    %c0_70 = arith.constant 0 : index
    %99 = vector.load %arg17[%c16, %c0_70] : memref<144x200xbf16, #tpu.memory_space<vmem>>, vector<16x200xbf16>
    tpu.vector_store %arg17[%c16, %c0_70], %98 {strides = array<i32>} : memref<144x200xbf16, #tpu.memory_space<vmem>>, vector<16x200xbf16>,
    %c0_71 = arith.constant 0 : index
    %c2_72 = arith.constant 2 : index
    %100 = vector.load %arg16[%c0_71, %c2_72] : memref<16x222xf32, #tpu.memory_space<vmem>>, vector<16x200xf32>
    %101 = arith.truncf %100 : vector<16x200xf32> to vector<16x200xbf16>
    %c32 = arith.constant 32 : index
    %c0_73 = arith.constant 0 : index
    %102 = vector.load %arg17[%c32, %c0_73] : memref<144x200xbf16, #tpu.memory_space<vmem>>, vector<16x200xbf16>
    tpu.vector_store %arg17[%c32, %c0_73], %101 {strides = array<i32>} : memref<144x200xbf16, #tpu.memory_space<vmem>>, vector<16x200xbf16>,
    %c0_74 = arith.constant 0 : index
    %c10 = arith.constant 10 : index
    %103 = vector.load %arg16[%c0_74, %c10] : memref<16x222xf32, #tpu.memory_space<vmem>>, vector<16x200xf32>
    %104 = arith.truncf %103 : vector<16x200xf32> to vector<16x200xbf16>
    %c48 = arith.constant 48 : index
    %c0_75 = arith.constant 0 : index
    %105 = vector.load %arg17[%c48, %c0_75] : memref<144x200xbf16, #tpu.memory_space<vmem>>, vector<16x200xbf16>
    tpu.vector_store %arg17[%c48, %c0_75], %104 {strides = array<i32>} : memref<144x200xbf16, #tpu.memory_space<vmem>>, vector<16x200xbf16>,
    %c0_76 = arith.constant 0 : index
    %c11_77 = arith.constant 11 : index
    %106 = vector.load %arg16[%c0_76, %c11_77] : memref<16x222xf32, #tpu.memory_space<vmem>>, vector<16x200xf32>
    %107 = arith.truncf %106 : vector<16x200xf32> to vector<16x200xbf16>
    %c64 = arith.constant 64 : index
    %c0_78 = arith.constant 0 : index
    %108 = vector.load %arg17[%c64, %c0_78] : memref<144x200xbf16, #tpu.memory_space<vmem>>, vector<16x200xbf16>
    tpu.vector_store %arg17[%c64, %c0_78], %107 {strides = array<i32>} : memref<144x200xbf16, #tpu.memory_space<vmem>>, vector<16x200xbf16>,
    %c0_79 = arith.constant 0 : index
    %c12 = arith.constant 12 : index
    %109 = vector.load %arg16[%c0_79, %c12] : memref<16x222xf32, #tpu.memory_space<vmem>>, vector<16x200xf32>
    %110 = arith.truncf %109 : vector<16x200xf32> to vector<16x200xbf16>
    %c80 = arith.constant 80 : index
    %c0_80 = arith.constant 0 : index
    %111 = vector.load %arg17[%c80, %c0_80] : memref<144x200xbf16, #tpu.memory_space<vmem>>, vector<16x200xbf16>
    tpu.vector_store %arg17[%c80, %c0_80], %110 {strides = array<i32>} : memref<144x200xbf16, #tpu.memory_space<vmem>>, vector<16x200xbf16>,
    %c0_81 = arith.constant 0 : index
    %c20_82 = arith.constant 20 : index
    %112 = vector.load %arg16[%c0_81, %c20_82] : memref<16x222xf32, #tpu.memory_space<vmem>>, vector<16x200xf32>
    %113 = arith.truncf %112 : vector<16x200xf32> to vector<16x200xbf16>
    %c96 = arith.constant 96 : index
    %c0_83 = arith.constant 0 : index
    %114 = vector.load %arg17[%c96, %c0_83] : memref<144x200xbf16, #tpu.memory_space<vmem>>, vector<16x200xbf16>
    tpu.vector_store %arg17[%c96, %c0_83], %113 {strides = array<i32>} : memref<144x200xbf16, #tpu.memory_space<vmem>>, vector<16x200xbf16>,
    %c0_84 = arith.constant 0 : index
    %c21 = arith.constant 21 : index
    %115 = vector.load %arg16[%c0_84, %c21] : memref<16x222xf32, #tpu.memory_space<vmem>>, vector<16x200xf32>
    %116 = arith.truncf %115 : vector<16x200xf32> to vector<16x200xbf16>
    %c112 = arith.constant 112 : index
    %c0_85 = arith.constant 0 : index
    %117 = vector.load %arg17[%c112, %c0_85] : memref<144x200xbf16, #tpu.memory_space<vmem>>, vector<16x200xbf16>
    tpu.vector_store %arg17[%c112, %c0_85], %116 {strides = array<i32>} : memref<144x200xbf16, #tpu.memory_space<vmem>>, vector<16x200xbf16>,
    %c0_86 = arith.constant 0 : index
    %c22 = arith.constant 22 : index
    %118 = vector.load %arg16[%c0_86, %c22] : memref<16x222xf32, #tpu.memory_space<vmem>>, vector<16x200xf32>
    %119 = arith.truncf %118 : vector<16x200xf32> to vector<16x200xbf16>
    %c128 = arith.constant 128 : index
    %c0_87 = arith.constant 0 : index
    %120 = vector.load %arg17[%c128, %c0_87] : memref<144x200xbf16, #tpu.memory_space<vmem>>, vector<16x200xbf16>
    tpu.vector_store %arg17[%c128, %c0_87], %119 {strides = array<i32>} : memref<144x200xbf16, #tpu.memory_space<vmem>>, vector<16x200xbf16>,
    %c0_88 = arith.constant 0 : index
    %c0_89 = arith.constant 0 : index
    %121 = vector.load %arg5[%c0_88, %c0_89] : memref<8x144xbf16, #tpu.memory_space<vmem>>, vector<8x144xbf16>
    %c0_90 = arith.constant 0 : index
    %c0_91 = arith.constant 0 : index
    %122 = vector.load %arg17[%c0_90, %c0_91] : memref<144x200xbf16, #tpu.memory_space<vmem>>, vector<144x200xbf16>
    %cst_92 = arith.constant dense<0.000000e+00> : vector<8x200xf32>
    %123 = tpu.matmul %121, %122, %cst_92 {dimension_numbers = #tpu.dot_dimension_numbers<[1], [0], [0], [1], [0, 0, 1, 1], [], []>} : vector<8x144xbf16>, vector<144x200xbf16>, vector<8x200xf32> -> vector<8x200xf32>
    %c0_93 = arith.constant 0 : index
    %c0_94 = arith.constant 0 : index
    %124 = vector.load %arg6[%c0_93, %c0_94] : memref<8x1xf32, #tpu.memory_space<vmem>>, vector<8x1xf32>
    %125 = vector.broadcast %124 : vector<8x1xf32> to vector<8x200xf32>
    %126 = arith.addf %123, %125 : vector<8x200xf32>
    %cst_95 = arith.constant 0.000000e+00 : f32
    %127 = vector.broadcast %cst_95 : f32 to vector<8x200xf32>
    %128 = arith.maximumf %126, %127 : vector<8x200xf32>
    %c0_96 = arith.constant 0 : index
    %c0_97 = arith.constant 0 : index
    %129 = vector.load %arg18[%c0_96, %c0_97] : memref<8x211xf32, #tpu.memory_space<vmem>>, vector<8x200xf32>
    tpu.vector_store %arg18[%c0_96, %c0_97], %128 {strides = array<i32>} : memref<8x211xf32, #tpu.memory_space<vmem>>, vector<8x200xf32>,
    %cst_98 = arith.constant 0.000000e+00 : f32
    %130 = vector.broadcast %cst_98 : f32 to vector<8x11xf32>
    %c0_99 = arith.constant 0 : index
    %c200 = arith.constant 200 : index
    %131 = vector.load %arg18[%c0_99, %c200] : memref<8x211xf32, #tpu.memory_space<vmem>>, vector<8x11xf32>
    tpu.vector_store %arg18[%c0_99, %c200], %130 {strides = array<i32>} : memref<8x211xf32, #tpu.memory_space<vmem>>, vector<8x11xf32>,
    %c0_100 = arith.constant 0 : index
    %c0_101 = arith.constant 0 : index
    %132 = vector.load %arg18[%c0_100, %c0_101] : memref<8x211xf32, #tpu.memory_space<vmem>>, vector<8x200xf32>
    %c0_102 = arith.constant 0 : index
    %c1_103 = arith.constant 1 : index
    %133 = vector.load %arg18[%c0_102, %c1_103] : memref<8x211xf32, #tpu.memory_space<vmem>>, vector<8x200xf32>
    %134 = arith.maximumf %132, %133 : vector<8x200xf32>
    %c0_104 = arith.constant 0 : index
    %c10_105 = arith.constant 10 : index
    %135 = vector.load %arg18[%c0_104, %c10_105] : memref<8x211xf32, #tpu.memory_space<vmem>>, vector<8x200xf32>
    %c0_106 = arith.constant 0 : index
    %c11_107 = arith.constant 11 : index
    %136 = vector.load %arg18[%c0_106, %c11_107] : memref<8x211xf32, #tpu.memory_space<vmem>>, vector<8x200xf32>
    %137 = arith.maximumf %135, %136 : vector<8x200xf32>
    %138 = arith.maximumf %134, %137 : vector<8x200xf32>
    %c0_108 = arith.constant 0 : index
    %c0_109 = arith.constant 0 : index
    %139 = vector.load %arg7[%c0_108, %c0_109] : memref<1x200xf32, #tpu.memory_space<vmem>>, vector<1x200xf32>
    %140 = vector.broadcast %139 : vector<1x200xf32> to vector<8x200xf32>
    %141 = arith.mulf %138, %140 : vector<8x200xf32>
    %cst_110 = arith.constant 0.000000e+00 : f32
    %142 = vector.broadcast %cst_110 : f32 to vector<8x11xf32>
    %c0_111 = arith.constant 0 : index
    %c0_112 = arith.constant 0 : index
    %143 = vector.load %arg19[%c0_111, %c0_112] : memref<8x222xf32, #tpu.memory_space<vmem>>, vector<8x11xf32>
    tpu.vector_store %arg19[%c0_111, %c0_112], %142 {strides = array<i32>} : memref<8x222xf32, #tpu.memory_space<vmem>>, vector<8x11xf32>,
    %cst_113 = arith.constant 0.000000e+00 : f32
    %144 = vector.broadcast %cst_113 : f32 to vector<8x11xf32>
    %c0_114 = arith.constant 0 : index
    %c211_115 = arith.constant 211 : index
    %145 = vector.load %arg19[%c0_114, %c211_115] : memref<8x222xf32, #tpu.memory_space<vmem>>, vector<8x11xf32>
    tpu.vector_store %arg19[%c0_114, %c211_115], %144 {strides = array<i32>} : memref<8x222xf32, #tpu.memory_space<vmem>>, vector<8x11xf32>,
    %c0_116 = arith.constant 0 : index
    %c11_117 = arith.constant 11 : index
    %146 = vector.load %arg19[%c0_116, %c11_117] : memref<8x222xf32, #tpu.memory_space<vmem>>, vector<8x200xf32>
    tpu.vector_store %arg19[%c0_116, %c11_117], %141 {strides = array<i32>} : memref<8x222xf32, #tpu.memory_space<vmem>>, vector<8x200xf32>,
    %c0_118 = arith.constant 0 : index
    %c0_119 = arith.constant 0 : index
    %147 = vector.load %arg19[%c0_118, %c0_119] : memref<8x222xf32, #tpu.memory_space<vmem>>, vector<8x200xf32>
    %148 = arith.truncf %147 : vector<8x200xf32> to vector<8x200xbf16>
    %c0_120 = arith.constant 0 : index
    %c0_121 = arith.constant 0 : index
    %149 = vector.load %arg20[%c0_120, %c0_121] : memref<72x200xbf16, #tpu.memory_space<vmem>>, vector<8x200xbf16>
    tpu.vector_store %arg20[%c0_120, %c0_121], %148 {strides = array<i32>} : memref<72x200xbf16, #tpu.memory_space<vmem>>, vector<8x200xbf16>,
    %c0_122 = arith.constant 0 : index
    %c1_123 = arith.constant 1 : index
    %150 = vector.load %arg19[%c0_122, %c1_123] : memref<8x222xf32, #tpu.memory_space<vmem>>, vector<8x200xf32>
    %151 = arith.truncf %150 : vector<8x200xf32> to vector<8x200xbf16>
    %c8_124 = arith.constant 8 : index
    %c0_125 = arith.constant 0 : index
    %152 = vector.load %arg20[%c8_124, %c0_125] : memref<72x200xbf16, #tpu.memory_space<vmem>>, vector<8x200xbf16>
    tpu.vector_store %arg20[%c8_124, %c0_125], %151 {strides = array<i32>} : memref<72x200xbf16, #tpu.memory_space<vmem>>, vector<8x200xbf16>,
    %c0_126 = arith.constant 0 : index
    %c2_127 = arith.constant 2 : index
    %153 = vector.load %arg19[%c0_126, %c2_127] : memref<8x222xf32, #tpu.memory_space<vmem>>, vector<8x200xf32>
    %154 = arith.truncf %153 : vector<8x200xf32> to vector<8x200xbf16>
    %c16_128 = arith.constant 16 : index
    %c0_129 = arith.constant 0 : index
    %155 = vector.load %arg20[%c16_128, %c0_129] : memref<72x200xbf16, #tpu.memory_space<vmem>>, vector<8x200xbf16>
    tpu.vector_store %arg20[%c16_128, %c0_129], %154 {strides = array<i32>} : memref<72x200xbf16, #tpu.memory_space<vmem>>, vector<8x200xbf16>,
    %c0_130 = arith.constant 0 : index
    %c10_131 = arith.constant 10 : index
    %156 = vector.load %arg19[%c0_130, %c10_131] : memref<8x222xf32, #tpu.memory_space<vmem>>, vector<8x200xf32>
    %157 = arith.truncf %156 : vector<8x200xf32> to vector<8x200xbf16>
    %c24 = arith.constant 24 : index
    %c0_132 = arith.constant 0 : index
    %158 = vector.load %arg20[%c24, %c0_132] : memref<72x200xbf16, #tpu.memory_space<vmem>>, vector<8x200xbf16>
    tpu.vector_store %arg20[%c24, %c0_132], %157 {strides = array<i32>} : memref<72x200xbf16, #tpu.memory_space<vmem>>, vector<8x200xbf16>,
    %c0_133 = arith.constant 0 : index
    %c11_134 = arith.constant 11 : index
    %159 = vector.load %arg19[%c0_133, %c11_134] : memref<8x222xf32, #tpu.memory_space<vmem>>, vector<8x200xf32>
    %160 = arith.truncf %159 : vector<8x200xf32> to vector<8x200xbf16>
    %c32_135 = arith.constant 32 : index
    %c0_136 = arith.constant 0 : index
    %161 = vector.load %arg20[%c32_135, %c0_136] : memref<72x200xbf16, #tpu.memory_space<vmem>>, vector<8x200xbf16>
    tpu.vector_store %arg20[%c32_135, %c0_136], %160 {strides = array<i32>} : memref<72x200xbf16, #tpu.memory_space<vmem>>, vector<8x200xbf16>,
    %c0_137 = arith.constant 0 : index
    %c12_138 = arith.constant 12 : index
    %162 = vector.load %arg19[%c0_137, %c12_138] : memref<8x222xf32, #tpu.memory_space<vmem>>, vector<8x200xf32>
    %163 = arith.truncf %162 : vector<8x200xf32> to vector<8x200xbf16>
    %c40 = arith.constant 40 : index
    %c0_139 = arith.constant 0 : index
    %164 = vector.load %arg20[%c40, %c0_139] : memref<72x200xbf16, #tpu.memory_space<vmem>>, vector<8x200xbf16>
    tpu.vector_store %arg20[%c40, %c0_139], %163 {strides = array<i32>} : memref<72x200xbf16, #tpu.memory_space<vmem>>, vector<8x200xbf16>,
    %c0_140 = arith.constant 0 : index
    %c20_141 = arith.constant 20 : index
    %165 = vector.load %arg19[%c0_140, %c20_141] : memref<8x222xf32, #tpu.memory_space<vmem>>, vector<8x200xf32>
    %166 = arith.truncf %165 : vector<8x200xf32> to vector<8x200xbf16>
    %c48_142 = arith.constant 48 : index
    %c0_143 = arith.constant 0 : index
    %167 = vector.load %arg20[%c48_142, %c0_143] : memref<72x200xbf16, #tpu.memory_space<vmem>>, vector<8x200xbf16>
    tpu.vector_store %arg20[%c48_142, %c0_143], %166 {strides = array<i32>} : memref<72x200xbf16, #tpu.memory_space<vmem>>, vector<8x200xbf16>,
    %c0_144 = arith.constant 0 : index
    %c21_145 = arith.constant 21 : index
    %168 = vector.load %arg19[%c0_144, %c21_145] : memref<8x222xf32, #tpu.memory_space<vmem>>, vector<8x200xf32>
    %169 = arith.truncf %168 : vector<8x200xf32> to vector<8x200xbf16>
    %c56 = arith.constant 56 : index
    %c0_146 = arith.constant 0 : index
    %170 = vector.load %arg20[%c56, %c0_146] : memref<72x200xbf16, #tpu.memory_space<vmem>>, vector<8x200xbf16>
    tpu.vector_store %arg20[%c56, %c0_146], %169 {strides = array<i32>} : memref<72x200xbf16, #tpu.memory_space<vmem>>, vector<8x200xbf16>,
    %c0_147 = arith.constant 0 : index
    %c22_148 = arith.constant 22 : index
    %171 = vector.load %arg19[%c0_147, %c22_148] : memref<8x222xf32, #tpu.memory_space<vmem>>, vector<8x200xf32>
    %172 = arith.truncf %171 : vector<8x200xf32> to vector<8x200xbf16>
    %c64_149 = arith.constant 64 : index
    %c0_150 = arith.constant 0 : index
    %173 = vector.load %arg20[%c64_149, %c0_150] : memref<72x200xbf16, #tpu.memory_space<vmem>>, vector<8x200xbf16>
    tpu.vector_store %arg20[%c64_149, %c0_150], %172 {strides = array<i32>} : memref<72x200xbf16, #tpu.memory_space<vmem>>, vector<8x200xbf16>,
    %c0_151 = arith.constant 0 : index
    %c0_152 = arith.constant 0 : index
    %174 = vector.load %arg8[%c0_151, %c0_152] : memref<16x72xbf16, #tpu.memory_space<vmem>>, vector<16x72xbf16>
    %c0_153 = arith.constant 0 : index
    %c0_154 = arith.constant 0 : index
    %175 = vector.load %arg20[%c0_153, %c0_154] : memref<72x200xbf16, #tpu.memory_space<vmem>>, vector<72x200xbf16>
    %cst_155 = arith.constant dense<0.000000e+00> : vector<16x200xf32>
    %176 = tpu.matmul %174, %175, %cst_155 {dimension_numbers = #tpu.dot_dimension_numbers<[1], [0], [0], [1], [0, 0, 1, 1], [], []>} : vector<16x72xbf16>, vector<72x200xbf16>, vector<16x200xf32> -> vector<16x200xf32>
    %c0_156 = arith.constant 0 : index
    %c0_157 = arith.constant 0 : index
    %177 = vector.load %arg9[%c0_156, %c0_157] : memref<16x1xf32, #tpu.memory_space<vmem>>, vector<16x1xf32>
    %178 = vector.broadcast %177 : vector<16x1xf32> to vector<16x200xf32>
    %179 = arith.addf %176, %178 : vector<16x200xf32>
    %cst_158 = arith.constant 0.000000e+00 : f32
    %180 = vector.broadcast %cst_158 : f32 to vector<16x200xf32>
    %181 = arith.maximumf %179, %180 : vector<16x200xf32>
    %182 = arith.truncf %181 : vector<16x200xf32> to vector<16x200xbf16>
    %c0_159 = arith.constant 0 : index
    %c0_160 = arith.constant 0 : index
    %183 = vector.load %arg10[%c0_159, %c0_160] : memref<200x800xbf16, #tpu.memory_space<vmem>>, vector<200x800xbf16>
    %cst_161 = arith.constant dense<0.000000e+00> : vector<16x800xf32>
    %184 = tpu.matmul %182, %183, %cst_161 {dimension_numbers = #tpu.dot_dimension_numbers<[1], [0], [0], [1], [0, 0, 1, 1], [], []>} : vector<16x200xbf16>, vector<200x800xbf16>, vector<16x800xf32> -> vector<16x800xf32>
    %cst_162 = arith.constant 0.000000e+00 : f32
    %185 = vector.broadcast %cst_162 : f32 to vector<16x21xf32>
    %c0_163 = arith.constant 0 : index
    %c0_164 = arith.constant 0 : index
    %186 = vector.load %arg21[%c0_163, %c0_164] : memref<16x842xf32, #tpu.memory_space<vmem>>, vector<16x21xf32>
    tpu.vector_store %arg21[%c0_163, %c0_164], %185 {strides = array<i32>} : memref<16x842xf32, #tpu.memory_space<vmem>>, vector<16x21xf32>,
    %cst_165 = arith.constant 0.000000e+00 : f32
    %187 = vector.broadcast %cst_165 : f32 to vector<16x21xf32>
    %c0_166 = arith.constant 0 : index
    %c821 = arith.constant 821 : index
    %188 = vector.load %arg21[%c0_166, %c821] : memref<16x842xf32, #tpu.memory_space<vmem>>, vector<16x21xf32>
    tpu.vector_store %arg21[%c0_166, %c821], %187 {strides = array<i32>} : memref<16x842xf32, #tpu.memory_space<vmem>>, vector<16x21xf32>,
    %c0_167 = arith.constant 0 : index
    %c21_168 = arith.constant 21 : index
    %189 = vector.load %arg21[%c0_167, %c21_168] : memref<16x842xf32, #tpu.memory_space<vmem>>, vector<16x800xf32>
    tpu.vector_store %arg21[%c0_167, %c21_168], %184 {strides = array<i32>} : memref<16x842xf32, #tpu.memory_space<vmem>>, vector<16x800xf32>,
    %c0_169 = arith.constant 0 : index
    %c0_170 = arith.constant 0 : index
    %190 = vector.load %arg21[%c0_169, %c0_170] : memref<16x842xf32, #tpu.memory_space<vmem>>, vector<16x800xf32>
    %191 = arith.truncf %190 : vector<16x800xf32> to vector<16x800xbf16>
    %c0_171 = arith.constant 0 : index
    %c0_172 = arith.constant 0 : index
    %192 = vector.load %arg22[%c0_171, %c0_172] : memref<144x800xbf16, #tpu.memory_space<vmem>>, vector<16x800xbf16>
    tpu.vector_store %arg22[%c0_171, %c0_172], %191 {strides = array<i32>} : memref<144x800xbf16, #tpu.memory_space<vmem>>, vector<16x800xbf16>,
    %c0_173 = arith.constant 0 : index
    %c1_174 = arith.constant 1 : index
    %193 = vector.load %arg21[%c0_173, %c1_174] : memref<16x842xf32, #tpu.memory_space<vmem>>, vector<16x800xf32>
    %194 = arith.truncf %193 : vector<16x800xf32> to vector<16x800xbf16>
    %c16_175 = arith.constant 16 : index
    %c0_176 = arith.constant 0 : index
    %195 = vector.load %arg22[%c16_175, %c0_176] : memref<144x800xbf16, #tpu.memory_space<vmem>>, vector<16x800xbf16>
    tpu.vector_store %arg22[%c16_175, %c0_176], %194 {strides = array<i32>} : memref<144x800xbf16, #tpu.memory_space<vmem>>, vector<16x800xbf16>,
    %c0_177 = arith.constant 0 : index
    %c2_178 = arith.constant 2 : index
    %196 = vector.load %arg21[%c0_177, %c2_178] : memref<16x842xf32, #tpu.memory_space<vmem>>, vector<16x800xf32>
    %197 = arith.truncf %196 : vector<16x800xf32> to vector<16x800xbf16>
    %c32_179 = arith.constant 32 : index
    %c0_180 = arith.constant 0 : index
    %198 = vector.load %arg22[%c32_179, %c0_180] : memref<144x800xbf16, #tpu.memory_space<vmem>>, vector<16x800xbf16>
    tpu.vector_store %arg22[%c32_179, %c0_180], %197 {strides = array<i32>} : memref<144x800xbf16, #tpu.memory_space<vmem>>, vector<16x800xbf16>,
    %c0_181 = arith.constant 0 : index
    %c20_182 = arith.constant 20 : index
    %199 = vector.load %arg21[%c0_181, %c20_182] : memref<16x842xf32, #tpu.memory_space<vmem>>, vector<16x800xf32>
    %200 = arith.truncf %199 : vector<16x800xf32> to vector<16x800xbf16>
    %c48_183 = arith.constant 48 : index
    %c0_184 = arith.constant 0 : index
    %201 = vector.load %arg22[%c48_183, %c0_184] : memref<144x800xbf16, #tpu.memory_space<vmem>>, vector<16x800xbf16>
    tpu.vector_store %arg22[%c48_183, %c0_184], %200 {strides = array<i32>} : memref<144x800xbf16, #tpu.memory_space<vmem>>, vector<16x800xbf16>,
    %c0_185 = arith.constant 0 : index
    %c21_186 = arith.constant 21 : index
    %202 = vector.load %arg21[%c0_185, %c21_186] : memref<16x842xf32, #tpu.memory_space<vmem>>, vector<16x800xf32>
    %203 = arith.truncf %202 : vector<16x800xf32> to vector<16x800xbf16>
    %c64_187 = arith.constant 64 : index
    %c0_188 = arith.constant 0 : index
    %204 = vector.load %arg22[%c64_187, %c0_188] : memref<144x800xbf16, #tpu.memory_space<vmem>>, vector<16x800xbf16>
    tpu.vector_store %arg22[%c64_187, %c0_188], %203 {strides = array<i32>} : memref<144x800xbf16, #tpu.memory_space<vmem>>, vector<16x800xbf16>,
    %c0_189 = arith.constant 0 : index
    %c22_190 = arith.constant 22 : index
    %205 = vector.load %arg21[%c0_189, %c22_190] : memref<16x842xf32, #tpu.memory_space<vmem>>, vector<16x800xf32>
    %206 = arith.truncf %205 : vector<16x800xf32> to vector<16x800xbf16>
    %c80_191 = arith.constant 80 : index
    %c0_192 = arith.constant 0 : index
    %207 = vector.load %arg22[%c80_191, %c0_192] : memref<144x800xbf16, #tpu.memory_space<vmem>>, vector<16x800xbf16>
    tpu.vector_store %arg22[%c80_191, %c0_192], %206 {strides = array<i32>} : memref<144x800xbf16, #tpu.memory_space<vmem>>, vector<16x800xbf16>,
    %c0_193 = arith.constant 0 : index
    %c40_194 = arith.constant 40 : index
    %208 = vector.load %arg21[%c0_193, %c40_194] : memref<16x842xf32, #tpu.memory_space<vmem>>, vector<16x800xf32>
    %209 = arith.truncf %208 : vector<16x800xf32> to vector<16x800xbf16>
    %c96_195 = arith.constant 96 : index
    %c0_196 = arith.constant 0 : index
    %210 = vector.load %arg22[%c96_195, %c0_196] : memref<144x800xbf16, #tpu.memory_space<vmem>>, vector<16x800xbf16>
    tpu.vector_store %arg22[%c96_195, %c0_196], %209 {strides = array<i32>} : memref<144x800xbf16, #tpu.memory_space<vmem>>, vector<16x800xbf16>,
    %c0_197 = arith.constant 0 : index
    %c41 = arith.constant 41 : index
    %211 = vector.load %arg21[%c0_197, %c41] : memref<16x842xf32, #tpu.memory_space<vmem>>, vector<16x800xf32>
    %212 = arith.truncf %211 : vector<16x800xf32> to vector<16x800xbf16>
    %c112_198 = arith.constant 112 : index
    %c0_199 = arith.constant 0 : index
    %213 = vector.load %arg22[%c112_198, %c0_199] : memref<144x800xbf16, #tpu.memory_space<vmem>>, vector<16x800xbf16>
    tpu.vector_store %arg22[%c112_198, %c0_199], %212 {strides = array<i32>} : memref<144x800xbf16, #tpu.memory_space<vmem>>, vector<16x800xbf16>,
    %c0_200 = arith.constant 0 : index
    %c42 = arith.constant 42 : index
    %214 = vector.load %arg21[%c0_200, %c42] : memref<16x842xf32, #tpu.memory_space<vmem>>, vector<16x800xf32>
    %215 = arith.truncf %214 : vector<16x800xf32> to vector<16x800xbf16>
    %c128_201 = arith.constant 128 : index
    %c0_202 = arith.constant 0 : index
    %216 = vector.load %arg22[%c128_201, %c0_202] : memref<144x800xbf16, #tpu.memory_space<vmem>>, vector<16x800xbf16>
    tpu.vector_store %arg22[%c128_201, %c0_202], %215 {strides = array<i32>} : memref<144x800xbf16, #tpu.memory_space<vmem>>, vector<16x800xbf16>,
    %c0_203 = arith.constant 0 : index
    %c0_204 = arith.constant 0 : index
    %217 = vector.load %arg11[%c0_203, %c0_204] : memref<1x144xbf16, #tpu.memory_space<vmem>>, vector<1x144xbf16>
    %c0_205 = arith.constant 0 : index
    %c0_206 = arith.constant 0 : index
    %218 = vector.load %arg22[%c0_205, %c0_206] : memref<144x800xbf16, #tpu.memory_space<vmem>>, vector<144x800xbf16>
    %cst_207 = arith.constant dense<0.000000e+00> : vector<1x800xf32>
    %219 = tpu.matmul %217, %218, %cst_207 {dimension_numbers = #tpu.dot_dimension_numbers<[1], [0], [0], [1], [0, 0, 1, 1], [], []>} : vector<1x144xbf16>, vector<144x800xbf16>, vector<1x800xf32> -> vector<1x800xf32>
    %c0_208 = arith.constant 0 : index
    %c0_209 = arith.constant 0 : index
    %220 = vector.load %arg12[%c0_208, %c0_209] : memref<1x1xf32, #tpu.memory_space<vmem>>, vector<1x1xf32>
    %221 = vector.broadcast %220 : vector<1x1xf32> to vector<1x800xf32>
    %222 = arith.addf %219, %221 : vector<1x800xf32>
    %cst_210 = arith.constant 0.000000e+00 : f32
    %223 = vector.broadcast %cst_210 : f32 to vector<1x800xf32>
    %224 = arith.subf %223, %222 : vector<1x800xf32>
    %225 = math.exp %224 : vector<1x800xf32>
    %cst_211 = arith.constant 1.000000e+00 : f32
    %226 = vector.broadcast %cst_211 : f32 to vector<1x800xf32>
    %227 = arith.addf %226, %225 : vector<1x800xf32>
    %228 = tpu.reciprocal %227 {approx = true} : vector<1x800xf32> -> vector<1x800xf32>
    %cst_212 = arith.constant 0.000000e+00 : f32
    %cst_213 = arith.constant 1.000000e+00 : f32
    %229 = vector.broadcast %cst_212 : f32 to vector<1x800xf32>
    %230 = arith.maximumf %229, %228 : vector<1x800xf32>
    %231 = vector.broadcast %cst_213 : f32 to vector<1x800xf32>
    %232 = arith.minimumf %231, %230 : vector<1x800xf32>
    %c0_214 = arith.constant 0 : index
    %c0_215 = arith.constant 0 : index
    %c0_216 = arith.constant 0 : index
    %233 = vector.load %arg13[%c0_214, %c0_215, %c0_216] : memref<1x1x800xf32, #tpu.memory_space<vmem>>, vector<1x1x800xf32>
    %234 = vector.shape_cast %233 : vector<1x1x800xf32> to vector<1x800xf32>
    %235 = vector.shape_cast %232 : vector<1x800xf32> to vector<1x1x800xf32>
    tpu.vector_store %arg13[%c0_214, %c0_215, %c0_216], %235 {strides = array<i32>} : memref<1x1x800xf32, #tpu.memory_space<vmem>>, vector<1x1x800xf32>,
    return
  }
  func.func @transform_0(%arg0: i32) -> (i32, i32, i32) {
    %c0_i32 = arith.constant 0 : i32
    %c0_i32_0 = arith.constant 0 : i32
    %c0_i32_1 = arith.constant 0 : i32
    return %arg0, %c0_i32, %c0_i32_0 : i32, i32, i32
  }
  func.func @transform_1(%arg0: i32) -> (i32, i32, i32) {
    %c0_i32 = arith.constant 0 : i32
    %c0_i32_0 = arith.constant 0 : i32
    %c0_i32_1 = arith.constant 0 : i32
    %c0_i32_2 = arith.constant 0 : i32
    return %c0_i32, %c0_i32_0, %c0_i32_1 : i32, i32, i32
  }
  func.func @transform_2(%arg0: i32) -> (i32, i32) {
    %c0_i32 = arith.constant 0 : i32
    %c0_i32_0 = arith.constant 0 : i32
    %c0_i32_1 = arith.constant 0 : i32
    return %c0_i32, %c0_i32_0 : i32, i32
  }
  func.func @transform_3(%arg0: i32) -> (i32, i32) {
    %c0_i32 = arith.constant 0 : i32
    %c0_i32_0 = arith.constant 0 : i32
    %c0_i32_1 = arith.constant 0 : i32
    return %c0_i32, %c0_i32_0 : i32, i32
  }
  func.func @transform_4(%arg0: i32) -> (i32, i32) {
    %c0_i32 = arith.constant 0 : i32
    %c0_i32_0 = arith.constant 0 : i32
    %c0_i32_1 = arith.constant 0 : i32
    return %c0_i32, %c0_i32_0 : i32, i32
  }
  func.func @transform_5(%arg0: i32) -> (i32, i32) {
    %c0_i32 = arith.constant 0 : i32
    %c0_i32_0 = arith.constant 0 : i32
    %c0_i32_1 = arith.constant 0 : i32
    return %c0_i32, %c0_i32_0 : i32, i32
  }
  func.func @transform_6(%arg0: i32) -> (i32, i32) {
    %c0_i32 = arith.constant 0 : i32
    %c0_i32_0 = arith.constant 0 : i32
    %c0_i32_1 = arith.constant 0 : i32
    return %c0_i32, %c0_i32_0 : i32, i32
  }
  func.func @transform_7(%arg0: i32) -> (i32, i32) {
    %c0_i32 = arith.constant 0 : i32
    %c0_i32_0 = arith.constant 0 : i32
    %c0_i32_1 = arith.constant 0 : i32
    return %c0_i32, %c0_i32_0 : i32, i32
  }
  func.func @transform_8(%arg0: i32) -> (i32, i32) {
    %c0_i32 = arith.constant 0 : i32
    %c0_i32_0 = arith.constant 0 : i32
    %c0_i32_1 = arith.constant 0 : i32
    return %c0_i32, %c0_i32_0 : i32, i32
  }
  func.func @transform_9(%arg0: i32) -> (i32, i32) {
    %c0_i32 = arith.constant 0 : i32
    %c0_i32_0 = arith.constant 0 : i32
    %c0_i32_1 = arith.constant 0 : i32
    return %c0_i32, %c0_i32_0 : i32, i32
  }
  func.func @transform_10(%arg0: i32) -> (i32, i32) {
    %c0_i32 = arith.constant 0 : i32
    %c0_i32_0 = arith.constant 0 : i32
    %c0_i32_1 = arith.constant 0 : i32
    return %c0_i32, %c0_i32_0 : i32, i32
  }
  func.func @transform_11(%arg0: i32) -> (i32, i32) {
    %c0_i32 = arith.constant 0 : i32
    %c0_i32_0 = arith.constant 0 : i32
    %c0_i32_1 = arith.constant 0 : i32
    return %c0_i32, %c0_i32_0 : i32, i32
  }
  func.func @transform_12(%arg0: i32) -> (i32, i32, i32) {
    %c0_i32 = arith.constant 0 : i32
    %c0_i32_0 = arith.constant 0 : i32
    %c0_i32_1 = arith.constant 0 : i32
    return %arg0, %c0_i32, %c0_i32_0 : i32, i32, i32
  }
}

</mosaic_0001>

<bundles_post_ra>
// kernel: autoencoder_forward.1
= control target key start
LH: loop header
LB: loop body
LE: loop exit
PB: predicated region body
PF: predicated region fallthrough
CT: control target
= control target key end

     0   :  { %s6542_s0 = inlined_call_operand.vmem [shape: f32[1,1,648], index: 0, kind: input, shape index: {}]   ;;  %s6543_s1 = inlined_call_operand.vmem [shape: f32[9,16,1], index: 1, kind: input, shape index: {}]   ;;  %s6544_s2 = inlined_call_operand.vmem [shape: f32[16,1], index: 2, kind: input, shape index: {}]   ;;  %s6545_s3 = inlined_call_operand.hbm [shape: bf16[648,200], index: 3, kind: input, shape index: {}]   ;;  %s6546_s4 = inlined_call_operand.vmem [shape: bf16[8,144], index: 4, kind: input, shape index: {}]   ;;  %s6547_s5 = inlined_call_operand.vmem [shape: f32[8,1], index: 5, kind: input, shape index: {}]   ;;  %s6548_s6 = inlined_call_operand.vmem [shape: f32[1,200], index: 6, kind: input, shape index: {}]   ;;  %s6549_s7 = inlined_call_operand.vmem [shape: bf16[16,72], index: 7, kind: input, shape index: {}]   ;;  %s6550_s8 = inlined_call_operand.vmem [shape: f32[16,1], index: 8, kind: input, shape index: {}]   ;;  %s6551_s9 = inlined_call_operand.vmem [shape: bf16[200,800], index: 9, kind: input, shape index: {}]   ;;  %s6552_s10 = inlined_call_operand.vmem [shape: bf16[1,144], index: 10, kind: input, shape index: {}]   ;;  %s6553_s11 = inlined_call_operand.<no memory space> [shape: f32[1,1], index: 11, kind: input, shape index: {}]   ;;  %s6554_s12 = inlined_call_operand.vmem [shape: f32[1,1,800], index: 12, kind: output, shape index: {}]  }
   0x1   :  { %v17_v0 = vstv %s6553_s11 }
   0x2   :  { %18 = vst [vmem:[#allocation11] sm:$0x1] %v17_v0 }
   0x3   :  { %19 = vsyncpa [#allocation13], 0  ;;  %s4720_s23 = smov [#allocation12]   ;;  %s4696_s27 = scalar_lea.hbm %s6545_s3, 10368 }
   0x4   :  { %s31_s24 = sshll.u32 %s4720_s23, 4  ;;  %p4697_p0 = scmp.ne.s32.totalorder %s6545_s3, %s4696_s27  ;;  %s32_s24 = int_to_ptr.vmem [resolvable:$true] %s31_s24 }
   0x5   :  { %p4700_p1 = scmp.lt.u32.totalorder %s4696_s27, %s6545_s3 }
   0x7   :  { %p4702_p2 = pnand %p4700_p1, %p4697_p0 }
   0x9   :  { %4705 = shalt.err (!%p4702_p2)
}
   0xa   :  { %s4706_s11 = scalar_lea.vmem %s32_s24, 10368  ;;  %p4711_p4 = scmp.lt.s32.totalorder %s32_s24, %s32_s24 }
   0xb   :  { %p4707_p3 = scmp.ne.s32.totalorder %s32_s24, %s4706_s11  ;;  %p4712_p5 = scmp.lt.s32.totalorder %s4706_s11, %s4706_s11 }
   0xd   :  { %p4713_p6 = por %p4712_p5, %p4711_p4 }
   0xf   :  { %p4714_p7 = pnand %p4713_p6, %p4707_p3 }
  0x11   :  { %4717 = shalt.err (!%p4714_p7)
}
  0x12   :  { %s4721_s14 = smov 128   ;;  %s4722_s15 = smov 8  }
  0x13   :  { %37 = dma.hbm_to_vmem [thread:$0]  %s6545_s3, 10368, %s32_s24, [#allocation13], %s4721_s14, %s4721_s14, %s4722_s15  }
  0x14   :  { %4718 = dma.done.wait [#allocation13], 10368  }
  0x15   :  { %4719 = vsyncadd [#allocation13], 4294956928  ;;  %v6555_v1 = vlaneseq  ;;  %v6557_v2 = vmov 0   ;;  %v6559_v3 = vmov 0.0   ;;  %v4071_v4 = vld [vmem:[%s6543_s1 + $0x18] sm:$0xff]  ;;  %s4725_s21 = smov 19  }
  0x16   :  { %4341 = vset.pattern.permute.xlu1 %v6557_v2  ;;  %4340 = vset.pattern.permute.xlu0 %v6557_v2  ;;  %v67_v5 = vld [vmem:[%s6542_s0] sm:$0x3f]  ;;  %v4070_v7 = vld [vmem:[%s6543_s1 + $0x10] sm:$0xff]  ;;  %v4073_v8 = vld [vmem:[%s6543_s1 + $0x28] sm:$0xff]  ;;  %vm72_vm6 = vcmask 154624   ;;  %s4727_s15 = smov 126  }
  0x17   :  { %vm60_vm0 = vcmp.lt.s32.totalorder %v6555_v1, 19  ;;  %vm63_vm1 = vcmp.ge.s32.totalorder %v6555_v1, 27  ;;  %vm64_vm2 = vcmp.lt.s32.totalorder %v6555_v1, 46  ;;  %157 = vperm.xlu1 %4341, %v4071_v4   ;;  %69 = vrot.lane.b32.xlu0 %v67_v5, %s4725_s21  ;;  %v4072_v6 = vld [vmem:[%s6543_s1 + $0x20] sm:$0xff]  ;;  %v4074_v9 = vld [vmem:[%s6543_s1 + $0x30] sm:$0xff]  ;;  %v4075_v10 = vld [vmem:[%s6543_s1 + $0x38] sm:$0xff] }
  0x18   :  { %vm65_vm3 = vmand %vm63_vm1, %vm64_vm2  ;;  %62 = vst.msk [vmem:[#allocation2] sm:$0x1] %vm60_vm0, %v6559_v3  ;;  %v4076_v11 = vld [vmem:[%s6543_s1 + $0x40] sm:$0xff]  ;;  %v4077_v12 = vld [vmem:[%s6543_s1 + $0x48] sm:$0xff]  ;;  %vm75_vm4 = vcmp.ge.s32.totalorder %v6555_v1, 19  ;;  %vm76_vm5 = vcmp.lt.s32.totalorder %v6555_v1, 667 }
  0x19   :  { %66 = vst.msk [vmem:[#allocation2 + $0x5] sm:$0x1] %vm65_vm3, %v6559_v3  ;;  %v4078_v13 = vld [vmem:[%s6543_s1 + $0x50] sm:$0xff]  ;;  %v4079_v14 = vld [vmem:[%s6543_s1 + $0x58] sm:$0xff]  ;;  %v4080_v15 = vld [vmem:[%s6543_s1 + $0x60] sm:$0xff]  ;;  %v4892_v26 = vshrl.u32 %v6555_v1, 7 }
  0x1a   :  { %v4081_v16 = vld [vmem:[%s6543_s1 + $0x68] sm:$0xff]  ;;  %v4082_v17 = vld [vmem:[%s6543_s1 + $0x70] sm:$0xff]  ;;  %v4083_v18 = vld [vmem:[%s6543_s1 + $0x78] sm:$0xff]  ;;  %s4728_s16 = smov 110   ;;  %s4729_s17 = smov 109   ;;  %vm208_vm8 = vcmask 1039360  }
  0x1b   :  { %248 = vperm.xlu1 %4341, %v4072_v6   ;;  %152 = vperm.xlu0 %4340, %v4070_v7   ;;  %v4084_v19 = vld [vmem:[%s6543_s1 + $0x80] sm:$0xff]  ;;  %v4085_v20 = vld [vmem:[%s6543_s1 + $0x88] sm:$0xff]  ;;  %vm77_vm7 = vmand %vm75_vm4, %vm76_vm5  ;;  %6586 = vst [vmem:[#allocation15_spill] sm:$0xff] %v4892_v26  ;;  %v6556_v27 = vsub.s32 1, %v4892_v26  ;;  %v103_v28 = vsub.s32 2, %v4892_v26  ;;  %v107_v30 = vsub.s32 3, %v4892_v26 }
  0x1c   :  { %v79_v21 = vld [vmem:[%s6543_s1] sm:$0xff]  ;;  %v80_v22 = vld [vmem:[%s6543_s1 + $0x8] sm:$0xff]  ;;  %v111_v31 = vsub.s32 4, %v4892_v26  ;;  %s4726_s1 = smov 127   ;;  %v4931_v42 = vsub.s32 0, %v4892_v26  ;;  %s4730_s3 = smov 108  }
  0x1d   :  { %s4731_s18 = smov 92   ;;  %s4733_s23 = smov 90   ;;  %vm304_vm9 = vcmask 1031168   ;;  %vm400_vm10 = vcmask 900096   ;;  %vm496_vm11 = vcmask 891904   ;;  %vm592_vm12 = vcmask 883712  }
  0x1e   :  { %6588 = vst [vmem:[#allocation17_spill] sm:$0xff] %v4931_v42  ;;  %vm688_vm13 = vcmask 752640   ;;  %vm784_vm14 = vcmask 744448   ;;  %vm880_vm15 = vcmask 736256   ;;  %vm956_vm0 = vcmask 64512   ;;  %s4734_s24 = smov 11  }
  0x1f   :  { %253 = vperm.xlu1 %4341, %v4073_v8   ;;  %344 = vperm.xlu0 %4340, %v4074_v9   ;;  %vm964_vm1 = vcmask 220224   ;;  %vm1614_vm2 = vcmask 1043456   ;;  %vm1750_vm3 = vcmask 89088   ;;  %vm1753_vm4 = vcmask 769688   ;;  %s4735_s25 = smov 118   ;;  %s4736_s26 = smov 117  }
  0x20   :  { %vm1774_vm5 = vcmask 1047640   ;;  %s4737_s27 = smov 116   ;;  %s4738_s28 = smov 107  }
  0x21   :  { %s4739_s30 = smov 106  }
  0x23   :  { %349 = vperm.xlu1 %4341, %v4075_v10   ;;  %440 = vperm.xlu0 %4340, %v4076_v11  }
  0x27   :  { %445 = vperm.xlu1 %4341, %v4077_v12   ;;  %536 = vperm.xlu0 %4340, %v4078_v13  }
  0x2b   :  { %541 = vperm.xlu1 %4341, %v4079_v14   ;;  %632 = vperm.xlu0 %4340, %v4080_v15  }
  0x2f   :  { %637 = vperm.xlu1 %4341, %v4081_v16   ;;  %728 = vperm.xlu0 %4340, %v4082_v17  }
  0x33   :  { %733 = vperm.xlu1 %4341, %v4083_v18   ;;  %824 = vperm.xlu0 %4340, %v4084_v19  }
  0x37   :  { %829 = vperm.xlu1 %4341, %v4085_v20   ;;  %84 = vperm.xlu0 %4340, %v79_v21  }
  0x3b   :  { %89 = vperm.xlu1 %4341, %v80_v22  }
  0x89   :  { %v70_v23 = vpop.permute.xlu0 %69 }
  0x8a   :  { %v71_v24 = vrot.slane %v70_v23, 7 }
  0x8c   :  { %v73_v25 = vsel %vm72_vm6, %v71_v24, %v70_v23  ;;  %vm1776_vm6 = vcmask 678912  }
  0x8d   :  { %78 = vst.msk [vmem:[#allocation2] sm:$0x3f] %vm77_vm7, %v73_v25  ;;  %vm1787_vm7 = vcmask 588800  }
  0x94   :  { %v4896_v29 = vld [vmem:[#allocation2] sm:$0x3f] }
  0x95   :  { %v4903_v32 = vrot.slane %v4896_v29, %v6556_v27  ;;  %v4906_v33 = vrot.slane %v4896_v29, %v103_v28  ;;  %v4915_v37 = vrot.slane %v4896_v29, %v107_v30  ;;  %v4918_v38 = vrot.slane %v4896_v29, %v111_v31 }
  0x96   :  { %v4926_v41 = vpop.permute.xlu1 %157  ;;  %v4941_v45 = vrot.slane %v4896_v29, %v4931_v42 }
  0x97   :  { %6587 = vst [vmem:[#allocation16_spill] sm:$0xff] %v4918_v38  ;;  %v168_v43 = vmul.f32 %v4926_v41, %v4906_v33  ;;  %v167_v44 = vmul.f32 %v4926_v41, %v4903_v32  ;;  %v170_v46 = vmul.f32 %v4926_v41, %v4918_v38  ;;  %v169_v47 = vmul.f32 %v4926_v41, %v4915_v37 }
  0x98   :  { %v166_v48 = vmul.f32 %v4926_v41, %v4941_v45 }
  0x9a   :  { %v4908_v34 = vpop.permute.xlu0 %152  ;;  %v4953_v50 = vpop.permute.xlu1 %248 }
  0x9b   :  { %v162_v35 = vmul.f32 %v4908_v34, %v4906_v33  ;;  %v161_v36 = vmul.f32 %v4908_v34, %v4903_v32  ;;  %v164_v39 = vmul.f32 %v4908_v34, %v4918_v38  ;;  %v163_v40 = vmul.f32 %v4908_v34, %v4915_v37 }
  0x9c   :  { %v160_v49 = vmul.f32 %v4908_v34, %v4941_v45  ;;  %v258_v51 = vmul.f32 %v4953_v50, %v4906_v33  ;;  %v257_v52 = vmul.f32 %v4953_v50, %v4903_v32  ;;  %v260_v53 = vmul.f32 %v4953_v50, %v4918_v38 }
  0x9d   :  { %188 = vrot.lane.b32.xlu1 %v162_v35, %s4726_s1  ;;  %186 = vrot.lane.b32.xlu0 %v161_v36, %s4726_s1  ;;  %v259_v54 = vmul.f32 %v4953_v50, %v4915_v37  ;;  %v256_v61 = vmul.f32 %v4953_v50, %v4941_v45 }
  0x9e   :  { %v4967_v55 = vpop.permute.xlu1 %253  ;;  %v4987_v62 = vpop.permute.xlu0 %344 }
  0x9f   :  { %v264_v56 = vmul.f32 %v4967_v55, %v4906_v33  ;;  %v263_v57 = vmul.f32 %v4967_v55, %v4903_v32  ;;  %v266_v58 = vmul.f32 %v4967_v55, %v4918_v38  ;;  %v265_v59 = vmul.f32 %v4967_v55, %v4915_v37 }
  0xa0   :  { %v262_v60 = vmul.f32 %v4967_v55, %v4941_v45  ;;  %v354_v63 = vmul.f32 %v4987_v62, %v4906_v33  ;;  %v353_v0 = vmul.f32 %v4987_v62, %v4903_v32  ;;  %v356_v4 = vmul.f32 %v4987_v62, %v4918_v38 }
  0xa1   :  { %192 = vrot.lane.b32.xlu1 %v164_v39, %s4726_s1  ;;  %190 = vrot.lane.b32.xlu0 %v163_v40, %s4726_s1  ;;  %v355_v5 = vmul.f32 %v4987_v62, %v4915_v37  ;;  %v352_v12 = vmul.f32 %v4987_v62, %v4941_v45 }
  0xa2   :  { %v5001_v6 = vpop.permute.xlu1 %349  ;;  %v5021_v13 = vpop.permute.xlu0 %440 }
  0xa3   :  { %v360_v7 = vmul.f32 %v5001_v6, %v4906_v33  ;;  %v359_v8 = vmul.f32 %v5001_v6, %v4903_v32  ;;  %v362_v9 = vmul.f32 %v5001_v6, %v4918_v38  ;;  %v361_v10 = vmul.f32 %v5001_v6, %v4915_v37 }
  0xa4   :  { %v358_v11 = vmul.f32 %v5001_v6, %v4941_v45  ;;  %v450_v14 = vmul.f32 %v5021_v13, %v4906_v33  ;;  %v449_v15 = vmul.f32 %v5021_v13, %v4903_v32  ;;  %v452_v16 = vmul.f32 %v5021_v13, %v4918_v38 }
  0xa5   :  { %200 = vrot.lane.b32.xlu1 %v168_v43, %s4726_s1  ;;  %198 = vrot.lane.b32.xlu0 %v167_v44, %s4726_s1  ;;  %v451_v17 = vmul.f32 %v5021_v13, %v4915_v37  ;;  %v448_v24 = vmul.f32 %v5021_v13, %v4941_v45 }
  0xa6   :  { %v5035_v18 = vpop.permute.xlu1 %445  ;;  %v5055_v25 = vpop.permute.xlu0 %536 }
  0xa7   :  { %v456_v19 = vmul.f32 %v5035_v18, %v4906_v33  ;;  %v455_v20 = vmul.f32 %v5035_v18, %v4903_v32  ;;  %v458_v21 = vmul.f32 %v5035_v18, %v4918_v38  ;;  %v457_v22 = vmul.f32 %v5035_v18, %v4915_v37 }
  0xa8   :  { %v454_v23 = vmul.f32 %v5035_v18, %v4941_v45  ;;  %v546_v28 = vmul.f32 %v5055_v25, %v4906_v33  ;;  %v545_v30 = vmul.f32 %v5055_v25, %v4903_v32  ;;  %v548_v31 = vmul.f32 %v5055_v25, %v4918_v38 }
  0xa9   :  { %204 = vrot.lane.b32.xlu1 %v170_v46, %s4726_s1  ;;  %202 = vrot.lane.b32.xlu0 %v169_v47, %s4726_s1  ;;  %v547_v35 = vmul.f32 %v5055_v25, %v4915_v37 }
  0xaa   :  { %v5069_v36 = vpop.permute.xlu1 %541  ;;  %v5083_v46 = vpop.permute.xlu0 %632 }
  0xab   :  { %v552_v39 = vmul.f32 %v5069_v36, %v4906_v33  ;;  %v551_v40 = vmul.f32 %v5069_v36, %v4903_v32  ;;  %v554_v43 = vmul.f32 %v5069_v36, %v4918_v38  ;;  %v553_v44 = vmul.f32 %v5069_v36, %v4915_v37 }
  0xad   :  { %196 = vrot.lane.b32.xlu1 %v166_v48, %s4726_s1  ;;  %184 = vrot.lane.b32.xlu0 %v160_v49, %s4726_s1  ;;  %v550_v48 = vmul.f32 %v5069_v36, %v4941_v45  ;;  %v544_v49 = vmul.f32 %v5055_v25, %v4941_v45 }
  0xae   :  { %v5085_v47 = vpop.permute.xlu1 %637 }
  0xb1   :  { %284 = vrot.lane.b32.xlu1 %v258_v51, %s4727_s15  ;;  %282 = vrot.lane.b32.xlu0 %v257_v52, %s4727_s15  ;;  %v5095_v51 = vpop.permute.xlu0 %728 }
  0xb2   :  { %v5097_v52 = vpop.permute.xlu1 %733 }
  0xb5   :  { %288 = vrot.lane.b32.xlu1 %v260_v53, %s4727_s15  ;;  %286 = vrot.lane.b32.xlu0 %v259_v54, %s4727_s15  ;;  %v642_v53 = vmul.f32 %v5083_v46, %v4906_v33  ;;  %v641_v54 = vmul.f32 %v5083_v46, %v4903_v32 }
  0xb9   :  { %296 = vrot.lane.b32.xlu1 %v264_v56, %s4727_s15  ;;  %294 = vrot.lane.b32.xlu0 %v263_v57, %s4727_s15  ;;  %v644_v56 = vmul.f32 %v5083_v46, %v4918_v38  ;;  %v643_v57 = vmul.f32 %v5083_v46, %v4915_v37 }
  0xbd   :  { %300 = vrot.lane.b32.xlu1 %v266_v58, %s4727_s15  ;;  %298 = vrot.lane.b32.xlu0 %v265_v59, %s4727_s15  ;;  %v5109_v58 = vpop.permute.xlu0 %824  ;;  %v5111_v59 = vpop.permute.xlu1 %829 }
  0xc1   :  { %292 = vrot.lane.b32.xlu1 %v262_v60, %s4727_s15  ;;  %280 = vrot.lane.b32.xlu0 %v256_v61, %s4727_s15  ;;  %v648_v60 = vmul.f32 %v5085_v47, %v4906_v33  ;;  %v647_v61 = vmul.f32 %v5085_v47, %v4903_v32 }
  0xc5   :  { %380 = vrot.lane.b32.xlu1 %v354_v63, %s4728_s16  ;;  %378 = vrot.lane.b32.xlu0 %v353_v0, %s4728_s16  ;;  %v5121_v63 = vpop.permute.xlu0 %84  ;;  %v5123_v0 = vpop.permute.xlu1 %89 }
  0xc6   :  { %6589 = vst [vmem:[#allocation18_spill] sm:$0xff] %v5121_v63  ;;  %6590 = vst [vmem:[#allocation19_spill] sm:$0xff] %v5123_v0 }
  0xc9   :  { %384 = vrot.lane.b32.xlu1 %v356_v4, %s4728_s16  ;;  %382 = vrot.lane.b32.xlu0 %v355_v5, %s4728_s16  ;;  %v650_v4 = vmul.f32 %v5085_v47, %v4918_v38  ;;  %v649_v5 = vmul.f32 %v5085_v47, %v4915_v37 }
  0xcd   :  { %392 = vrot.lane.b32.xlu1 %v360_v7, %s4728_s16  ;;  %390 = vrot.lane.b32.xlu0 %v359_v8, %s4728_s16  ;;  %v916_v7 = vld [vmem:[%s6544_s2 + $0x8] sm:$0xff]  ;;  %v915_v8 = vld [vmem:[%s6544_s2] sm:$0xff]  ;;  %s4732_s2 = smov 91  }
  0xd1   :  { %396 = vrot.lane.b32.xlu1 %v362_v9, %s4728_s16  ;;  %394 = vrot.lane.b32.xlu0 %v361_v10, %s4728_s16 }
  0xd5   :  { %388 = vrot.lane.b32.xlu1 %v358_v11, %s4728_s16  ;;  %376 = vrot.lane.b32.xlu0 %v352_v12, %s4728_s16 }
  0xd9   :  { %476 = vrot.lane.b32.xlu1 %v450_v14, %s4729_s17  ;;  %474 = vrot.lane.b32.xlu0 %v449_v15, %s4729_s17  ;;  %v646_v14 = vmul.f32 %v5085_v47, %v4941_v45  ;;  %v640_v15 = vmul.f32 %v5083_v46, %v4941_v45 }
  0xdd   :  { %480 = vrot.lane.b32.xlu1 %v452_v16, %s4729_s17  ;;  %478 = vrot.lane.b32.xlu0 %v451_v17, %s4729_s17 }
  0xe1   :  { %488 = vrot.lane.b32.xlu1 %v456_v19, %s4729_s17  ;;  %486 = vrot.lane.b32.xlu0 %v455_v20, %s4729_s17  ;;  %v738_v19 = vmul.f32 %v5095_v51, %v4906_v33  ;;  %v737_v20 = vmul.f32 %v5095_v51, %v4903_v32 }
  0xe5   :  { %492 = vrot.lane.b32.xlu1 %v458_v21, %s4729_s17  ;;  %490 = vrot.lane.b32.xlu0 %v457_v22, %s4729_s17 }
  0xe9   :  { %484 = vrot.lane.b32.xlu1 %v454_v23, %s4729_s17  ;;  %472 = vrot.lane.b32.xlu0 %v448_v24, %s4729_s17  ;;  %v740_v23 = vmul.f32 %v5095_v51, %v4918_v38  ;;  %v739_v24 = vmul.f32 %v5095_v51, %v4915_v37 }
  0xed   :  { %572 = vrot.lane.b32.xlu1 %v546_v28, %s4730_s3  ;;  %570 = vrot.lane.b32.xlu0 %v545_v30, %s4730_s3 }
  0xf1   :  { %576 = vrot.lane.b32.xlu1 %v548_v31, %s4730_s3  ;;  %574 = vrot.lane.b32.xlu0 %v547_v35, %s4730_s3  ;;  %v744_v31 = vmul.f32 %v5097_v52, %v4906_v33  ;;  %v743_v35 = vmul.f32 %v5097_v52, %v4903_v32 }
  0xf5   :  { %584 = vrot.lane.b32.xlu1 %v552_v39, %s4730_s3  ;;  %582 = vrot.lane.b32.xlu0 %v551_v40, %s4730_s3 }
  0xf9   :  { %588 = vrot.lane.b32.xlu1 %v554_v43, %s4730_s3  ;;  %586 = vrot.lane.b32.xlu0 %v553_v44, %s4730_s3  ;;  %v746_v43 = vmul.f32 %v5097_v52, %v4918_v38  ;;  %v745_v44 = vmul.f32 %v5097_v52, %v4915_v37 }
  0xfd   :  { %580 = vrot.lane.b32.xlu1 %v550_v48, %s4730_s3  ;;  %568 = vrot.lane.b32.xlu0 %v544_v49, %s4730_s3 }
 0x101   :  { %668 = vrot.lane.b32.xlu1 %v642_v53, %s4731_s18  ;;  %666 = vrot.lane.b32.xlu0 %v641_v54, %s4731_s18  ;;  %v742_v53 = vmul.f32 %v5097_v52, %v4941_v45  ;;  %v736_v54 = vmul.f32 %v5095_v51, %v4941_v45 }
 0x105   :  { %672 = vrot.lane.b32.xlu1 %v644_v56, %s4731_s18  ;;  %670 = vrot.lane.b32.xlu0 %v643_v57, %s4731_s18 }
 0x109   :  { %680 = vrot.lane.b32.xlu1 %v648_v60, %s4731_s18  ;;  %678 = vrot.lane.b32.xlu0 %v647_v61, %s4731_s18  ;;  %v834_v60 = vmul.f32 %v5109_v58, %v4906_v33  ;;  %v833_v61 = vmul.f32 %v5109_v58, %v4903_v32 }
 0x10d   :  { %684 = vrot.lane.b32.xlu1 %v650_v4, %s4731_s18  ;;  %682 = vrot.lane.b32.xlu0 %v649_v5, %s4731_s18 }
 0x10f   :  { %v5137_v9 = vpop.permute.xlu1 %188  ;;  %v5139_v10 = vpop.permute.xlu0 %186 }
 0x111   :  { %924 = vperm.xlu1 %4341, %v916_v7   ;;  %919 = vperm.xlu0 %4340, %v915_v8   ;;  %v836_v7 = vmul.f32 %v5109_v58, %v4918_v38  ;;  %v835_v8 = vmul.f32 %v5109_v58, %v4915_v37 }
 0x113   :  { %v5141_v11 = vpop.permute.xlu1 %192  ;;  %v5143_v12 = vpop.permute.xlu0 %190 }
 0x114   :  { %6591 = vst [vmem:[#allocation20_spill] sm:$0xff] %v5141_v11 }
 0x115   :  { %676 = vrot.lane.b32.xlu1 %v646_v14, %s4731_s18  ;;  %664 = vrot.lane.b32.xlu0 %v640_v15, %s4731_s18 }
 0x117   :  { %v5151_v16 = vpop.permute.xlu1 %200  ;;  %v5153_v17 = vpop.permute.xlu0 %198 }
 0x119   :  { %764 = vrot.lane.b32.xlu1 %v738_v19, %s4732_s2  ;;  %762 = vrot.lane.b32.xlu0 %v737_v20, %s4732_s2  ;;  %v840_v19 = vmul.f32 %v5111_v59, %v4906_v33  ;;  %v839_v20 = vmul.f32 %v5111_v59, %v4903_v32 }
 0x11b   :  { %v5161_v21 = vpop.permute.xlu1 %204  ;;  %v5163_v22 = vpop.permute.xlu0 %202 }
 0x11d   :  { %768 = vrot.lane.b32.xlu1 %v740_v23, %s4732_s2  ;;  %766 = vrot.lane.b32.xlu0 %v739_v24, %s4732_s2  ;;  %v115_v23 = vsub.s32 5, %v4892_v26 }
 0x11f   :  { %v5171_v28 = vpop.permute.xlu1 %196  ;;  %v5173_v30 = vpop.permute.xlu0 %184 }
 0x121   :  { %776 = vrot.lane.b32.xlu1 %v744_v31, %s4732_s2  ;;  %774 = vrot.lane.b32.xlu0 %v743_v35, %s4732_s2  ;;  %v842_v35 = vmul.f32 %v5111_v59, %v4918_v38 }
 0x123   :  { %v5181_v39 = vpop.permute.xlu1 %284  ;;  %v5183_v40 = vpop.permute.xlu0 %282 }
 0x125   :  { %780 = vrot.lane.b32.xlu1 %v746_v43, %s4732_s2  ;;  %778 = vrot.lane.b32.xlu0 %v745_v44, %s4732_s2  ;;  %v841_v43 = vmul.f32 %v5111_v59, %v4915_v37  ;;  %v5243_v44 = vrot.slane %v4896_v29, %v115_v23 }
 0x127   :  { %v5191_v48 = vpop.permute.xlu1 %288  ;;  %v5193_v49 = vpop.permute.xlu0 %286  ;;  %6592 = vst [vmem:[#allocation21_spill] sm:$0xff] %v5243_v44  ;;  %v171_v29 = vmul.f32 %v4926_v41, %v5243_v44 }
 0x129   :  { %772 = vrot.lane.b32.xlu1 %v742_v53, %s4732_s2  ;;  %760 = vrot.lane.b32.xlu0 %v736_v54, %s4732_s2 }
 0x12b   :  { %v5201_v56 = vpop.permute.xlu1 %296  ;;  %v5203_v57 = vpop.permute.xlu0 %294 }
 0x12d   :  { %860 = vrot.lane.b32.xlu1 %v834_v60, %s4733_s23  ;;  %858 = vrot.lane.b32.xlu0 %v833_v61, %s4733_s23  ;;  %v838_v60 = vmul.f32 %v5111_v59, %v4941_v45  ;;  %v832_v61 = vmul.f32 %v5109_v58, %v4941_v45 }
 0x12f   :  { %v5211_v4 = vpop.permute.xlu1 %300  ;;  %v5213_v5 = vpop.permute.xlu0 %298 }
 0x131   :  { %864 = vrot.lane.b32.xlu1 %v836_v7, %s4733_s23  ;;  %862 = vrot.lane.b32.xlu0 %v835_v8, %s4733_s23 }
 0x133   :  { %v5221_v14 = vpop.permute.xlu1 %292  ;;  %v5223_v15 = vpop.permute.xlu0 %280 }
 0x135   :  { %872 = vrot.lane.b32.xlu1 %v840_v19, %s4733_s23  ;;  %870 = vrot.lane.b32.xlu0 %v839_v20, %s4733_s23  ;;  %v165_v19 = vmul.f32 %v4908_v34, %v5243_v44 }
 0x137   :  { %v5232_v24 = vpop.permute.xlu1 %380  ;;  %v5234_v31 = vpop.permute.xlu0 %378 }
 0x139   :  { %876 = vrot.lane.b32.xlu1 %v842_v35, %s4733_s23  ;;  %874 = vrot.lane.b32.xlu0 %v841_v43, %s4733_s23  ;;  %v267_v35 = vmul.f32 %v4967_v55, %v5243_v44  ;;  %v261_v43 = vmul.f32 %v4953_v50, %v5243_v44 }
 0x13b   :  { %v5245_v53 = vpop.permute.xlu1 %384  ;;  %v5247_v54 = vpop.permute.xlu0 %382 }
 0x13d   :  { %868 = vrot.lane.b32.xlu1 %v838_v60, %s4733_s23  ;;  %856 = vrot.lane.b32.xlu0 %v832_v61, %s4733_s23  ;;  %v363_v60 = vmul.f32 %v5001_v6, %v5243_v44  ;;  %v357_v61 = vmul.f32 %v4987_v62, %v5243_v44 }
 0x13f   :  { %v5255_v7 = vpop.permute.xlu1 %392  ;;  %v5257_v8 = vpop.permute.xlu0 %390 }
 0x141   :  { %206 = vrot.lane.b32.xlu1 %v171_v29, %s4726_s1  ;;  %194 = vrot.lane.b32.xlu0 %v165_v19, %s4726_s1  ;;  %v459_v29 = vmul.f32 %v5035_v18, %v5243_v44  ;;  %v453_v19 = vmul.f32 %v5021_v13, %v5243_v44 }
 0x143   :  { %v5265_v20 = vpop.permute.xlu1 %396  ;;  %v5267_v23 = vpop.permute.xlu0 %394 }
 0x145   :  { %302 = vrot.lane.b32.xlu1 %v267_v35, %s4727_s15  ;;  %290 = vrot.lane.b32.xlu0 %v261_v43, %s4727_s15  ;;  %v555_v35 = vmul.f32 %v5069_v36, %v5243_v44  ;;  %v549_v43 = vmul.f32 %v5055_v25, %v5243_v44 }
 0x147   :  { %v5275_v41 = vpop.permute.xlu1 %388  ;;  %v5277_v34 = vpop.permute.xlu0 %376 }
 0x149   :  { %398 = vrot.lane.b32.xlu1 %v363_v60, %s4728_s16  ;;  %386 = vrot.lane.b32.xlu0 %v357_v61, %s4728_s16  ;;  %v651_v60 = vmul.f32 %v5085_v47, %v5243_v44  ;;  %v645_v61 = vmul.f32 %v5083_v46, %v5243_v44 }
 0x14b   :  { %v5285_v55 = vpop.permute.xlu1 %476  ;;  %v5287_v50 = vpop.permute.xlu0 %474 }
 0x14d   :  { %494 = vrot.lane.b32.xlu1 %v459_v29, %s4729_s17  ;;  %482 = vrot.lane.b32.xlu0 %v453_v19, %s4729_s17  ;;  %v747_v29 = vmul.f32 %v5097_v52, %v5243_v44  ;;  %v741_v19 = vmul.f32 %v5095_v51, %v5243_v44 }
 0x14f   :  { %v5295_v6 = vpop.permute.xlu1 %480  ;;  %v5297_v62 = vpop.permute.xlu0 %478 }
 0x151   :  { %590 = vrot.lane.b32.xlu1 %v555_v35, %s4730_s3  ;;  %578 = vrot.lane.b32.xlu0 %v549_v43, %s4730_s3  ;;  %v843_v35 = vmul.f32 %v5111_v59, %v5243_v44  ;;  %v837_v43 = vmul.f32 %v5109_v58, %v5243_v44 }
 0x153   :  { %v5305_v18 = vpop.permute.xlu1 %488  ;;  %v5307_v13 = vpop.permute.xlu0 %486 }
 0x155   :  { %686 = vrot.lane.b32.xlu1 %v651_v60, %s4731_s18  ;;  %674 = vrot.lane.b32.xlu0 %v645_v61, %s4731_s18 }
 0x157   :  { %v5315_v36 = vpop.permute.xlu1 %492  ;;  %v5317_v25 = vpop.permute.xlu0 %490 }
 0x159   :  { %782 = vrot.lane.b32.xlu1 %v747_v29, %s4732_s2  ;;  %770 = vrot.lane.b32.xlu0 %v741_v19, %s4732_s2 }
 0x15b   :  { %v5325_v47 = vpop.permute.xlu1 %484  ;;  %v5327_v46 = vpop.permute.xlu0 %472 }
 0x15c   :  { %6593 = vst [vmem:[#allocation22_spill] sm:$0xff] %v5325_v47  ;;  %6594 = vst [vmem:[#allocation23_spill] sm:$0xff] %v5327_v46  ;;  %v124_v46 = vmul.f32 %v4903_v32, %v5121_v63 }
 0x15d   :  { %878 = vrot.lane.b32.xlu1 %v843_v35, %s4733_s23  ;;  %866 = vrot.lane.b32.xlu0 %v837_v43, %s4733_s23 }
 0x15f   :  { %v5335_v52 = vpop.permute.xlu1 %572  ;;  %v5337_v51 = vpop.permute.xlu0 %570 }
 0x163   :  { %v5339_v60 = vpop.permute.xlu1 %576  ;;  %v5341_v61 = vpop.permute.xlu0 %574 }
 0x167   :  { %v5343_v29 = vpop.permute.xlu1 %584  ;;  %v5345_v19 = vpop.permute.xlu0 %582 }
 0x168   :  { %6595 = vst [vmem:[#allocation24_spill] sm:$0xff] %v5343_v29  ;;  %6596 = vst [vmem:[#allocation25_spill] sm:$0xff] %v5345_v19 }
 0x16b   :  { %v5347_v59 = vpop.permute.xlu1 %588  ;;  %v5349_v1 = vpop.permute.xlu0 %586 }
 0x16c   :  { %6597 = vst [vmem:[#allocation26_spill] sm:$0xff] %v5347_v59  ;;  %6598 = vst [vmem:[#allocation27_spill] sm:$0xff] %v5349_v1 }
 0x16f   :  { %v5351_v58 = vpop.permute.xlu1 %580  ;;  %v5353_v35 = vpop.permute.xlu0 %568 }
 0x170   :  { %6599 = vst [vmem:[#allocation28_spill] sm:$0xff] %v5351_v58  ;;  %6600 = vst [vmem:[#allocation29_spill] sm:$0xff] %v5353_v35 }
 0x173   :  { %v5355_v43 = vpop.permute.xlu1 %668  ;;  %v5357_v27 = vpop.permute.xlu0 %666 }
 0x177   :  { %v5359_v2 = vpop.permute.xlu1 %672  ;;  %v5361_v3 = vpop.permute.xlu0 %670 }
 0x178   :  { %6601 = vst [vmem:[#allocation30_spill] sm:$0xff] %v5359_v2  ;;  %6602 = vst [vmem:[#allocation31_spill] sm:$0xff] %v5361_v3  ;;  %v211_v2 = vsel %vm208_vm8, %v5137_v9, %v5143_v12  ;;  %v129_v3 = vmul.f32 %v4941_v45, %v5123_v0 }
 0x17b   :  { %v5363_v42 = vpop.permute.xlu1 %680  ;;  %v5365_v26 = vpop.permute.xlu0 %678 }
 0x17c   :  { %6603 = vst [vmem:[#allocation32_spill] sm:$0xff] %v5363_v42  ;;  %6604 = vst [vmem:[#allocation33_spill] sm:$0xff] %v5365_v26  ;;  %v125_v42 = vmul.f32 %v4906_v33, %v5121_v63  ;;  %v210_v26 = vsel %vm208_vm8, %v5139_v10, %v5137_v9  ;;  %v216_v9 = vsel %vm208_vm8, %v5151_v16, %v5163_v22 }
 0x17d   :  { %v232_v19 = vadd.f32 %v210_v26, %v124_v46  ;;  %v308_v26 = vsel %vm304_vm9, %v5193_v49, %v5191_v48 }
 0x17f   :  { %v5367_v38 = vpop.permute.xlu1 %684  ;;  %v5369_v44 = vpop.permute.xlu0 %682 }
 0x180   :  { %6605 = vst [vmem:[#allocation34_spill] sm:$0xff] %v5367_v38  ;;  %6606 = vst [vmem:[#allocation35_spill] sm:$0xff] %v5369_v44  ;;  %v126_v38 = vmul.f32 %v4915_v37, %v5121_v63  ;;  %v131_v44 = vmul.f32 %v4906_v33, %v5123_v0  ;;  %v132_v33 = vmul.f32 %v4915_v37, %v5123_v0 }
 0x181   :  { %v214_v37 = vsel %vm208_vm8, %v5171_v28, %v5153_v17  ;;  %v312_v28 = vsel %vm304_vm9, %v5201_v56, %v5213_v5 }
 0x190   :  { %v5371_v59 = vpop.permute.xlu1 %924  ;;  %v5373_v58 = vpop.permute.xlu0 %919 }
 0x191   :  { %6607 = vst [vmem:[#allocation36_spill] sm:$0xff] %v5371_v59  ;;  %6608 = vst [vmem:[#allocation37_spill] sm:$0xff] %v5373_v58  ;;  %v130_v59 = vmul.f32 %v4903_v32, %v5123_v0  ;;  %v212_v32 = vsel %vm208_vm8, %v5143_v12, %v5141_v11  ;;  %v217_v12 = vsel %vm208_vm8, %v5163_v22, %v5161_v21 }
 0x192   :  { %v209_v11 = vsel %vm208_vm8, %v5173_v30, %v5139_v10  ;;  %v234_v0 = vadd.f32 %v212_v32, %v126_v38  ;;  %v306_v22 = vsel %vm304_vm9, %v5183_v40, %v5181_v39  ;;  %v240_v38 = vadd.f32 %v217_v12, %v132_v33 }
 0x193   :  { %v313_v30 = vsel %vm304_vm9, %v5213_v5, %v5211_v4  ;;  %v403_v5 = vsel %vm400_vm10, %v5232_v24, %v5247_v54  ;;  %v408_v32 = vsel %vm400_vm10, %v5255_v7, %v5267_v23 }
 0x194   :  { %v5375_v35 = vpop.permute.xlu1 %676  ;;  %v5377_v1 = vpop.permute.xlu0 %664 }
 0x195   :  { %6609 = vst [vmem:[#allocation38_spill] sm:$0xff] %v5375_v35  ;;  %6610 = vst [vmem:[#allocation39_spill] sm:$0xff] %v5377_v1  ;;  %v123_v1 = vmul.f32 %v4941_v45, %v5121_v63  ;;  %v215_v63 = vsel %vm208_vm8, %v5153_v17, %v5151_v16  ;;  %v233_v45 = vadd.f32 %v211_v2, %v125_v42 }
 0x196   :  { %v238_v16 = vadd.f32 %v215_v63, %v130_v59  ;;  %v307_v17 = vsel %vm304_vm9, %v5181_v39, %v5193_v49  ;;  %v239_v2 = vadd.f32 %v216_v9, %v131_v44  ;;  %v237_v42 = vadd.f32 %v214_v37, %v129_v3 }
 0x197   :  { %v231_v10 = vadd.f32 %v209_v11, %v123_v1  ;;  %v311_v63 = vsel %vm304_vm9, %v5203_v57, %v5201_v56  ;;  %v310_v39 = vsel %vm304_vm9, %v5221_v14, %v5203_v57  ;;  %v328_v49 = vadd.f32 %v306_v22, %v232_v19 }
 0x198   :  { %v5391_v35 = vpop.permute.xlu1 %764  ;;  %v5393_v58 = vpop.permute.xlu0 %762  ;;  %v329_v3 = vadd.f32 %v307_v17, %v233_v45  ;;  %v330_v1 = vadd.f32 %v308_v26, %v234_v0  ;;  %v305_v11 = vsel %vm304_vm9, %v5223_v15, %v5183_v40  ;;  %v402_v56 = vsel %vm400_vm10, %v5234_v31, %v5232_v24 }
 0x199   :  { %v404_v0 = vsel %vm400_vm10, %v5247_v54, %v5245_v53  ;;  %v407_v40 = vsel %vm400_vm10, %v5257_v8, %v5255_v7  ;;  %v334_v57 = vadd.f32 %v311_v63, %v238_v16  ;;  %v335_v14 = vadd.f32 %v312_v28, %v239_v2 }
 0x19a   :  { %v336_v15 = vadd.f32 %v313_v30, %v240_v38  ;;  %v333_v19 = vadd.f32 %v310_v39, %v237_v42  ;;  %v327_v59 = vadd.f32 %v305_v11, %v231_v10  ;;  %v409_v24 = vsel %vm400_vm10, %v5267_v23, %v5265_v20 }
 0x19b   :  { %v498_v54 = vsel %vm496_vm11, %v5287_v50, %v5285_v55  ;;  %v424_v33 = vadd.f32 %v402_v56, %v328_v49  ;;  %v425_v9 = vadd.f32 %v403_v5, %v329_v3  ;;  %v426_v12 = vadd.f32 %v404_v0, %v330_v1  ;;  %v6611_v5 = vld [vmem:[#allocation22_spill] sm:$0xff] }
 0x19c   :  { %v5423_v29 = vpop.permute.xlu1 %768  ;;  %v5425_v47 = vpop.permute.xlu0 %766  ;;  %v430_v37 = vadd.f32 %v407_v40, %v334_v57  ;;  %v406_v7 = vsel %vm400_vm10, %v5275_v41, %v5257_v8  ;;  %v401_v23 = vsel %vm400_vm10, %v5277_v34, %v5234_v31  ;;  %v499_v22 = vsel %vm496_vm11, %v5285_v55, %v5297_v62  ;;  %v6612_v40 = vld [vmem:[#allocation24_spill] sm:$0xff]  ;;  %v6613_v57 = vld [vmem:[#allocation25_spill] sm:$0xff] }
 0x19d   :  { %v594_v17 = vsel %vm592_vm12, %v5337_v51, %v5335_v52  ;;  %v431_v26 = vadd.f32 %v408_v32, %v335_v14  ;;  %v432_v2 = vadd.f32 %v409_v24, %v336_v15  ;;  %v520_v38 = vadd.f32 %v498_v54, %v424_v33  ;;  %v6614_v14 = vld [vmem:[#allocation31_spill] sm:$0xff]  ;;  %v6615_v15 = vld [vmem:[#allocation30_spill] sm:$0xff] }
 0x19e   :  { %v500_v42 = vsel %vm496_vm11, %v5297_v62, %v5295_v6  ;;  %v503_v8 = vsel %vm496_vm11, %v5307_v13, %v5305_v18  ;;  %v504_v31 = vsel %vm496_vm11, %v5305_v18, %v5317_v25  ;;  %v505_v41 = vsel %vm496_vm11, %v5317_v25, %v5315_v36 }
 0x19f   :  { %v690_v34 = vsel %vm688_vm13, %v5357_v27, %v5355_v43  ;;  %v429_v55 = vadd.f32 %v406_v7, %v333_v19  ;;  %v423_v10 = vadd.f32 %v401_v23, %v327_v59  ;;  %v521_v63 = vadd.f32 %v499_v22, %v425_v9  ;;  %v6616_v59 = vld [vmem:[#allocation23_spill] sm:$0xff] }
 0x1a0   :  { %v5451_v44 = vpop.permute.xlu1 %776  ;;  %v5453_v46 = vpop.permute.xlu0 %774  ;;  %v616_v62 = vadd.f32 %v594_v17, %v520_v38  ;;  %v522_v39 = vadd.f32 %v500_v42, %v426_v12  ;;  %v595_v18 = vsel %vm592_vm12, %v5335_v52, %v5341_v61  ;;  %v596_v25 = vsel %vm592_vm12, %v5341_v61, %v5339_v60  ;;  %v6617_v12 = vld [vmem:[#allocation32_spill] sm:$0xff] }
 0x1a1   :  { %v786_v49 = vsel %vm784_vm14, %v5393_v58, %v5391_v35  ;;  %v526_v3 = vadd.f32 %v503_v8, %v430_v37  ;;  %v527_v1 = vadd.f32 %v504_v31, %v431_v26  ;;  %v528_v11 = vadd.f32 %v505_v41, %v432_v2  ;;  %v6618_v37 = vld [vmem:[#allocation33_spill] sm:$0xff]  ;;  %v6619_v8 = vld [vmem:[#allocation27_spill] sm:$0xff]  ;;  %v6620_v41 = vld [vmem:[#allocation26_spill] sm:$0xff] }
 0x1a2   :  { %v712_v56 = vadd.f32 %v690_v34, %v616_v62  ;;  %v502_v0 = vsel %vm496_vm11, %v6611_v5, %v5307_v13  ;;  %v599_v52 = vsel %vm592_vm12, %v6613_v57, %v6612_v40  ;;  %v691_v61 = vsel %vm688_vm13, %v5355_v43, %v6614_v14  ;;  %v6621_v62 = vld [vmem:[#allocation37_spill] sm:$0xff]  ;;  %v6623_v5 = vld [vmem:[#allocation34_spill] sm:$0xff] }
 0x1a3   :  { %v692_v19 = vsel %vm688_vm13, %v6614_v14, %v6615_v15  ;;  %v497_v32 = vsel %vm496_vm11, %v6616_v59, %v5287_v50  ;;  %v617_v24 = vadd.f32 %v595_v18, %v521_v63  ;;  %v618_v54 = vadd.f32 %v596_v25, %v522_v39  ;;  %v6624_v59 = vld [vmem:[#allocation28_spill] sm:$0xff] }
 0x1a4   :  { %v5476_v45 = vpop.permute.xlu1 %780  ;;  %v5478_v16 = vpop.permute.xlu0 %778  ;;  %v808_v33 = vadd.f32 %v786_v49, %v712_v56  ;;  %v695_v7 = vsel %vm688_vm13, %v6618_v37, %v6617_v12  ;;  %v787_v43 = vsel %vm784_vm14, %v5391_v35, %v5425_v47  ;;  %v788_v23 = vsel %vm784_vm14, %v5425_v47, %v5423_v29  ;;  %v6622_v49 = vld [vmem:[#allocation35_spill] sm:$0xff] }
 0x1a5   :  { %v622_v22 = vadd.f32 %v599_v52, %v526_v3  ;;  %v713_v17 = vadd.f32 %v691_v61, %v617_v24  ;;  %v714_v26 = vadd.f32 %v692_v19, %v618_v54  ;;  %v525_v38 = vadd.f32 %v502_v0, %v429_v55  ;;  %v6625_v24 = vld [vmem:[#allocation29_spill] sm:$0xff] }
 0x1a6   :  { %v519_v42 = vadd.f32 %v497_v32, %v423_v10  ;;  %v600_v31 = vsel %vm592_vm12, %v6612_v40, %v6619_v8  ;;  %v601_v35 = vsel %vm592_vm12, %v6619_v8, %v6620_v41  ;;  %v696_v55 = vsel %vm688_vm13, %v6617_v12, %v6622_v49 }
 0x1a7   :  { %v718_v34 = vadd.f32 %v695_v7, %v622_v22  ;;  %v809_v63 = vadd.f32 %v787_v43, %v713_v17  ;;  %v810_v47 = vadd.f32 %v788_v23, %v714_v26  ;;  %v791_v10 = vsel %vm784_vm14, %v5453_v46, %v5451_v44 }
 0x1a8   :  { %v5507_v28 = vpop.permute.xlu1 %772  ;;  %v5509_v30 = vpop.permute.xlu0 %760  ;;  %v697_v0 = vsel %vm688_vm13, %v6622_v49, %v6623_v5  ;;  %v623_v61 = vadd.f32 %v600_v31, %v527_v1  ;;  %v624_v19 = vadd.f32 %v601_v35, %v528_v11  ;;  %v598_v32 = vsel %vm592_vm12, %v6624_v59, %v6613_v57  ;;  %v6627_v31 = vld [vmem:[#allocation39_spill] sm:$0xff] }
 0x1a9   :  { %v593_v54 = vsel %vm592_vm12, %v6625_v24, %v5337_v51  ;;  %v793_v57 = vsel %vm784_vm14, %v5478_v16, %v5476_v45  ;;  %v689_v35 = vsel %vm688_vm13, %v6627_v31, %v5357_v27  ;;  %v785_v27 = vsel %vm784_vm14, %v5509_v30, %v5393_v58  ;;  %v4405_v31 = vld [vmem:[#allocation12 + $0x14] ss:$8 sps:$4 sm:$0xff]  }
 0x1aa   :  { %v719_v43 = vadd.f32 %v696_v55, %v623_v61  ;;  %v720_v23 = vadd.f32 %v697_v0, %v624_v19  ;;  %v615_v8 = vadd.f32 %v593_v54, %v519_v42 }
 0x1ac   :  { %v861_v13 = vpop.permute.xlu1 %860  ;;  %v5535_v9 = vpop.permute.xlu0 %858 }
 0x1ad   :  { %v882_v50 = vsel %vm880_vm15, %v5535_v9, %v861_v13 }
 0x1ae   :  { %v904_v2 = vadd.f32 %v882_v50, %v808_v33  ;;  %v814_v33 = vadd.f32 %v791_v10, %v718_v34  ;;  %v6626_v50 = vld [vmem:[#allocation38_spill] sm:$0xff] }
 0x1b0   :  { %v5555_v39 = vadd.f32 %v6621_v62, %v904_v2  ;;  %v5557_v18 = vpop.permute.xlu1 %864  ;;  %v863_v25 = vpop.permute.xlu0 %862  ;;  %v621_v2 = vadd.f32 %v598_v32, %v525_v38 }
 0x1b1   :  { %v883_v3 = vsel %vm880_vm15, %v861_v13, %v863_v25  ;;  %v884_v56 = vsel %vm880_vm15, %v863_v25, %v5557_v18  ;;  %v792_v13 = vsel %vm784_vm14, %v5451_v44, %v5478_v16  ;;  %v694_v44 = vsel %vm688_vm13, %v6626_v50, %v6618_v37 }
 0x1b2   :  { %v940_v40 = vmax.f32 %v5555_v39, 0.0  ;;  %v905_v52 = vadd.f32 %v883_v3, %v809_v63  ;;  %v906_v14 = vadd.f32 %v884_v56, %v810_v47  ;;  %v815_v34 = vadd.f32 %v792_v13, %v719_v43  ;;  %v6628_v47 = vld [vmem:[#allocation36_spill] sm:$0xff] }
 0x1b3   :  { %v816_v63 = vadd.f32 %v793_v57, %v720_v23  ;;  %v790_v16 = vsel %vm784_vm14, %v5507_v28, %v5453_v46  ;;  %v717_v42 = vadd.f32 %v694_v44, %v621_v2  ;;  %v711_v28 = vadd.f32 %v689_v35, %v615_v8  ;;  %v4402_v2 = vld [vmem:[#allocation12 + $0x4] ss:$8 sps:$4 sm:$0xff]   ;;  %v4404_v8 = vld [vmem:[#allocation12] ss:$8 sps:$4 sm:$0xff]   ;;  %v4407_v35 = vld [vmem:[#allocation12 + $0x10] ss:$8 sps:$4 sm:$0xff]  }
 0x1b4   :  { %v5582_v12 = vadd.f32 %v6621_v62, %v905_v52  ;;  %v5585_v7 = vadd.f32 %v6621_v62, %v906_v14  ;;  %v873_v1 = vpop.permute.xlu1 %872  ;;  %v871_v11 = vpop.permute.xlu0 %870  ;;  %1621 = vmatprep.subr.bf16.mxu0 %v4402_v2 }
 0x1b5   :  { %v887_v51 = vsel %vm880_vm15, %v871_v11, %v873_v1  ;;  %v813_v0 = vadd.f32 %v790_v16, %v717_v42  ;;  %v807_v52 = vadd.f32 %v785_v27, %v711_v28  ;;  %1622 = vmatpush1.bf16.msra.mxu0 %v4404_v8  ;;  %v4408_v16 = vld [vmem:[#allocation12 + $0x24] ss:$8 sps:$4 sm:$0xff]   ;;  %v4411_v27 = vld [vmem:[#allocation12 + $0x34] ss:$8 sps:$4 sm:$0xff]  }
 0x1b6   :  { %v941_v22 = vmax.f32 %v5582_v12, 0.0  ;;  %v942_v17 = vmax.f32 %v5585_v7, 0.0  ;;  %v910_v26 = vadd.f32 %v887_v51, %v814_v33  ;;  %1623 = vmatprep.subr.bf16.mxu0 %v4405_v31  ;;  %v4450_v7 = vld [vmem:[#allocation12 + $0x100] ss:$8 sps:$4 sm:$0xff]  }
 0x1b8   :  { %v5603_v25 = vadd.f32 %v6628_v47, %v910_v26  ;;  %v5605_v37 = vpop.permute.xlu1 %876  ;;  %v875_v49 = vpop.permute.xlu0 %874  ;;  %v4342_v38 = vpack.i.bf16 %v941_v22, %v940_v40 }
 0x1b9   :  { %v888_v55 = vsel %vm880_vm15, %v873_v1, %v875_v49  ;;  %v889_v46 = vsel %vm880_vm15, %v875_v49, %v5605_v37  ;;  %1624 = vmatpush1.bf16.msra.mxu0 %v4407_v35  ;;  %v4410_v49 = vld [vmem:[#allocation12 + $0x20] ss:$8 sps:$4 sm:$0xff]   ;;  %v4414_v35 = vld [vmem:[#allocation12 + $0x44] ss:$8 sps:$4 sm:$0xff]  }
 0x1ba   :  { %v946_v10 = vmax.f32 %v5603_v25, 0.0  ;;  %v911_v3 = vadd.f32 %v888_v55, %v815_v34  ;;  %v912_v56 = vadd.f32 %v889_v46, %v816_v63  ;;  %4343 = vrot.lane.b32.xlu0 %v4342_v38, %s4726_s1  ;;  %1625 = vmatprep.subr.bf16.mxu0 %v4408_v16  ;;  %v6629_v55 = vld [vmem:[#allocation19_spill] sm:$0xff]  ;;  %v6630_v46 = vld [vmem:[#allocation21_spill] sm:$0xff] }
 0x1bb   :  { %v134_v28 = vmul.f32 %v6630_v46, %v6629_v55 }
 0x1bc   :  { %v5620_v14 = vadd.f32 %v6628_v47, %v911_v3  ;;  %v5623_v61 = vadd.f32 %v6628_v47, %v912_v56  ;;  %v869_v58 = vpop.permute.xlu1 %868  ;;  %v857_v30 = vpop.permute.xlu0 %856  ;;  %v4347_v19 = vpack.i.bf16 %v946_v10, %v942_v17  ;;  %v6631_v56 = vld [vmem:[#allocation18_spill] sm:$0xff] }
 0x1bd   :  { %v886_v59 = vsel %vm880_vm15, %v869_v58, %v871_v11  ;;  %v881_v32 = vsel %vm880_vm15, %v857_v30, %v5535_v9  ;;  %v6633_v30 = vld [vmem:[#allocation16_spill] sm:$0xff]  ;;  %1626 = vmatpush1.bf16.msra.mxu0 %v4410_v49 }
 0x1be   :  { %v947_v24 = vmax.f32 %v5620_v14, 0.0  ;;  %v948_v54 = vmax.f32 %v5623_v61, 0.0  ;;  %v909_v33 = vadd.f32 %v886_v59, %v813_v0  ;;  %v903_v13 = vadd.f32 %v881_v32, %v807_v52  ;;  %4348 = vrot.lane.b32.xlu1 %v4347_v19, %s4726_s1  ;;  %v6632_v52 = vld [vmem:[#allocation20_spill] sm:$0xff]  ;;  %1627 = vmatprep.subr.bf16.mxu0 %v4411_v27  ;;  %v4416_v27 = vld [vmem:[#allocation12 + $0x40] ss:$8 sps:$4 sm:$0xff]  }
 0x1bf   :  { %v128_v0 = vmul.f32 %v6630_v46, %v6631_v56  ;;  %v133_v19 = vmul.f32 %v6633_v30, %v6629_v55  ;;  %v127_v59 = vmul.f32 %v6633_v30, %v6631_v56  ;;  %v4456_v61 = vld [vmem:[#allocation12 + $0x120] ss:$8 sps:$4 sm:$0xff]  }
 0x1c0   :  { %v5636_v1 = vadd.f32 %v6628_v47, %v909_v33  ;;  %v5639_v43 = vadd.f32 %v6621_v62, %v903_v13  ;;  %v207_v23 = vpop.permute.xlu1 %206  ;;  %v195_v57 = vpop.permute.xlu0 %194  ;;  %v4352_v9 = vpack.i.bf16 %v948_v54, %v947_v24 }
 0x1c1   :  { %v218_v3 = vsel %vm208_vm8, %v5161_v21, %v207_v23  ;;  %v213_v58 = vsel %vm208_vm8, %v6632_v52, %v195_v57  ;;  %v242_v32 = vadd.f32 %v207_v23, %v134_v28  ;;  %v236_v33 = vadd.f32 %v195_v57, %v128_v0 }
 0x1c2   :  { %v945_v11 = vmax.f32 %v5636_v1, 0.0  ;;  %v939_v51 = vmax.f32 %v5639_v43, 0.0  ;;  %4353 = vrot.lane.b32.xlu0 %v4352_v9, %s4726_s1  ;;  %v4413_v9 = vld [vmem:[#allocation12 + $0x30] ss:$8 sps:$4 sm:$0xff]   ;;  %v235_v2 = vadd.f32 %v213_v58, %v127_v59 }
 0x1c3   :  { %1628 = vmatpush1.bf16.msra.mxu0 %v4413_v9 }
 0x1c4   :  { %v303_v50 = vpop.permute.xlu1 %302  ;;  %v291_v44 = vpop.permute.xlu0 %290  ;;  %v4357_v26 = vpack.i.bf16 %v945_v11, %v939_v51  ;;  %1629 = vmatprep.subr.bf16.mxu0 %v4414_v35 }
 0x1c5   :  { %v314_v13 = vsel %vm304_vm9, %v5211_v4, %v303_v50  ;;  %v309_v21 = vsel %vm304_vm9, %v5191_v48, %v291_v44  ;;  %v338_v16 = vadd.f32 %v303_v50, %v242_v32  ;;  %v332_v55 = vadd.f32 %v291_v44, %v236_v33  ;;  %v4419_v32 = vld [vmem:[#allocation12 + $0x50] ss:$8 sps:$4 sm:$0xff]  }
 0x1c6   :  { %4358 = vrot.lane.b32.xlu1 %v4357_v26, %s4726_s1  ;;  %v241_v26 = vadd.f32 %v218_v3, %v133_v19  ;;  %v331_v46 = vadd.f32 %v309_v21, %v235_v2 }
 0x1c7   :  { %1630 = vmatpush1.bf16.msra.mxu0 %v4416_v27  ;;  %v4425_v27 = vld [vmem:[#allocation12 + $0x70] ss:$8 sps:$4 sm:$0xff]  }
 0x1c8   :  { %v399_v34 = vpop.permute.xlu1 %398  ;;  %v387_v63 = vpop.permute.xlu0 %386  ;;  %v337_v4 = vadd.f32 %v314_v13, %v241_v26 }
 0x1c9   :  { %v410_v23 = vsel %vm400_vm10, %v5265_v20, %v399_v34  ;;  %v405_v57 = vsel %vm400_vm10, %v5245_v53, %v387_v63  ;;  %v434_v28 = vadd.f32 %v399_v34, %v338_v16  ;;  %v428_v48 = vadd.f32 %v387_v63, %v332_v55  ;;  %v4417_v20 = vld [vmem:[#allocation12 + $0x54] ss:$8 sps:$4 sm:$0xff]  }
 0x1ca   :  { %v433_v50 = vadd.f32 %v410_v23, %v337_v4  ;;  %v427_v44 = vadd.f32 %v405_v57, %v331_v46  ;;  %1631 = vmatprep.subr.bf16.mxu0 %v4417_v20  ;;  %v4423_v57 = vld [vmem:[#allocation12 + $0x74] ss:$8 sps:$4 sm:$0xff]  }
 0x1cb   :  { %1632 = vmatpush1.bf16.msra.mxu0 %v4419_v32 }
 0x1cc   :  { %v495_v38 = vpop.permute.xlu1 %494  ;;  %v483_v42 = vpop.permute.xlu0 %482 }
 0x1cd   :  { %v506_v49 = vsel %vm496_vm11, %v5315_v36, %v495_v38  ;;  %v501_v3 = vsel %vm496_vm11, %v5295_v6, %v483_v42  ;;  %v530_v52 = vadd.f32 %v495_v38, %v434_v28  ;;  %v524_v53 = vadd.f32 %v483_v42, %v428_v48 }
 0x1ce   :  { %v529_v36 = vadd.f32 %v506_v49, %v433_v50  ;;  %v523_v58 = vadd.f32 %v501_v3, %v427_v44  ;;  %vm1837_vm11 = vcmask 965632  }
 0x1d0   :  { %v591_v8 = vpop.permute.xlu1 %590  ;;  %v579_v31 = vpop.permute.xlu0 %578 }
 0x1d1   :  { %v602_v34 = vsel %vm592_vm12, %v6620_v41, %v591_v8  ;;  %v597_v63 = vsel %vm592_vm12, %v5339_v60, %v579_v31  ;;  %v626_v30 = vadd.f32 %v591_v8, %v530_v52  ;;  %v620_v6 = vadd.f32 %v579_v31, %v524_v53  ;;  %v4420_v41 = vld [vmem:[#allocation12 + $0x64] ss:$8 sps:$4 sm:$0xff]   ;;  %v4422_v31 = vld [vmem:[#allocation12 + $0x60] ss:$8 sps:$4 sm:$0xff]   ;;  %v4431_v53 = vld [vmem:[#allocation12 + $0x90] ss:$8 sps:$4 sm:$0xff]  }
 0x1d2   :  { %v625_v38 = vadd.f32 %v602_v34, %v529_v36  ;;  %v619_v42 = vadd.f32 %v597_v63, %v523_v58  ;;  %1633 = vmatprep.subr.bf16.mxu0 %v4420_v41  ;;  %v4428_v52 = vld [vmem:[#allocation12 + $0x80] ss:$8 sps:$4 sm:$0xff]   ;;  %v4432_v34 = vld [vmem:[#allocation12 + $0xa4] ss:$8 sps:$4 sm:$0xff]   ;;  %v4435_v36 = vld [vmem:[#allocation12 + $0xb4] ss:$8 sps:$4 sm:$0xff]  }
 0x1d3   :  { %1634 = vmatpush1.bf16.msra.mxu0 %v4422_v31  ;;  %v4434_v63 = vld [vmem:[#allocation12 + $0xa0] ss:$8 sps:$4 sm:$0xff]   ;;  %v4437_v58 = vld [vmem:[#allocation12 + $0xb0] ss:$8 sps:$4 sm:$0xff]  }
 0x1d4   :  { %v687_v56 = vpop.permute.xlu1 %686  ;;  %v675_v0 = vpop.permute.xlu0 %674  ;;  %1635 = vmatprep.subr.bf16.mxu0 %v4423_v57 }
 0x1d5   :  { %v698_v19 = vsel %vm688_vm13, %v6623_v5, %v687_v56  ;;  %v693_v59 = vsel %vm688_vm13, %v6615_v15, %v675_v0  ;;  %v722_v21 = vadd.f32 %v687_v56, %v626_v30  ;;  %v716_v60 = vadd.f32 %v675_v0, %v620_v6  ;;  %v4438_v30 = vld [vmem:[#allocation12 + $0xc4] ss:$8 sps:$4 sm:$0xff]   ;;  %v4440_v6 = vld [vmem:[#allocation12 + $0xc0] ss:$8 sps:$4 sm:$0xff]  }
 0x1d6   :  { %v721_v5 = vadd.f32 %v698_v19, %v625_v38  ;;  %v715_v2 = vadd.f32 %v693_v59, %v619_v42  ;;  %v4441_v19 = vld [vmem:[#allocation12 + $0xd4] ss:$8 sps:$4 sm:$0xff]   ;;  %v4443_v42 = vld [vmem:[#allocation12 + $0xd0] ss:$8 sps:$4 sm:$0xff]   ;;  %vm1855_vm13 = vcmask 957440  }
 0x1d7   :  { %1636 = vmatpush1.bf16.msra.mxu0 %v4425_v27 }
 0x1d8   :  { %v783_v33 = vpop.permute.xlu1 %782  ;;  %v771_v13 = vpop.permute.xlu0 %770 }
 0x1d9   :  { %v794_v9 = vsel %vm784_vm14, %v5476_v45, %v783_v33  ;;  %v789_v26 = vsel %vm784_vm14, %v5423_v29, %v771_v13  ;;  %v818_v8 = vadd.f32 %v783_v33, %v722_v21  ;;  %v812_v15 = vadd.f32 %v771_v13, %v716_v60  ;;  %v4444_v33 = vld [vmem:[#allocation12 + $0xe4] ss:$8 sps:$4 sm:$0xff]  }
 0x1da   :  { %v817_v35 = vadd.f32 %v794_v9, %v721_v5  ;;  %v811_v16 = vadd.f32 %v789_v26, %v715_v2  ;;  %v4446_v2 = vld [vmem:[#allocation12 + $0xe0] ss:$8 sps:$4 sm:$0xff]   ;;  %vm1873_vm14 = vcmask 949248  }
 0x1dc   :  { %v879_v55 = vpop.permute.xlu1 %878  ;;  %v867_v23 = vpop.permute.xlu0 %866 }
 0x1dd   :  { %v890_v4 = vsel %vm880_vm15, %v5605_v37, %v879_v55  ;;  %v914_v46 = vadd.f32 %v879_v55, %v818_v8  ;;  %v885_v45 = vsel %vm880_vm15, %v5557_v18, %v867_v23  ;;  %v908_v29 = vadd.f32 %v867_v23, %v812_v15  ;;  %v4426_v37 = vld [vmem:[#allocation12 + $0x84] ss:$8 sps:$4 sm:$0xff]   ;;  %v4449_v23 = vld [vmem:[#allocation12 + $0xf0] ss:$8 sps:$4 sm:$0xff]  }
 0x1de   :  { %v913_v28 = vadd.f32 %v890_v4, %v817_v35  ;;  %v907_v48 = vadd.f32 %v885_v45, %v811_v16  ;;  %1637 = vmatprep.subr.bf16.mxu0 %v4426_v37  ;;  %v4447_v16 = vld [vmem:[#allocation12 + $0xf4] ss:$8 sps:$4 sm:$0xff]   ;;  %vm1909_vm15 = vcmask 875520  }
 0x1df   :  { %v938_v49 = vadd.f32 %v6628_v47, %v914_v46  ;;  %v932_v3 = vadd.f32 %v6621_v62, %v908_v29  ;;  %1638 = vmatpush1.bf16.msra.mxu0 %v4428_v52 }
 0x1e0   :  { %v5696_v50 = vadd.f32 %v6628_v47, %v913_v28  ;;  %v5699_v44 = vadd.f32 %v6621_v62, %v907_v48  ;;  %v6634_v47 = vmov 0.0   ;;  %v4429_v62 = vld [vmem:[#allocation12 + $0x94] ss:$8 sps:$4 sm:$0xff]   ;;  %v4452_v48 = vld [vmem:[#allocation12 + $0x104] ss:$8 sps:$4 sm:$0xff]  }
 0x1e1   :  { %v950_v18 = vmax.f32 %v938_v49, 0.0  ;;  %v944_v56 = vmax.f32 %v932_v3, 0.0  ;;  %1639 = vmatprep.subr.bf16.mxu0 %v4429_v62  ;;  %1751 = vst.msk [vmem:[#allocation4] sm:$0xff] %vm1750_vm3, %v6634_v47  ;;  %1752 = vst.msk [vmem:[#allocation4 + $0x10] sm:$0xff] %vm1750_vm3, %v6634_v47 }
 0x1e2   :  { %v949_v0 = vmax.f32 %v5696_v50, 0.0  ;;  %v943_v20 = vmax.f32 %v5699_v44, 0.0  ;;  %v4459_v50 = vld [vmem:[#allocation12 + $0x130] ss:$8 sps:$4 sm:$0xff]   ;;  %2054 = vst.msk [vmem:[#allocation7] sm:$0xff] %vm1750_vm3, %v6634_v47 }
 0x1e3   :  { %963 = vst.msk [vmem:[#allocation3 + $0x58] sm:$0xff] %vm956_vm0, %v950_v18  ;;  %957 = vst.msk [vmem:[#allocation3 + $0x28] sm:$0xff] %vm956_vm0, %v944_v56  ;;  %1640 = vmatpush1.bf16.msra.mxu0 %v4431_v53 }
 0x1e4   :  { %966 = vst.msk [vmem:[#allocation3 + $0x58] sm:$0xff] %vm964_vm1, %v6634_v47  ;;  %965 = vst.msk [vmem:[#allocation3 + $0x28] sm:$0xff] %vm964_vm1, %v6634_v47  ;;  %1641 = vmatprep.subr.bf16.mxu0 %v4432_v34  ;;  %vm2013_vm1 = vcmask 679488  }
 0x1e5   :  { %1754 = vst.msk [vmem:[#allocation4 + $0x8] sm:$0xff] %vm1753_vm4, %v6634_v47  ;;  %1755 = vst.msk [vmem:[#allocation4 + $0x18] sm:$0xff] %vm1753_vm4, %v6634_v47 }
 0x1e6   :  { %2055 = vst.msk [vmem:[#allocation7 + $0x8] sm:$0xff] %vm1753_vm4, %v6634_v47  ;;  %vm2077_vm4 = vcmask 588804  }
 0x1e7   :  { %1642 = vmatpush1.bf16.msra.mxu0 %v4434_v63 }
 0x1e8   :  { %1643 = vmatprep.subr.bf16.mxu0 %v4435_v36 }
 0x1eb   :  { %1644 = vmatpush1.bf16.msra.mxu0 %v4437_v58  ;;  %v972_v25 = vld [vmem:[#allocation3 + $0x28] sm:$0xff]  ;;  %v978_v49 = vld [vmem:[#allocation3 + $0x58] sm:$0xff] }
 0x1ec   :  { %1645 = vmatprep.subr.bf16.mxu0 %v4438_v30  ;;  %v4382_v1 = vpack.i.bf16 %v978_v49, %v949_v0 }
 0x1ef   :  { %1646 = vmatpush1.bf16.msra.mxu0 %v4440_v6 }
 0x1f0   :  { %1647 = vmatprep.subr.bf16.mxu0 %v4441_v19 }
 0x1f3   :  { %1648 = vmatpush1.bf16.msra.mxu0 %v4443_v42 }
 0x1f4   :  { %1649 = vmatprep.subr.bf16.mxu0 %v4444_v33 }
 0x1f7   :  { %1650 = vmatpush1.bf16.msra.mxu0 %v4446_v2 }
 0x1f8   :  { %1651 = vmatprep.subr.bf16.mxu0 %v4447_v16 }
 0x1fb   :  { %1652 = vmatpush1.bf16.msra.mxu0 %v4449_v23  ;;  %v4467_v23 = vld [vmem:[#allocation12 + $0x154] ss:$8 sps:$4 sm:$0xff]  }
 0x1fc   :  { %1664 = vmatprep.subr.bf16.mxu0 %v4452_v48  ;;  %v4480_v48 = vld [vmem:[#allocation12 + $0x1a0] ss:$8 sps:$4 sm:$0xff]  }
 0x22c   :  { %v4344_v59 = vpop.permute.xlu0 %4343 }
 0x22d   :  { %v4346_v32 = vunpack.i.h.bf16 %v4344_v59  ;;  %v4345_v38 = vunpack.i.l.bf16 %v4344_v59 }
 0x22f   :  { %v1016_v41 = vsel %vm208_vm8, %v4345_v38, %v4346_v32 }
 0x230   :  { %v4349_v13 = vpop.permute.xlu1 %4348  ;;  %v1038_v9 = vmax.f32 %v940_v40, %v1016_v41 }
 0x231   :  { %v4350_v21 = vunpack.i.l.bf16 %v4349_v13  ;;  %v4351_v8 = vunpack.i.h.bf16 %v4349_v13 }
 0x233   :  { %v1017_v60 = vsel %vm208_vm8, %v4346_v32, %v4350_v21 }
 0x234   :  { %v5713_v26 = vmax.f32 %v941_v22, %v1017_v60  ;;  %v5715_v5 = vpop.permute.xlu0 %4353 }
 0x235   :  { %v4356_v15 = vunpack.i.h.bf16 %v5715_v5  ;;  %v4355_v31 = vunpack.i.l.bf16 %v5715_v5 }
 0x236   :  { %v4362_v35 = vpack.i.bf16 %v5713_v26, %v1038_v9 }
 0x237   :  { %v1021_v55 = vsel %vm208_vm8, %v4351_v8, %v4355_v31  ;;  %v1022_v39 = vsel %vm208_vm8, %v4355_v31, %v4356_v15 }
 0x238   :  { %v1044_v40 = vmax.f32 %v946_v10, %v1021_v55  ;;  %v5728_v12 = vmax.f32 %v947_v24, %v1022_v39  ;;  %4363 = vrot.lane.b32.xlu0 %v4362_v35, %s4728_s16  ;;  %v4359_v22 = vpop.permute.xlu1 %4358  ;;  %v4372_v24 = vpack.i.bf16 %v972_v25, %v943_v20  ;;  %v4455_v35 = vld [vmem:[#allocation12 + $0x114] ss:$8 sps:$4 sm:$0xff]   ;;  %v4453_v39 = vld [vmem:[#allocation12 + $0x110] ss:$8 sps:$4 sm:$0xff]  }
 0x239   :  { %v4361_v57 = vunpack.i.h.bf16 %v4359_v22  ;;  %v4360_v4 = vunpack.i.l.bf16 %v4359_v22  ;;  %v4462_v22 = vld [vmem:[#allocation12 + $0x140] ss:$8 sps:$4 sm:$0xff]  }
 0x23a   :  { %v4367_v46 = vpack.i.bf16 %v5728_v12, %v1044_v40 }
 0x23b   :  { %v1020_v45 = vsel %vm208_vm8, %v4361_v57, %v4351_v8  ;;  %v1015_v29 = vsel %vm208_vm8, %v4360_v4, %v4345_v38  ;;  %v4465_v57 = vld [vmem:[#allocation12 + $0x150] ss:$8 sps:$4 sm:$0xff]   ;;  %v4470_v4 = vld [vmem:[#allocation12 + $0x164] ss:$8 sps:$4 sm:$0xff]  }
 0x23c   :  { %v1043_v10 = vmax.f32 %v945_v11, %v1020_v45  ;;  %v1037_v14 = vmax.f32 %v939_v51, %v1015_v29  ;;  %4368 = vrot.lane.b32.xlu1 %v4367_v46, %s4728_s16  ;;  %v4468_v46 = vld [vmem:[#allocation12 + $0x160] ss:$8 sps:$4 sm:$0xff]   ;;  %v4473_v45 = vld [vmem:[#allocation12 + $0x174] ss:$8 sps:$4 sm:$0xff]   ;;  %v4471_v29 = vld [vmem:[#allocation12 + $0x170] ss:$8 sps:$4 sm:$0xff]  }
 0x23e   :  { %v4377_v28 = vpack.i.bf16 %v1043_v10, %v1037_v14 }
 0x240   :  { %4373 = vrot.lane.b32.xlu1 %v4372_v24, %s4726_s1  ;;  %4378 = vrot.lane.b32.xlu0 %v4377_v28, %s4728_s16  ;;  %v4477_v24 = vld [vmem:[#allocation12 + $0x190] ss:$8 sps:$4 sm:$0xff]   ;;  %v4482_v28 = vld [vmem:[#allocation12 + $0x1a4] ss:$8 sps:$4 sm:$0xff]  }
 0x244   :  { %4383 = vrot.lane.b32.xlu0 %v4382_v1, %s4726_s1  ;;  %v4483_v1 = vld [vmem:[#allocation12 + $0x1b0] ss:$8 sps:$4 sm:$0xff]  }
 0x2aa   :  { %v5746_v43 = vpop.permute.xlu0 %4363 }
 0x2ab   :  { %v4366_v11 = vunpack.i.h.bf16 %v5746_v43  ;;  %v4365_v51 = vunpack.i.l.bf16 %v5746_v43 }
 0x2ad   :  { %v1086_v18 = vsel %vm400_vm10, %v4365_v51, %v4366_v11 }
 0x2ae   :  { %v5750_v3 = vpop.permute.xlu1 %4368  ;;  %v1108_v53 = vmax.f32 %v1038_v9, %v1086_v18  ;;  %v4491_v18 = vld [vmem:[#allocation12 + $0x1d4] ss:$8 sps:$4 sm:$0xff]  }
 0x2af   :  { %v4371_v27 = vunpack.i.h.bf16 %v5750_v3  ;;  %v4370_v37 = vunpack.i.l.bf16 %v5750_v3 }
 0x2b1   :  { %v1091_v56 = vsel %vm400_vm10, %v4370_v37, %v4371_v27 }
 0x2b2   :  { %v4374_v52 = vpop.permute.xlu1 %4373  ;;  %v4379_v62 = vpop.permute.xlu0 %4378  ;;  %v1114_v34 = vmax.f32 %v1044_v40, %v1091_v56  ;;  %v4458_v40 = vld [vmem:[#allocation12 + $0x124] ss:$8 sps:$4 sm:$0xff]   ;;  %v4489_v56 = vld [vmem:[#allocation12 + $0x1d0] ss:$8 sps:$4 sm:$0xff]  }
 0x2b3   :  { %v4376_v63 = vunpack.i.h.bf16 %v4374_v52  ;;  %v4375_v36 = vunpack.i.l.bf16 %v4374_v52  ;;  %v4381_v58 = vunpack.i.h.bf16 %v4379_v62  ;;  %v4380_v30 = vunpack.i.l.bf16 %v4379_v62  ;;  %v4494_v52 = vld [vmem:[#allocation12 + $0x1e4] ss:$8 sps:$4 sm:$0xff]   ;;  %v4492_v62 = vld [vmem:[#allocation12 + $0x1e0] ss:$8 sps:$4 sm:$0xff]  }
 0x2b4   :  { %v1120_v6 = vpack.c.bf16 %v1114_v34, %v1108_v53  ;;  %v4497_v53 = vld [vmem:[#allocation12 + $0x1f4] ss:$8 sps:$4 sm:$0xff]   ;;  %v4495_v34 = vld [vmem:[#allocation12 + $0x1f0] ss:$8 sps:$4 sm:$0xff]  }
 0x2b5   :  { %v1018_v19 = vsel %vm208_vm8, %v4350_v21, %v4375_v36  ;;  %v1019_v59 = vsel %vm208_vm8, %v4375_v36, %v4376_v63  ;;  %v1085_v32 = vsel %vm400_vm10, %v4380_v30, %v4365_v51  ;;  %v1090_v13 = vsel %vm400_vm10, %v4381_v58, %v4370_v37  ;;  %v4488_v51 = vld [vmem:[#allocation12 + $0x1c4] ss:$8 sps:$4 sm:$0xff]   ;;  %v4486_v37 = vld [vmem:[#allocation12 + $0x1c0] ss:$8 sps:$4 sm:$0xff]  }
 0x2b6   :  { %v5765_v38 = vmax.f32 %v942_v17, %v1018_v19  ;;  %v5769_v42 = vmax.f32 %v943_v20, %v1019_v59  ;;  %1653 = vmatprep.mubr.bf16.mxu0 %v1120_v6  ;;  %v4384_v33 = vpop.permute.xlu0 %4383  ;;  %v1107_v41 = vmax.f32 %v1037_v14, %v1085_v32  ;;  %v1113_v21 = vmax.f32 %v1043_v10, %v1090_v13  ;;  %v4474_v10 = vld [vmem:[#allocation12 + $0x180] ss:$8 sps:$4 sm:$0xff]   ;;  %v4479_v14 = vld [vmem:[#allocation12 + $0x194] ss:$8 sps:$4 sm:$0xff]  }
 0x2b7   :  { %v4386_v60 = vunpack.i.h.bf16 %v4384_v33  ;;  %v4385_v9 = vunpack.i.l.bf16 %v4384_v33  ;;  %v5772_v2 = vmax.f32 %v972_v25, %v4376_v63  ;;  %v4476_v25 = vld [vmem:[#allocation12 + $0x184] ss:$8 sps:$4 sm:$0xff]  }
 0x2b8   :  { %v4387_v8 = vpack.i.bf16 %v5769_v42, %v5765_v38  ;;  %v1119_v31 = vpack.c.bf16 %v1113_v21, %v1107_v41  ;;  %v4500_v63 = vld [vmem:[#allocation12 + $0x204] ss:$8 sps:$4 sm:$0xff]  }
 0x2b9   :  { %v5776_v17 = vmax.f32 %v978_v49, %v4386_v60  ;;  %v1023_v44 = vsel %vm208_vm8, %v4356_v15, %v4385_v9  ;;  %v1024_v20 = vsel %vm208_vm8, %v4385_v9, %v4386_v60  ;;  %v4485_v49 = vld [vmem:[#allocation12 + $0x1b4] ss:$8 sps:$4 sm:$0xff]  }
 0x2ba   :  { %v5784_v16 = vmax.f32 %v948_v54, %v1023_v44  ;;  %v5788_v55 = vmax.f32 %v949_v0, %v1024_v20  ;;  %4388 = vrot.lane.b32.xlu1 %v4387_v8, %s4728_s16  ;;  %1654 = vmatmul.mubr.bf16.vlgmr.msra.gmra.mrb[0].mxu0 %v1119_v31  ;;  %v4461_v54 = vld [vmem:[#allocation12 + $0x134] ss:$8 sps:$4 sm:$0xff]   ;;  %v4464_v0 = vld [vmem:[#allocation12 + $0x144] ss:$8 sps:$4 sm:$0xff]  }
 0x2bb   :  { %v4397_v5 = vpack.i.bf16 %v5776_v17, %v5772_v2  ;;  %1665 = vmatpush1.bf16.msra.mxu0 %v4450_v7 }
 0x2bc   :  { %v4392_v15 = vpack.i.bf16 %v5788_v55, %v5784_v16  ;;  %1666 = vmatprep.subr.bf16.mxu0 %v4455_v35  ;;  %v4498_v35 = vld [vmem:[#allocation12 + $0x200] ss:$8 sps:$4 sm:$0xff]  }
 0x2be   :  { %4398 = vrot.lane.b32.xlu1 %v4397_v5, %s4728_s16  ;;  %4393 = vrot.lane.b32.xlu0 %v4392_v15, %s4728_s16  ;;  %v4510_v15 = vld [vmem:[#allocation12 + $0x240] ss:$8 sps:$4 sm:$0xff]  }
 0x2bf   :  { %1667 = vmatpush1.bf16.msra.mxu0 %v4453_v39  ;;  %v4515_v39 = vld [vmem:[#allocation12 + $0x254] ss:$8 sps:$4 sm:$0xff]  }
 0x2c0   :  { %1668 = vmatprep.subr.bf16.mxu0 %v4458_v40  ;;  %v4513_v40 = vld [vmem:[#allocation12 + $0x250] ss:$8 sps:$4 sm:$0xff]  }
 0x2c3   :  { %1669 = vmatpush1.bf16.msra.mxu0 %v4456_v61  ;;  %v4518_v61 = vld [vmem:[#allocation12 + $0x264] ss:$8 sps:$4 sm:$0xff]  }
 0x2c4   :  { %1670 = vmatprep.subr.bf16.mxu0 %v4461_v54  ;;  %v4516_v54 = vld [vmem:[#allocation12 + $0x260] ss:$8 sps:$4 sm:$0xff]  }
 0x2c7   :  { %1671 = vmatpush1.bf16.msra.mxu0 %v4459_v50  ;;  %v4521_v50 = vld [vmem:[#allocation12 + $0x274] ss:$8 sps:$4 sm:$0xff]  }
 0x2c8   :  { %1672 = vmatprep.subr.bf16.mxu0 %v4464_v0  ;;  %v1205_v0 = vld [vmem:[#allocation12 + $0x280] sm:$0xff] }
 0x2cb   :  { %1673 = vmatpush1.bf16.msra.mxu0 %v4462_v22  ;;  %v4519_v22 = vld [vmem:[#allocation12 + $0x270] ss:$8 sps:$4 sm:$0xff]  }
 0x2cc   :  { %1674 = vmatprep.subr.bf16.mxu0 %v4467_v23  ;;  %v4167_v23 = vcombine.high %v1205_v0, %v1205_v0 }
 0x2cf   :  { %1675 = vmatpush1.bf16.msra.mxu0 %v4465_v57  ;;  %v4166_v57 = vcombine.low %v1205_v0, %v1205_v0 }
 0x2d0   :  { %1676 = vmatprep.subr.bf16.mxu0 %v4470_v4 }
 0x2d3   :  { %1677 = vmatpush1.bf16.msra.mxu0 %v4468_v46 }
 0x2d4   :  { %1678 = vmatprep.subr.bf16.mxu0 %v4473_v45 }
 0x2d7   :  { %1679 = vmatpush1.bf16.msra.mxu0 %v4471_v29 }
 0x2d8   :  { %1680 = vmatprep.subr.bf16.mxu0 %v4476_v25  ;;  %v1616_v25 = vsel %vm1614_vm2, %v4166_v57, 0 }
 0x2db   :  { %1681 = vmatpush1.bf16.msra.mxu0 %v4474_v10 }
 0x2dc   :  { %1682 = vmatprep.subr.bf16.mxu0 %v4479_v14  ;;  %v6635_v14 = vmov 0  }
 0x2df   :  { %1683 = vmatpush1.bf16.msra.mxu0 %v4477_v24 }
 0x2e0   :  { %1684 = vmatprep.subr.bf16.mxu0 %v4482_v28 }
 0x2e3   :  { %1685 = vmatpush1.bf16.msra.mxu0 %v4480_v48 }
 0x2e4   :  { %1686 = vmatprep.subr.bf16.mxu0 %v4485_v49 }
 0x2e7   :  { %1687 = vmatpush1.bf16.msra.mxu0 %v4483_v1 }
 0x2e8   :  { %1688 = vmatprep.subr.bf16.mxu0 %v4488_v51 }
 0x2eb   :  { %1689 = vmatpush1.bf16.msra.mxu0 %v4486_v37 }
 0x2ec   :  { %1690 = vmatprep.subr.bf16.mxu0 %v4491_v18 }
 0x2ef   :  { %1691 = vmatpush1.bf16.msra.mxu0 %v4489_v56 }
 0x2f0   :  { %1692 = vmatprep.subr.bf16.mxu0 %v4494_v52 }
 0x2f3   :  { %1693 = vmatpush1.bf16.msra.mxu0 %v4492_v62 }
 0x2f4   :  { %1694 = vmatprep.subr.bf16.mxu0 %v4497_v53 }
 0x2f7   :  { %1695 = vmatpush1.bf16.msra.mxu0 %v4495_v34 }
 0x2f8   :  { %1707 = vmatprep.subr.bf16.mxu0 %v4500_v63 }
 0x32c   :  { %v4389_v36 = vpop.permute.xlu1 %4388 }
 0x32d   :  { %v4391_v58 = vunpack.i.h.bf16 %v4389_v36  ;;  %v4390_v30 = vunpack.i.l.bf16 %v4389_v36 }
 0x32f   :  { %v1087_v6 = vsel %vm400_vm10, %v4366_v11, %v4390_v30  ;;  %v1088_v32 = vsel %vm400_vm10, %v4390_v30, %v4391_v58 }
 0x330   :  { %v4399_v19 = vpop.permute.xlu1 %4398  ;;  %v4394_v59 = vpop.permute.xlu0 %4393  ;;  %v1109_v9 = vmax.f32 %v5713_v26, %v1087_v6  ;;  %v1110_v43 = vmax.f32 %v5765_v38, %v1088_v32  ;;  %v4503_v26 = vld [vmem:[#allocation12 + $0x214] ss:$8 sps:$4 sm:$0xff]   ;;  %v4506_v38 = vld [vmem:[#allocation12 + $0x224] ss:$8 sps:$4 sm:$0xff]  }
 0x331   :  { %v4401_v33 = vunpack.i.h.bf16 %v4399_v19  ;;  %v4400_v13 = vunpack.i.l.bf16 %v4399_v19  ;;  %v4396_v41 = vunpack.i.h.bf16 %v4394_v59  ;;  %v4395_v60 = vunpack.i.l.bf16 %v4394_v59  ;;  %v1952_v6 = vld [vmem:[%s6547_s5] sm:$0xff]  ;;  %s4741_s5 = smov 88  }
 0x333   :  { %v1092_v21 = vsel %vm400_vm10, %v4371_v27, %v4395_v60  ;;  %v1093_v8 = vsel %vm400_vm10, %v4395_v60, %v4396_v41  ;;  %v1118_v11 = vmax.f32 %v5776_v17, %v4401_v33  ;;  %v1112_v7 = vmax.f32 %v5772_v2, %v4400_v13  ;;  %v4501_v27 = vld [vmem:[#allocation12 + $0x210] ss:$8 sps:$4 sm:$0xff]   ;;  %v4504_v17 = vld [vmem:[#allocation12 + $0x220] ss:$8 sps:$4 sm:$0xff]   ;;  %v4509_v2 = vld [vmem:[#allocation12 + $0x234] ss:$8 sps:$4 sm:$0xff]  }
 0x334   :  { %v1115_v44 = vmax.f32 %v5728_v12, %v1092_v21  ;;  %v1116_v20 = vmax.f32 %v5784_v16, %v1093_v8  ;;  %v4507_v12 = vld [vmem:[#allocation12 + $0x230] ss:$8 sps:$4 sm:$0xff]   ;;  %v4512_v16 = vld [vmem:[#allocation12 + $0x244] ss:$8 sps:$4 sm:$0xff]   ;;  %v1089_v4 = vsel %vm400_vm10, %v4391_v58, %v4400_v13  ;;  %v1094_v46 = vsel %vm400_vm10, %v4396_v41, %v4401_v33 }
 0x335   :  { %v1124_v3 = vpack.c.bf16 %v1118_v11, %v1112_v7  ;;  %v1111_v45 = vmax.f32 %v5769_v42, %v1089_v4  ;;  %v1117_v29 = vmax.f32 %v5788_v55, %v1094_v46  ;;  %v5856_v58 = vld [vmem:[%s6546_s4] sm:$0xff]  ;;  %vm1964_vm10 = vcmask 130048  }
 0x336   :  { %v1122_v31 = vpack.c.bf16 %v1116_v20, %v1110_v43  ;;  %v1121_v5 = vpack.c.bf16 %v1115_v44, %v1109_v9  ;;  %v4171_v30 = vcombine.high %v5856_v58, %v5856_v58  ;;  %v4170_v0 = vcombine.low %v5856_v58, %v5856_v58 }
 0x337   :  { %v1123_v10 = vpack.c.bf16 %v1117_v29, %v1111_v45 }
 0x338   :  { %1696 = vmatprep.mubr.bf16.mxu0 %v1122_v31  ;;  %4172 = vmatprep.mubr.msk.bf16.mxu1 %vm1964_vm10, %v4171_v30 }
 0x339   :  { %1697 = vmatmul.mubr.bf16.vlgmr.msra.gmra.mrb[0].mxu0 %v1121_v5 }
 0x33a   :  { %1708 = vmatpush1.bf16.msra.mxu0 %v4498_v35  ;;  %4169 = vmatprep.mubr.msk.bf16.mxu0 %vm956_vm0, %v1124_v3  ;;  %vm1927_vm0 = vcmask 867328  }
 0x33b   :  { %1709 = vmatprep.subr.bf16.mxu0 %v4503_v26 }
 0x33e   :  { %1710 = vmatpush1.bf16.msra.mxu0 %v4501_v27 }
 0x33f   :  { %1711 = vmatprep.subr.bf16.mxu0 %v4506_v38 }
 0x342   :  { %1712 = vmatpush1.bf16.msra.mxu0 %v4504_v17 }
 0x343   :  { %1713 = vmatprep.subr.bf16.mxu0 %v4509_v2 }
 0x346   :  { %1714 = vmatpush1.bf16.msra.mxu0 %v4507_v12 }
 0x347   :  { %1715 = vmatprep.subr.bf16.mxu0 %v4512_v16 }
 0x34a   :  { %1716 = vmatpush1.bf16.msra.mxu0 %v4510_v15 }
 0x34b   :  { %1717 = vmatprep.subr.bf16.mxu0 %v4515_v39 }
 0x34e   :  { %1718 = vmatpush1.bf16.msra.mxu0 %v4513_v40 }
 0x34f   :  { %1719 = vmatprep.subr.bf16.mxu0 %v4518_v61 }
 0x352   :  { %1720 = vmatpush1.bf16.msra.mxu0 %v4516_v54 }
 0x353   :  { %1721 = vmatprep.subr.bf16.mxu0 %v4521_v50 }
 0x356   :  { %1722 = vmatpush1.bf16.msra.mxu0 %v4519_v22 }
 0x357   :  { %4168 = vmatprep.subr.msk.bf16.mxu0 %vm1614_vm2, %v4167_v23 }
 0x35a   :  { %1724 = vmatpush1.bf16.msra.mxu0 %v1616_v25 }
 0x35b   :  { %3034 = vmatprep.subr.bf16.mxu0 %v6635_v14 }
 0x35d   :  { %1740 = vmatmul.mubr.bf16.vlgmr.msra.gmra.mrb[0].mxu0 %v1123_v10 }
 0x430   :  { %v1741_v42 = vpop.f32.mrb[0].mxu0 }
 0x431   :  { %1760 = vrot.lane.b32.xlu0 %v1741_v42, %s4734_s24  ;;  %v1743_v55 = vpop.f32.mrb[1].mxu0 }
 0x432   :  { %1762 = vrot.lane.b32.xlu1 %v1743_v55, %s4734_s24  ;;  %v1745_v24 = vpop.f32.mrb[2].mxu0 }
 0x433   :  { %v1747_v28 = vpop.f32.mrb[3].mxu0 }
 0x435   :  { %1764 = vrot.lane.b32.xlu0 %v1745_v24, %s4734_s24 }
 0x436   :  { %1766 = vrot.lane.b32.xlu1 %v1747_v28, %s4734_s24 }
 0x4a3   :  { %v1761_v48 = vpop.permute.xlu0 %1760 }
 0x4a4   :  { %1775 = vst.msk [vmem:[#allocation4] sm:$0xff] %vm1774_vm5, %v1761_v48  ;;  %v1763_v49 = vpop.permute.xlu1 %1762 }
 0x4a5   :  { %v1768_v1 = vsel %vm1750_vm3, %v1761_v48, %v1763_v49 }
 0x4a6   :  { %1777 = vst.msk [vmem:[#allocation4 + $0x8] sm:$0xff] %vm1776_vm6, %v1768_v1  ;;  %v2040_v1 = vld [vmem:[%s6548_s6] sm:$0x3]  ;;  %s4742_s6 = smov 87  }
 0x4a7   :  { %v1765_v51 = vpop.permute.xlu0 %1764 }
 0x4a8   :  { %1778 = vst.msk [vmem:[#allocation4 + $0x10] sm:$0xff] %vm1774_vm5, %v1765_v51  ;;  %v1767_v37 = vpop.permute.xlu1 %1766 }
 0x4a9   :  { %v1769_v18 = vsel %vm1750_vm3, %v1765_v51, %v1767_v37  ;;  %v6636_v51 = vld [vmem:[#allocation15_spill] sm:$0xff] }
 0x4aa   :  { %1779 = vst.msk [vmem:[#allocation4 + $0x18] sm:$0xff] %vm1776_vm6, %v1769_v18  ;;  %v6637_v37 = vsub.s32 1, %v6636_v51 }
 0x4ab   :  { %v1789_v56 = vld [vmem:[#allocation4] sm:$0xff] }
 0x4ac   :  { %v2049_v18 = vrot.slane %v2040_v1, %v6637_v37 }
 0x4ad   :  { %v1790_v53 = vld [vmem:[#allocation4 + $0x8] sm:$0xff] }
 0x4af   :  { %v1791_v52 = vld [vmem:[#allocation4 + $0x10] sm:$0xff] }
 0x4b0   :  { %v1793_v62 = vpack.c.bf16 %v1791_v52, %v1789_v56 }
 0x4b1   :  { %v1792_v34 = vld [vmem:[#allocation4 + $0x18] sm:$0xff] }
 0x4b2   :  { %1797 = vrot.lane.b32.xlu0 %v1793_v62, %s4726_s1  ;;  %v1794_v63 = vpack.c.bf16 %v1792_v34, %v1790_v53 }
 0x4b4   :  { %1799 = vrot.lane.b32.xlu1 %v1794_v63, %s4726_s1  ;;  %1788 = vst.msk [vmem:[#allocation5 + $0x8] sm:$0xff] %vm1787_vm7, %v1794_v63 }
 0x4b6   :  { %1815 = vrot.lane.b32.xlu0 %v1793_v62, %s4727_s15 }
 0x4b8   :  { %1817 = vrot.lane.b32.xlu1 %v1794_v63, %s4727_s15 }
 0x4ba   :  { %1833 = vrot.lane.b32.xlu0 %v1793_v62, %s4735_s25 }
 0x4bb   :  { %v1935_v36 = vld [vmem:[#allocation5 + $0x8] sm:$0xff] }
 0x4bc   :  { %1835 = vrot.lane.b32.xlu1 %v1794_v63, %s4735_s25  ;;  %1968 = vmatprep.subr.bf16.mxu1 %v1935_v36 }
 0x4bd   :  { %1969 = vmatpush1.bf16.msra.mxu1 %v1793_v62 }
 0x4be   :  { %1851 = vrot.lane.b32.xlu0 %v1793_v62, %s4736_s26 }
 0x4c0   :  { %1853 = vrot.lane.b32.xlu1 %v1794_v63, %s4736_s26 }
 0x4c2   :  { %1869 = vrot.lane.b32.xlu0 %v1793_v62, %s4737_s27 }
 0x4c4   :  { %1871 = vrot.lane.b32.xlu1 %v1794_v63, %s4737_s27 }
 0x4c6   :  { %1887 = vrot.lane.b32.xlu0 %v1793_v62, %s4730_s3 }
 0x4c8   :  { %1889 = vrot.lane.b32.xlu1 %v1794_v63, %s4730_s3 }
 0x4ca   :  { %1905 = vrot.lane.b32.xlu0 %v1793_v62, %s4738_s28 }
 0x4cc   :  { %1907 = vrot.lane.b32.xlu1 %v1794_v63, %s4738_s28 }
 0x4ce   :  { %1923 = vrot.lane.b32.xlu0 %v1793_v62, %s4739_s30  ;;  %v6638_v62 = vld [vmem:[#allocation17_spill] sm:$0xff] }
 0x4cf   :  { %v2045_v53 = vrot.slane %v2040_v1, %v6638_v62 }
 0x4d0   :  { %1925 = vrot.lane.b32.xlu1 %v1794_v63, %s4739_s30 }
 0x4d2   :  { %1955 = vperm.xlu0 %4340, %v1952_v6  }
 0x524   :  { %v1798_v19 = vpop.permute.xlu0 %1797 }
 0x526   :  { %v1800_v59 = vpop.permute.xlu1 %1799 }
 0x527   :  { %v1802_v32 = vsel %vm208_vm8, %v1798_v19, %v1800_v59  ;;  %1806 = vst.msk [vmem:[#allocation5 + $0x18] sm:$0xff] %vm1787_vm7, %v1800_v59 }
 0x528   :  { %v1816_v33 = vpop.permute.xlu0 %1815 }
 0x52a   :  { %v1818_v13 = vpop.permute.xlu1 %1817 }
 0x52b   :  { %v1820_v41 = vsel %vm304_vm9, %v1816_v33, %v1818_v13  ;;  %1824 = vst.msk [vmem:[#allocation5 + $0x28] sm:$0xff] %vm1787_vm7, %v1818_v13  ;;  %v4557_v13 = vld [vmem:[%s6551_s9 + $0xe0] ss:$28 sps:$4 sm:$0xff]  }
 0x52c   :  { %v1834_v60 = vpop.permute.xlu0 %1833 }
 0x52e   :  { %v1836_v9 = vpop.permute.xlu1 %1835  ;;  %v1937_v21 = vld [vmem:[#allocation5 + $0x18] sm:$0xff] }
 0x52f   :  { %v1838_v8 = vsel %vm1837_vm11, %v1834_v60, %v1836_v9  ;;  %1842 = vst.msk [vmem:[#allocation5 + $0x38] sm:$0xff] %vm1787_vm7, %v1836_v9  ;;  %1970 = vmatprep.subr.bf16.mxu1 %v1937_v21  ;;  %v2212_v60 = vld [vmem:[%s6550_s8 + $0x8] sm:$0xff]  ;;  %v2211_v9 = vld [vmem:[%s6550_s8] sm:$0xff]  ;;  %v4544_v21 = vld [vmem:[%s6551_s9 + $0x18] ss:$28 sps:$4 sm:$0xff]  }
 0x530   :  { %v1852_v43 = vpop.permute.xlu0 %1851  ;;  %1971 = vmatpush1.bf16.msra.mxu1 %v1802_v32  ;;  %3035 = vmatpush1.bf16.msra.mxu0 %v4544_v21  ;;  %v4565_v21 = vld [vmem:[%s6551_s9 + $0x150] ss:$28 sps:$4 sm:$0xff]  }
 0x531   :  { %3036 = vmatprep.subr.bf16.mxu0 %v6635_v14 }
 0x532   :  { %v1854_v11 = vpop.permute.xlu1 %1853  ;;  %v1939_v7 = vld [vmem:[#allocation5 + $0x28] sm:$0xff] }
 0x533   :  { %v1856_v44 = vsel %vm1855_vm13, %v1852_v43, %v1854_v11  ;;  %1860 = vst.msk [vmem:[#allocation5 + $0x48] sm:$0xff] %vm1787_vm7, %v1854_v11  ;;  %1972 = vmatprep.subr.bf16.mxu1 %v1939_v7  ;;  %v4552_v43 = vld [vmem:[%s6551_s9 + $0x88] ss:$28 sps:$4 sm:$0xff]   ;;  %v4556_v11 = vld [vmem:[%s6551_s9 + $0xc0] ss:$28 sps:$4 sm:$0xff]  }
 0x534   :  { %v1870_v20 = vpop.permute.xlu0 %1869  ;;  %1973 = vmatpush1.bf16.msra.mxu1 %v1820_v41  ;;  %v4560_v7 = vld [vmem:[%s6551_s9 + $0xf8] ss:$28 sps:$4 sm:$0xff]  }
 0x536   :  { %v1872_v31 = vpop.permute.xlu1 %1871  ;;  %v1941_v35 = vld [vmem:[#allocation5 + $0x38] sm:$0xff] }
 0x537   :  { %v1874_v5 = vsel %vm1873_vm14, %v1870_v20, %v1872_v31  ;;  %1878 = vst.msk [vmem:[#allocation5 + $0x58] sm:$0xff] %vm1787_vm7, %v1872_v31  ;;  %1974 = vmatprep.subr.bf16.mxu1 %v1941_v35  ;;  %v4568_v20 = vld [vmem:[%s6551_s9 + $0x168] ss:$28 sps:$4 sm:$0xff]   ;;  %v4572_v31 = vld [vmem:[%s6551_s9 + $0x1a0] ss:$28 sps:$4 sm:$0xff]  }
 0x538   :  { %v1888_v26 = vpop.permute.xlu0 %1887  ;;  %1975 = vmatpush1.bf16.msra.mxu1 %v1838_v8  ;;  %v4548_v8 = vld [vmem:[%s6551_s9 + $0x50] ss:$28 sps:$4 sm:$0xff]   ;;  %v4576_v35 = vld [vmem:[%s6551_s9 + $0x1d8] ss:$28 sps:$4 sm:$0xff]  }
 0x539   :  { %3037 = vmatpush1.bf16.msra.mxu0 %v4548_v8  ;;  %v4571_v8 = vld [vmem:[%s6551_s9 + $0x18c] ss:$28 sps:$4 sm:$0xff]  }
 0x53a   :  { %v1890_v3 = vpop.permute.xlu1 %1889  ;;  %v1943_v27 = vld [vmem:[#allocation5 + $0x48] sm:$0xff]  ;;  %3038 = vmatprep.subr.bf16.mxu0 %v6635_v14 }
 0x53b   :  { %v1892_v38 = vsel %vm592_vm12, %v1888_v26, %v1890_v3  ;;  %1896 = vst.msk [vmem:[#allocation5 + $0x68] sm:$0xff] %vm1787_vm7, %v1890_v3  ;;  %1976 = vmatprep.subr.bf16.mxu1 %v1943_v27 }
 0x53c   :  { %v1906_v17 = vpop.permute.xlu0 %1905  ;;  %1977 = vmatpush1.bf16.msra.mxu1 %v1856_v44  ;;  %v4564_v44 = vld [vmem:[%s6551_s9 + $0x130] ss:$28 sps:$4 sm:$0xff]  }
 0x53d   :  { %3039 = vmatpush1.bf16.msra.mxu0 %v4552_v43  ;;  %v4569_v43 = vld [vmem:[%s6551_s9 + $0x188] ss:$28 sps:$4 sm:$0xff]  }
 0x53e   :  { %v1908_v2 = vpop.permute.xlu1 %1907  ;;  %v1945_v12 = vld [vmem:[#allocation5 + $0x58] sm:$0xff]  ;;  %3040 = vmatprep.subr.bf16.mxu0 %v6635_v14 }
 0x53f   :  { %v1910_v16 = vsel %vm1909_vm15, %v1906_v17, %v1908_v2  ;;  %1914 = vst.msk [vmem:[#allocation5 + $0x78] sm:$0xff] %vm1787_vm7, %v1908_v2  ;;  %1978 = vmatprep.subr.bf16.mxu1 %v1945_v12 }
 0x540   :  { %1979 = vmatpush1.bf16.msra.mxu1 %v1874_v5  ;;  %v1924_v15 = vpop.permute.xlu0 %1923  ;;  %v4580_v5 = vld [vmem:[%s6551_s9 + $0x210] ss:$28 sps:$4 sm:$0xff]  }
 0x541   :  { %3041 = vmatpush1.bf16.msra.mxu0 %v4556_v11  ;;  %v4575_v11 = vld [vmem:[%s6551_s9 + $0x1c4] ss:$28 sps:$4 sm:$0xff]  }
 0x542   :  { %v1926_v39 = vpop.permute.xlu1 %1925  ;;  %v1947_v40 = vld [vmem:[#allocation5 + $0x68] sm:$0xff]  ;;  %3042 = vmatprep.subr.bf16.mxu0 %v6635_v14 }
 0x543   :  { %v1928_v61 = vsel %vm1927_vm0, %v1924_v15, %v1926_v39  ;;  %1932 = vst.msk [vmem:[#allocation5 + $0x88] sm:$0xff] %vm1787_vm7, %v1926_v39  ;;  %1980 = vmatprep.subr.bf16.mxu1 %v1947_v40 }
 0x544   :  { %1981 = vmatpush1.bf16.msra.mxu1 %v1892_v38 }
 0x545   :  { %3043 = vmatpush1.bf16.msra.mxu0 %v4560_v7  ;;  %v4573_v7 = vld [vmem:[%s6551_s9 + $0x1c0] ss:$28 sps:$4 sm:$0xff]  }
 0x546   :  { %v1949_v54 = vld [vmem:[#allocation5 + $0x78] sm:$0xff]  ;;  %3044 = vmatprep.subr.bf16.mxu0 %v6635_v14 }
 0x547   :  { %1982 = vmatprep.subr.bf16.mxu1 %v1949_v54 }
 0x548   :  { %1983 = vmatpush1.bf16.msra.mxu1 %v1910_v16 }
 0x549   :  { %3045 = vmatpush1.bf16.msra.mxu0 %v4564_v44  ;;  %v4579_v44 = vld [vmem:[%s6551_s9 + $0x1fc] ss:$28 sps:$4 sm:$0xff]  }
 0x54a   :  { %v1951_v50 = vld [vmem:[#allocation5 + $0x88] sm:$0xff]  ;;  %3046 = vmatprep.subr.bf16.mxu0 %v6635_v14 }
 0x54b   :  { %1984 = vmatprep.subr.bf16.mxu1 %v1951_v50 }
 0x54c   :  { %1985 = vmatpush1.bf16.msra.mxu1 %v1928_v61 }
 0x54d   :  { %3047 = vmatpush1.bf16.msra.mxu0 %v4568_v20  ;;  %v4577_v20 = vld [vmem:[%s6551_s9 + $0x1f8] ss:$28 sps:$4 sm:$0xff]  }
 0x54e   :  { %3048 = vmatprep.subr.bf16.mxu0 %v6635_v14 }
 0x54f   :  { %2001 = vmatmul.mubr.bf16.vlgmr.msra.gmra.mrb[0].mxu1 %v4170_v0 }
 0x550   :  { %2314 = vmatprep.mubr.bf16.mxu1 %v6635_v14 }
 0x551   :  { %v1956_v22 = vpop.permute.xlu0 %1955  ;;  %3049 = vmatpush1.bf16.msra.mxu0 %v4572_v31  ;;  %v4583_v31 = vld [vmem:[%s6551_s9 + $0x234] ss:$28 sps:$4 sm:$0xff]  }
 0x552   :  { %3050 = vmatprep.subr.bf16.mxu0 %v6635_v14 }
 0x555   :  { %3051 = vmatpush1.bf16.msra.mxu0 %v4576_v35  ;;  %v4581_v35 = vld [vmem:[%s6551_s9 + $0x230] ss:$28 sps:$4 sm:$0xff]  }
 0x556   :  { %3052 = vmatprep.subr.bf16.mxu0 %v6635_v14 }
 0x559   :  { %3053 = vmatpush1.bf16.msra.mxu0 %v4580_v5  ;;  %v4584_v5 = vld [vmem:[%s6551_s9 + $0x248] ss:$28 sps:$4 sm:$0xff]  }
 0x55a   :  { %3054 = vmatprep.subr.bf16.mxu0 %v6635_v14 }
 0x55d   :  { %3055 = vmatpush1.bf16.msra.mxu0 %v4584_v5  ;;  %v4641_v5 = vld [vmem:[%s6551_s9 + $0xbc] ss:$28 sps:$4 sm:$0xff]  }
 0x55e   :  { %3056 = vmatprep.subr.bf16.mxu0 %v6635_v14 }
 0x622   :  { %v2002_v23 = vpop.f32.mrb[0].mxu1 }
 0x623   :  { %v2003_v57 = vadd.f32 %v2002_v23, %v1956_v22  ;;  %v2004_v4 = vpop.f32.mrb[1].mxu1 }
 0x624   :  { %v2005_v46 = vadd.f32 %v2004_v4, %v1956_v22  ;;  %v2006_v45 = vpop.f32.mrb[2].mxu1 }
 0x625   :  { %v2009_v29 = vmax.f32 %v2003_v57, 0.0  ;;  %v2007_v25 = vpop.f32.mrb[3].mxu1 }
 0x626   :  { %v2010_v10 = vmax.f32 %v2005_v46, 0.0 }
 0x627   :  { %2019 = vrot.lane.b32.xlu1 %v2009_v29, %s4726_s1 }
 0x628   :  { %2012 = vst.msk [vmem:[#allocation6 + $0x8] sm:$0xff] %vm1787_vm7, %v2010_v10 }
 0x629   :  { %2014 = vst.msk [vmem:[#allocation6 + $0x8] sm:$0xff] %vm2013_vm1, %v6634_v47  ;;  %vm5905_vm1 = vmor %vm2077_vm4, %vm1614_vm2 }
 0x630   :  { %v2016_v42 = vld [vmem:[#allocation6 + $0x8] sm:$0xff] }
 0x631   :  { %2021 = vrot.lane.b32.xlu0 %v2016_v42, %s4726_s1 }
 0x699   :  { %v2020_v55 = vpop.permute.xlu1 %2019 }
 0x6a3   :  { %v2022_v24 = vpop.permute.xlu0 %2021 }
 0x6a4   :  { %v2023_v28 = vsel %vm208_vm8, %v2020_v55, %v2022_v24  ;;  %v2027_v48 = vmax.f32 %v2016_v42, %v2022_v24 }
 0x6a5   :  { %v2026_v49 = vmax.f32 %v2009_v29, %v2023_v28 }
 0x6a6   :  { %2032 = vrot.lane.b32.xlu0 %v2027_v48, %s4735_s25 }
 0x6a7   :  { %2030 = vrot.lane.b32.xlu1 %v2026_v49, %s4735_s25 }
 0x718   :  { %v2033_v56 = vpop.permute.xlu0 %2032 }
 0x719   :  { %v2039_v52 = vmax.f32 %v2027_v48, %v2033_v56  ;;  %v2031_v34 = vpop.permute.xlu1 %2030 }
 0x71a   :  { %v2035_v63 = vsel %vm1837_vm11, %v2031_v34, %v2033_v56 }
 0x71b   :  { %v2053_v36 = vmul.f32 %v2049_v18, %v2039_v52  ;;  %v2038_v58 = vmax.f32 %v2026_v49, %v2035_v63  ;;  %v4540_v63 = vld [vmem:[%s6549_s7] sm:$0xff]  }
 0x71d   :  { %v2052_v30 = vmul.f32 %v2045_v53, %v2038_v58  ;;  %2060 = vrot.lane.b32.xlu0 %v2053_v36, %s4734_s24  ;;  %v4543_v53 = vld [vmem:[%s6551_s9 + $0x4] ss:$28 sps:$4 sm:$0xff]   ;;  %v4547_v58 = vld [vmem:[%s6551_s9 + $0x3c] ss:$28 sps:$4 sm:$0xff]  }
 0x71e   :  { %v4541_v36 = vld [vmem:[%s6551_s9] ss:$28 sps:$4 sm:$0xff]  }
 0x71f   :  { %2058 = vrot.lane.b32.xlu1 %v2052_v30, %s4734_s24  ;;  %v4545_v30 = vld [vmem:[%s6551_s9 + $0x38] ss:$28 sps:$4 sm:$0xff]  }
 0x78f   :  { %v2061_v6 = vpop.permute.xlu0 %2060 }
 0x791   :  { %v2059_v19 = vpop.permute.xlu1 %2058 }
 0x792   :  { %v2062_v59 = vsel %vm1750_vm3, %v2059_v19, %v2061_v6  ;;  %2065 = vst.msk [vmem:[#allocation7] sm:$0xff] %vm1774_vm5, %v2059_v19  ;;  %v4551_v6 = vld [vmem:[%s6551_s9 + $0x74] ss:$28 sps:$4 sm:$0xff]   ;;  %vm3075_vm3 = vcmask 171008   ;;  %vm3149_vm5 = vcmask 1047720  }
 0x793   :  { %2066 = vst.msk [vmem:[#allocation7 + $0x8] sm:$0xff] %vm1776_vm6, %v2062_v59  ;;  %v4549_v19 = vld [vmem:[%s6551_s9 + $0x70] ss:$28 sps:$4 sm:$0xff]   ;;  %vm3156_vm6 = vcmask 433152  }
 0x794   :  { %v4555_v59 = vld [vmem:[%s6551_s9 + $0xac] ss:$28 sps:$4 sm:$0xff]   ;;  %3076 = vst.msk [vmem:[#allocation9] sm:$0xff] %vm3075_vm3, %v6634_v47  ;;  %3077 = vst.msk [vmem:[#allocation9 + $0x38] sm:$0xff] %vm3075_vm3, %v6634_v47 }
 0x799   :  { %v2067_v32 = vld [vmem:[#allocation7] sm:$0xff] }
 0x79a   :  { %v2068_v33 = vld [vmem:[#allocation7 + $0x8] sm:$0xff] }
 0x79b   :  { %v4298_v41 = vpack.c.bf16 %v2068_v33, %v2067_v32  ;;  %v4553_v32 = vld [vmem:[%s6551_s9 + $0xa8] ss:$28 sps:$4 sm:$0xff]  }
 0x79c   :  { %v4559_v33 = vld [vmem:[%s6551_s9 + $0xe4] ss:$28 sps:$4 sm:$0xff]  }
 0x79d   :  { %2104 = vrot.lane.b32.xlu0 %v4298_v41, %s4727_s15  ;;  %2089 = vrot.lane.b32.xlu1 %v4298_v41, %s4726_s1  ;;  %2079 = vst.msk [vmem:[#allocation8] sm:$0xff] %vm5905_vm1, %v4298_v41 }
 0x7a1   :  { %2134 = vrot.lane.b32.xlu0 %v4298_v41, %s4736_s26  ;;  %2119 = vrot.lane.b32.xlu1 %v4298_v41, %s4735_s25 }
 0x7a5   :  { %2164 = vrot.lane.b32.xlu0 %v4298_v41, %s4730_s3  ;;  %2149 = vrot.lane.b32.xlu1 %v4298_v41, %s4737_s27 }
 0x7a9   :  { %2194 = vrot.lane.b32.xlu0 %v4298_v41, %s4739_s30  ;;  %2179 = vrot.lane.b32.xlu1 %v4298_v41, %s4738_s28  ;;  %v4563_v41 = vld [vmem:[%s6551_s9 + $0x11c] ss:$28 sps:$4 sm:$0xff]  }
 0x7ad   :  { %2220 = vperm.xlu0 %4340, %v2212_v60   ;;  %2215 = vperm.xlu1 %4341, %v2211_v9   ;;  %v4561_v60 = vld [vmem:[%s6551_s9 + $0x118] ss:$28 sps:$4 sm:$0xff]  }
 0x7ae   :  { %v4567_v9 = vld [vmem:[%s6551_s9 + $0x154] ss:$28 sps:$4 sm:$0xff]  }
 0x80f   :  { %v2105_v26 = vpop.permute.xlu0 %2104  ;;  %v2090_v3 = vpop.permute.xlu1 %2089 }
 0x810   :  { %v2106_v27 = vrot.slane %v2105_v26, 4  ;;  %v2091_v38 = vrot.slane %v2090_v3, 4 }
 0x812   :  { %v2107_v17 = vsel %vm304_vm9, %v2105_v26, %v2106_v27  ;;  %v2092_v2 = vsel %vm208_vm8, %v2090_v3, %v2091_v38  ;;  %v4587_v26 = vld [vmem:[%s6551_s9 + $0x26c] ss:$28 sps:$4 sm:$0xff]   ;;  %v4588_v27 = vld [vmem:[%s6551_s9 + $0x280] ss:$28 sps:$4 sm:$0xff]  }
 0x813   :  { %2109 = vst.msk [vmem:[#allocation8 + $0x10] sm:$0xff] %vm5905_vm1, %v2107_v17  ;;  %2094 = vst.msk [vmem:[#allocation8 + $0x8] sm:$0xff] %vm5905_vm1, %v2092_v2  ;;  %v2135_v12 = vpop.permute.xlu0 %2134  ;;  %v2120_v16 = vpop.permute.xlu1 %2119  ;;  %v4585_v3 = vld [vmem:[%s6551_s9 + $0x268] ss:$28 sps:$4 sm:$0xff]   ;;  %3057 = vmatpush1.bf16.msra.mxu0 %v4588_v27  ;;  %v4642_v27 = vld [vmem:[%s6551_s9 + $0xf0] ss:$28 sps:$4 sm:$0xff]  }
 0x814   :  { %v2136_v15 = vrot.slane %v2135_v12, 4  ;;  %v2121_v39 = vrot.slane %v2120_v16, 4  ;;  %v2427_v38 = vld [vmem:[%s6551_s9 + $0x2a0] sm:$0xff]  ;;  %3058 = vmatprep.subr.bf16.mxu0 %v6635_v14 }
 0x815   :  { %v4280_v17 = vcombine.high %v2427_v38, %v2427_v38  ;;  %v4279_v2 = vcombine.low %v2427_v38, %v2427_v38  ;;  %v4647_v38 = vld [vmem:[%s6551_s9 + $0x12c] ss:$28 sps:$4 sm:$0xff]  }
 0x816   :  { %v2137_v40 = vsel %vm1855_vm13, %v2135_v12, %v2136_v15  ;;  %v2122_v61 = vsel %vm1837_vm11, %v2120_v16, %v2121_v39  ;;  %v4591_v12 = vld [vmem:[%s6551_s9 + $0x2b8] ss:$0 sps:$4 sm:$0xff]   ;;  %v4594_v39 = vld [vmem:[%s6551_s9 + $0xc] ss:$28 sps:$4 sm:$0xff]   ;;  %vm3546_vm11 = vcmask 719872   ;;  %vm3609_vm13 = vcmask 711680  }
 0x817   :  { %2139 = vst.msk [vmem:[#allocation8 + $0x20] sm:$0xff] %vm5905_vm1, %v2137_v40  ;;  %2124 = vst.msk [vmem:[#allocation8 + $0x18] sm:$0xff] %vm5905_vm1, %v2122_v61  ;;  %v2165_v54 = vpop.permute.xlu0 %2164  ;;  %v2150_v50 = vpop.permute.xlu1 %2149  ;;  %v2885_v16 = vsel %vm1614_vm2, %v4279_v2, 0  ;;  %v2903_v15 = vsel %vm1614_vm2, %v4591_v12, 0  ;;  %v4650_v2 = vld [vmem:[%s6551_s9 + $0x164] ss:$28 sps:$4 sm:$0xff]  }
 0x818   :  { %v2166_v0 = vrot.slane %v2165_v54, 4  ;;  %v2151_v22 = vrot.slane %v2150_v50, 4  ;;  %3059 = vmatpush1.bf16.msra.mxu0 %v2903_v15  ;;  %v4648_v12 = vld [vmem:[%s6551_s9 + $0x160] ss:$28 sps:$4 sm:$0xff]   ;;  %v4651_v15 = vld [vmem:[%s6551_s9 + $0x198] ss:$28 sps:$4 sm:$0xff]  }
 0x81a   :  { %v2167_v23 = vsel %vm592_vm12, %v2165_v54, %v2166_v0  ;;  %v2152_v57 = vsel %vm1873_vm14, %v2150_v50, %v2151_v22  ;;  %v4526_v4 = vld [vmem:[#allocation8] ss:$8 sps:$4 sm:$0xff]   ;;  %v4528_v46 = vld [vmem:[#allocation8 + $0x4] ss:$8 sps:$4 sm:$0xff]   ;;  %vm3672_vm14 = vcmask 703488  }
 0x81b   :  { %2169 = vst.msk [vmem:[#allocation8 + $0x30] sm:$0xff] %vm5905_vm1, %v2167_v23  ;;  %2154 = vst.msk [vmem:[#allocation8 + $0x28] sm:$0xff] %vm5905_vm1, %v2152_v57  ;;  %v2195_v45 = vpop.permute.xlu0 %2194  ;;  %v2180_v29 = vpop.permute.xlu1 %2179  ;;  %2282 = vmatprep.subr.bf16.mxu1 %v4528_v46 }
 0x81c   :  { %v2196_v25 = vrot.slane %v2195_v45, 4  ;;  %v2181_v10 = vrot.slane %v2180_v29, 4  ;;  %2283 = vmatpush1.bf16.msra.mxu1 %v4526_v4 }
 0x81e   :  { %v2197_v42 = vsel %vm1927_vm0, %v2195_v45, %v2196_v25  ;;  %v2182_v55 = vsel %vm1909_vm15, %v2180_v29, %v2181_v10  ;;  %v4529_v24 = vld [vmem:[#allocation8 + $0x10] ss:$8 sps:$4 sm:$0xff]   ;;  %v4531_v28 = vld [vmem:[#allocation8 + $0x14] ss:$8 sps:$4 sm:$0xff]  }
 0x81f   :  { %2199 = vst.msk [vmem:[#allocation8 + $0x40] sm:$0xff] %vm5905_vm1, %v2197_v42  ;;  %2184 = vst.msk [vmem:[#allocation8 + $0x38] sm:$0xff] %vm5905_vm1, %v2182_v55  ;;  %2284 = vmatprep.subr.bf16.mxu1 %v4531_v28  ;;  %v4597_v28 = vld [vmem:[%s6551_s9 + $0x44] ss:$28 sps:$4 sm:$0xff]  }
 0x820   :  { %2285 = vmatpush1.bf16.msra.mxu1 %v4529_v24  ;;  %v4592_v24 = vld [vmem:[%s6551_s9 + $0x8] ss:$28 sps:$4 sm:$0xff]  }
 0x822   :  { %v4532_v48 = vld [vmem:[#allocation8 + $0x20] ss:$8 sps:$4 sm:$0xff]   ;;  %v4534_v49 = vld [vmem:[#allocation8 + $0x24] ss:$8 sps:$4 sm:$0xff]  }
 0x823   :  { %2286 = vmatprep.subr.bf16.mxu1 %v4534_v49  ;;  %v4600_v49 = vld [vmem:[%s6551_s9 + $0x7c] ss:$28 sps:$4 sm:$0xff]  }
 0x824   :  { %2287 = vmatpush1.bf16.msra.mxu1 %v4532_v48  ;;  %v4595_v48 = vld [vmem:[%s6551_s9 + $0x40] ss:$28 sps:$4 sm:$0xff]  }
 0x826   :  { %v4535_v1 = vld [vmem:[#allocation8 + $0x30] ss:$8 sps:$4 sm:$0xff]   ;;  %v4537_v37 = vld [vmem:[#allocation8 + $0x34] ss:$8 sps:$4 sm:$0xff]   ;;  %v2210_v18 = vld [vmem:[#allocation8 + $0x40] sm:$0xff] }
 0x827   :  { %2288 = vmatprep.subr.bf16.mxu1 %v4537_v37  ;;  %v4192_v56 = vcombine.high %v2210_v18, %v2210_v18  ;;  %v4191_v52 = vcombine.low %v2210_v18, %v2210_v18  ;;  %v4603_v37 = vld [vmem:[%s6551_s9 + $0xb4] ss:$28 sps:$4 sm:$0xff]  }
 0x828   :  { %2289 = vmatpush1.bf16.msra.mxu1 %v4535_v1  ;;  %v4598_v1 = vld [vmem:[%s6551_s9 + $0x78] ss:$28 sps:$4 sm:$0xff]   ;;  %v4601_v18 = vld [vmem:[%s6551_s9 + $0xb0] ss:$28 sps:$4 sm:$0xff]  }
 0x829   :  { %4193 = vmatprep.subr.msk.bf16.mxu1 %vm1614_vm2, %v4192_v56  ;;  %v2277_v34 = vsel %vm1614_vm2, %v4191_v52, 0  ;;  %v4606_v56 = vld [vmem:[%s6551_s9 + $0xec] ss:$28 sps:$4 sm:$0xff]  }
 0x82a   :  { %v4604_v52 = vld [vmem:[%s6551_s9 + $0xe8] ss:$28 sps:$4 sm:$0xff]  }
 0x82c   :  { %2291 = vmatpush1.bf16.msra.mxu1 %v2277_v34  ;;  %v2216_v40 = vpop.permute.xlu1 %2215  ;;  %v2221_v0 = vpop.permute.xlu0 %2220  ;;  %v4607_v34 = vld [vmem:[%s6551_s9 + $0x120] ss:$28 sps:$4 sm:$0xff]  }
 0x82d   :  { %2905 = vmatprep.subr.bf16.mxu1 %v4543_v53  ;;  %v4609_v53 = vld [vmem:[%s6551_s9 + $0x124] ss:$28 sps:$4 sm:$0xff]  }
 0x82f   :  { %4194 = vmatmul.mubr.msk.bf16.vlgmr.msra.gmra.mrb[4].mxu1 %vm1787_vm7, %v4540_v63  ;;  %v4612_v63 = vld [vmem:[%s6551_s9 + $0x15c] ss:$28 sps:$4 sm:$0xff]  }
 0x830   :  { %2906 = vmatpush1.bf16.msra.mxu1 %v4541_v36  ;;  %v4610_v36 = vld [vmem:[%s6551_s9 + $0x158] ss:$28 sps:$4 sm:$0xff]  }
 0x831   :  { %2907 = vmatprep.subr.bf16.mxu1 %v4547_v58  ;;  %v4615_v58 = vld [vmem:[%s6551_s9 + $0x194] ss:$28 sps:$4 sm:$0xff]  }
 0x834   :  { %2908 = vmatpush1.bf16.msra.mxu1 %v4545_v30  ;;  %v4613_v30 = vld [vmem:[%s6551_s9 + $0x190] ss:$28 sps:$4 sm:$0xff]  }
 0x835   :  { %2909 = vmatprep.subr.bf16.mxu1 %v4551_v6  ;;  %v4618_v6 = vld [vmem:[%s6551_s9 + $0x1cc] ss:$28 sps:$4 sm:$0xff]  }
 0x838   :  { %2910 = vmatpush1.bf16.msra.mxu1 %v4549_v19  ;;  %v4616_v19 = vld [vmem:[%s6551_s9 + $0x1c8] ss:$28 sps:$4 sm:$0xff]  }
 0x839   :  { %2911 = vmatprep.subr.bf16.mxu1 %v4555_v59  ;;  %v4621_v59 = vld [vmem:[%s6551_s9 + $0x204] ss:$28 sps:$4 sm:$0xff]  }
 0x83c   :  { %2912 = vmatpush1.bf16.msra.mxu1 %v4553_v32  ;;  %v4619_v32 = vld [vmem:[%s6551_s9 + $0x200] ss:$28 sps:$4 sm:$0xff]  }
 0x83d   :  { %2913 = vmatprep.subr.bf16.mxu1 %v4559_v33  ;;  %v4624_v33 = vld [vmem:[%s6551_s9 + $0x23c] ss:$28 sps:$4 sm:$0xff]  }
 0x840   :  { %2914 = vmatpush1.bf16.msra.mxu1 %v4557_v13  ;;  %v4622_v13 = vld [vmem:[%s6551_s9 + $0x238] ss:$28 sps:$4 sm:$0xff]  }
 0x841   :  { %2915 = vmatprep.subr.bf16.mxu1 %v4563_v41  ;;  %v4627_v41 = vld [vmem:[%s6551_s9 + $0x274] ss:$28 sps:$4 sm:$0xff]  }
 0x844   :  { %2916 = vmatpush1.bf16.msra.mxu1 %v4561_v60  ;;  %v2428_v60 = vld [vmem:[%s6551_s9 + $0x2a8] sm:$0xff] }
 0x845   :  { %2917 = vmatprep.subr.bf16.mxu1 %v4567_v9  ;;  %v4625_v9 = vld [vmem:[%s6551_s9 + $0x270] ss:$28 sps:$4 sm:$0xff]  }
 0x848   :  { %2918 = vmatpush1.bf16.msra.mxu1 %v4565_v21  ;;  %v4282_v21 = vcombine.high %v2428_v60, %v2428_v60 }
 0x849   :  { %2919 = vmatprep.subr.bf16.mxu1 %v4571_v8  ;;  %v4281_v8 = vcombine.low %v2428_v60, %v2428_v60 }
 0x84c   :  { %2920 = vmatpush1.bf16.msra.mxu1 %v4569_v43  ;;  %v2891_v43 = vsel %vm1614_vm2, %v4281_v8, 0 }
 0x84d   :  { %2921 = vmatprep.subr.bf16.mxu1 %v4575_v11  ;;  %v4632_v11 = vld [vmem:[%s6551_s9 + $0x14] ss:$28 sps:$4 sm:$0xff]  }
 0x850   :  { %2922 = vmatpush1.bf16.msra.mxu1 %v4573_v7  ;;  %v4630_v7 = vld [vmem:[%s6551_s9 + $0x10] ss:$28 sps:$4 sm:$0xff]  }
 0x851   :  { %2923 = vmatprep.subr.bf16.mxu1 %v4579_v44  ;;  %v4635_v44 = vld [vmem:[%s6551_s9 + $0x4c] ss:$28 sps:$4 sm:$0xff]  }
 0x854   :  { %2924 = vmatpush1.bf16.msra.mxu1 %v4577_v20  ;;  %v4633_v20 = vld [vmem:[%s6551_s9 + $0x48] ss:$28 sps:$4 sm:$0xff]  }
 0x855   :  { %2925 = vmatprep.subr.bf16.mxu1 %v4583_v31  ;;  %v4638_v31 = vld [vmem:[%s6551_s9 + $0x84] ss:$28 sps:$4 sm:$0xff]  }
 0x858   :  { %2926 = vmatpush1.bf16.msra.mxu1 %v4581_v35  ;;  %v4636_v35 = vld [vmem:[%s6551_s9 + $0x80] ss:$28 sps:$4 sm:$0xff]  }
 0x859   :  { %2927 = vmatprep.subr.bf16.mxu1 %v4587_v26  ;;  %v4639_v26 = vld [vmem:[%s6551_s9 + $0xb8] ss:$28 sps:$4 sm:$0xff]  }
 0x85c   :  { %2928 = vmatpush1.bf16.msra.mxu1 %v4585_v3  ;;  %v4644_v3 = vld [vmem:[%s6551_s9 + $0xf4] ss:$28 sps:$4 sm:$0xff]  }
 0x85d   :  { %4286 = vmatprep.subr.msk.bf16.mxu1 %vm1614_vm2, %v4280_v17  ;;  %v4645_v17 = vld [vmem:[%s6551_s9 + $0x128] ss:$28 sps:$4 sm:$0xff]  }
 0x860   :  { %2930 = vmatpush1.bf16.msra.mxu1 %v2885_v16  ;;  %v4653_v16 = vld [vmem:[%s6551_s9 + $0x19c] ss:$28 sps:$4 sm:$0xff]  }
 0x861   :  { %2948 = vmatprep.subr.bf16.mxu1 %v4594_v39  ;;  %v4656_v39 = vld [vmem:[%s6551_s9 + $0x1d4] ss:$28 sps:$4 sm:$0xff]  }
 0x902   :  { %v2316_v61 = vpop.f32.mrb[4].mxu1 }
 0x903   :  { %v2317_v54 = vadd.f32 %v2316_v61, %v2216_v40  ;;  %v2318_v50 = vpop.f32.mrb[5].mxu1  ;;  %v4659_v61 = vld [vmem:[%s6551_s9 + $0x20c] ss:$28 sps:$4 sm:$0xff]  }
 0x904   :  { %v2319_v22 = vadd.f32 %v2318_v50, %v2216_v40  ;;  %v2320_v23 = vpop.f32.mrb[6].mxu1  ;;  %v4654_v40 = vld [vmem:[%s6551_s9 + $0x1d0] ss:$28 sps:$4 sm:$0xff]   ;;  %v4662_v50 = vld [vmem:[%s6551_s9 + $0x244] ss:$28 sps:$4 sm:$0xff]  }
 0x905   :  { %v2321_v57 = vadd.f32 %v2320_v23, %v2221_v0  ;;  %v2322_v4 = vpop.f32.mrb[7].mxu1  ;;  %v2325_v45 = vmax.f32 %v2317_v54, 0.0  ;;  %v4657_v54 = vld [vmem:[%s6551_s9 + $0x208] ss:$28 sps:$4 sm:$0xff]   ;;  %v2429_v23 = vld [vmem:[%s6551_s9 + $0x2b0] sm:$0xff] }
 0x906   :  { %v2323_v46 = vadd.f32 %v2322_v4, %v2221_v0  ;;  %v2326_v25 = vmax.f32 %v2319_v22, 0.0  ;;  %v4660_v0 = vld [vmem:[%s6551_s9 + $0x240] ss:$28 sps:$4 sm:$0xff]   ;;  %v4284_v4 = vcombine.high %v2429_v23, %v2429_v23 }
 0x907   :  { %v2327_v29 = vmax.f32 %v2321_v57, 0.0  ;;  %v4665_v22 = vld [vmem:[%s6551_s9 + $0x27c] ss:$28 sps:$4 sm:$0xff]  }
 0x908   :  { %v2328_v10 = vmax.f32 %v2323_v46, 0.0  ;;  %v4663_v57 = vld [vmem:[%s6551_s9 + $0x278] ss:$28 sps:$4 sm:$0xff]   ;;  %v4283_v46 = vcombine.low %v2429_v23, %v2429_v23  ;;  %s4740_s9 = smov 21  }
 0x909   :  { %v6087_v42 = vpack.c.bf16 %v2327_v29, %v2325_v45 }
 0x90a   :  { %v6089_v55 = vpack.c.bf16 %v2328_v10, %v2326_v25  ;;  %v2897_v45 = vsel %vm1614_vm2, %v4283_v46, 0 }
 0x90c   :  { %4287 = vmatprep.mubr.msk.bf16.mxu1 %vm1787_vm7, %v6089_v55  ;;  %4292 = vmatprep.mubr.msk.bf16.mxu0 %vm1787_vm7, %v6089_v55 }
 0x90d   :  { %2938 = vmatmul.mubr.bf16.vlgmr.msra.gmra.mrb[8].mxu1 %v6087_v42  ;;  %3067 = vmatmul.mubr.bf16.vlgmr.msra.gmra.mrb[4].mxu0 %v6087_v42 }
 0x90e   :  { %2949 = vmatpush1.bf16.msra.mxu1 %v4592_v24  ;;  %4289 = vmatprep.mubr.msk.bf16.mxu1 %vm1787_vm7, %v6089_v55 }
 0x90f   :  { %2950 = vmatprep.subr.bf16.mxu1 %v4597_v28 }
 0x912   :  { %2951 = vmatpush1.bf16.msra.mxu1 %v4595_v48 }
 0x913   :  { %2952 = vmatprep.subr.bf16.mxu1 %v4600_v49 }
 0x916   :  { %2953 = vmatpush1.bf16.msra.mxu1 %v4598_v1 }
 0x917   :  { %2954 = vmatprep.subr.bf16.mxu1 %v4603_v37 }
 0x91a   :  { %2955 = vmatpush1.bf16.msra.mxu1 %v4601_v18 }
 0x91b   :  { %2956 = vmatprep.subr.bf16.mxu1 %v4606_v56 }
 0x91e   :  { %2957 = vmatpush1.bf16.msra.mxu1 %v4604_v52 }
 0x91f   :  { %2958 = vmatprep.subr.bf16.mxu1 %v4609_v53 }
 0x922   :  { %2959 = vmatpush1.bf16.msra.mxu1 %v4607_v34 }
 0x923   :  { %2960 = vmatprep.subr.bf16.mxu1 %v4612_v63 }
 0x926   :  { %2961 = vmatpush1.bf16.msra.mxu1 %v4610_v36 }
 0x927   :  { %2962 = vmatprep.subr.bf16.mxu1 %v4615_v58 }
 0x92a   :  { %2963 = vmatpush1.bf16.msra.mxu1 %v4613_v30 }
 0x92b   :  { %2964 = vmatprep.subr.bf16.mxu1 %v4618_v6 }
 0x92e   :  { %2965 = vmatpush1.bf16.msra.mxu1 %v4616_v19 }
 0x92f   :  { %2966 = vmatprep.subr.bf16.mxu1 %v4621_v59 }
 0x932   :  { %2967 = vmatpush1.bf16.msra.mxu1 %v4619_v32 }
 0x933   :  { %2968 = vmatprep.subr.bf16.mxu1 %v4624_v33 }
 0x936   :  { %2969 = vmatpush1.bf16.msra.mxu1 %v4622_v13 }
 0x937   :  { %2970 = vmatprep.subr.bf16.mxu1 %v4627_v41 }
 0x93a   :  { %2971 = vmatpush1.bf16.msra.mxu1 %v4625_v9 }
 0x93b   :  { %4288 = vmatprep.subr.msk.bf16.mxu1 %vm1614_vm2, %v4282_v21 }
 0x93e   :  { %2973 = vmatpush1.bf16.msra.mxu1 %v2891_v43 }
 0x93f   :  { %2991 = vmatprep.subr.bf16.mxu1 %v4632_v11 }
 0x941   :  { %2981 = vmatmul.mubr.bf16.vlgmr.msra.gmra.mrb[12].mxu1 %v6087_v42 }
 0x942   :  { %2992 = vmatpush1.bf16.msra.mxu1 %v4630_v7  ;;  %4291 = vmatprep.mubr.msk.bf16.mxu1 %vm1787_vm7, %v6089_v55  ;;  %vm3192_vm7 = vcmask 261120  }
 0x943   :  { %2993 = vmatprep.subr.bf16.mxu1 %v4635_v44 }
 0x946   :  { %2994 = vmatpush1.bf16.msra.mxu1 %v4633_v20 }
 0x947   :  { %2995 = vmatprep.subr.bf16.mxu1 %v4638_v31 }
 0x94a   :  { %2996 = vmatpush1.bf16.msra.mxu1 %v4636_v35 }
 0x94b   :  { %2997 = vmatprep.subr.bf16.mxu1 %v4641_v5 }
 0x94e   :  { %2998 = vmatpush1.bf16.msra.mxu1 %v4639_v26 }
 0x94f   :  { %2999 = vmatprep.subr.bf16.mxu1 %v4644_v3 }
 0x952   :  { %3000 = vmatpush1.bf16.msra.mxu1 %v4642_v27 }
 0x953   :  { %3001 = vmatprep.subr.bf16.mxu1 %v4647_v38 }
 0x956   :  { %3002 = vmatpush1.bf16.msra.mxu1 %v4645_v17 }
 0x957   :  { %3003 = vmatprep.subr.bf16.mxu1 %v4650_v2 }
 0x95a   :  { %3004 = vmatpush1.bf16.msra.mxu1 %v4648_v12 }
 0x95b   :  { %3005 = vmatprep.subr.bf16.mxu1 %v4653_v16 }
 0x95e   :  { %3006 = vmatpush1.bf16.msra.mxu1 %v4651_v15  ;;  %v4743_v15 = vmov 1966171168  }
 0x95f   :  { %3007 = vmatprep.subr.bf16.mxu1 %v4656_v39  ;;  %v3777_v39 = vunpack.c.l.s4 %v4743_v15 }
 0x962   :  { %3008 = vmatpush1.bf16.msra.mxu1 %v4654_v40 }
 0x963   :  { %3009 = vmatprep.subr.bf16.mxu1 %v4659_v61 }
 0x966   :  { %3010 = vmatpush1.bf16.msra.mxu1 %v4657_v54  ;;  %v3778_v54 = vunpack.c.0.s8 %v3777_v39 }
 0x967   :  { %3011 = vmatprep.subr.bf16.mxu1 %v4662_v50  ;;  %v6363_v50 = vld.sshfl [vmem:[%s6552_s10] sm:$0x11 pattern:$0x75316420]  ;;  %s4744_s10 = smov 86  }
 0x96a   :  { %3012 = vmatpush1.bf16.msra.mxu1 %v4660_v0  ;;  %v3775_v0 = vcombine.high %v6363_v50, %v6363_v50 }
 0x96b   :  { %3013 = vmatprep.subr.bf16.mxu1 %v4665_v22  ;;  %v6368_v22 = vsub.s32 %v3778_v54, %v6636_v51 }
 0x96d   :  { %v6375_v23 = vrot.slane %v3775_v0, %v6368_v22 }
 0x96e   :  { %3014 = vmatpush1.bf16.msra.mxu1 %v4663_v57 }
 0x96f   :  { %4290 = vmatprep.subr.msk.bf16.mxu1 %vm1614_vm2, %v4284_v4  ;;  %vm3078_vm2 = vcmask 605608   ;;  %4295 = vmatprep.mubr.msk.bf16.mxu0 %vm1964_vm10, %v6375_v23 }
 0x970   :  { %3079 = vst.msk [vmem:[#allocation9 + $0x30] sm:$0xff] %vm3078_vm2, %v6634_v47  ;;  %3080 = vst.msk [vmem:[#allocation9 + $0x68] sm:$0xff] %vm3078_vm2, %v6634_v47 }
 0x972   :  { %3016 = vmatpush1.bf16.msra.mxu1 %v2897_v45 }
 0x975   :  { %3024 = vmatmul.mubr.bf16.vlgmr.msra.gmra.mrb[16].mxu1 %v6087_v42 }
 0x976   :  { %4294 = vmatprep.mubr.msk.bf16.mxu1 %vm1964_vm10, %v6375_v23 }
 0x9e0   :  { %v2939_v29 = vpop.f32.mrb[8].mxu1  ;;  %v3068_v25 = vpop.f32.mrb[4].mxu0 }
 0x9e1   :  { %v3070_v10 = vpop.f32.mrb[5].mxu0  ;;  %3095 = vrot.lane.b32.xlu1 %v2939_v29, %s4740_s9  ;;  %v2941_v55 = vpop.f32.mrb[9].mxu1 }
 0x9e2   :  { %v3071_v24 = vpop.f32.mrb[6].mxu0  ;;  %3097 = vrot.lane.b32.xlu0 %v2941_v55, %s4740_s9  ;;  %v2943_v28 = vpop.f32.mrb[10].mxu1 }
 0x9e3   :  { %v2945_v48 = vpop.f32.mrb[11].mxu1  ;;  %v3073_v42 = vpop.f32.mrb[7].mxu0 }
 0x9e5   :  { %3111 = vrot.lane.b32.xlu1 %v2945_v48, %s4740_s9 }
 0x9e6   :  { %3109 = vrot.lane.b32.xlu0 %v2943_v28, %s4740_s9 }
 0xa14   :  { %v2982_v49 = vpop.f32.mrb[12].mxu1 }
 0xa15   :  { %3099 = vrot.lane.b32.xlu1 %v2982_v49, %s4740_s9  ;;  %v2984_v1 = vpop.f32.mrb[13].mxu1 }
 0xa16   :  { %v2986_v37 = vpop.f32.mrb[14].mxu1 }
 0xa17   :  { %3113 = vrot.lane.b32.xlu0 %v2986_v37, %s4740_s9  ;;  %v2988_v18 = vpop.f32.mrb[15].mxu1 }
 0xa19   :  { %3101 = vrot.lane.b32.xlu1 %v2984_v1, %s4740_s9 }
 0xa1d   :  { %3115 = vrot.lane.b32.xlu1 %v2988_v18, %s4740_s9 }
 0xa48   :  { %v3025_v56 = vpop.f32.mrb[16].mxu1 }
 0xa49   :  { %3103 = vrot.lane.b32.xlu0 %v3025_v56, %s4740_s9  ;;  %v3027_v52 = vpop.f32.mrb[17].mxu1 }
 0xa4a   :  { %3105 = vrot.lane.b32.xlu1 %v3027_v52, %s4740_s9  ;;  %v3029_v53 = vpop.f32.mrb[18].mxu1 }
 0xa4b   :  { %v3031_v34 = vpop.f32.mrb[19].mxu1 }
 0xa4d   :  { %3117 = vrot.lane.b32.xlu0 %v3029_v53, %s4740_s9 }
 0xa4e   :  { %3119 = vrot.lane.b32.xlu1 %v3031_v34, %s4740_s9 }
 0xa51   :  { %3107 = vrot.lane.b32.xlu0 %v3068_v25, %s4740_s9 }
 0xa53   :  { %v3096_v63 = vpop.permute.xlu1 %3095 }
 0xa54   :  { %3150 = vst.msk [vmem:[#allocation9] sm:$0xff] %vm3149_vm5, %v3096_v63  ;;  %v3098_v36 = vpop.permute.xlu0 %3097 }
 0xa55   :  { %v3123_v47 = vsel %vm3075_vm3, %v3096_v63, %v3098_v36  ;;  %3121 = vrot.lane.b32.xlu0 %v3071_v24, %s4740_s9 }
 0xa57   :  { %v3112_v58 = vpop.permute.xlu1 %3111 }
 0xa58   :  { %v3110_v30 = vpop.permute.xlu0 %3109 }
 0xa59   :  { %v3129_v6 = vsel %vm3075_vm3, %v3110_v30, %v3112_v58  ;;  %3158 = vst.msk [vmem:[#allocation9 + $0x38] sm:$0xff] %vm3149_vm5, %v3110_v30  ;;  %v3757_v30 = vld [vmem:[#allocation11] sm:$0x1] }
 0xa5a   :  { %v6276_v19 = vpack.c.bf16 %v3129_v6, %v3123_v47 }
 0xa5b   :  { %v3165_v59 = vld [vmem:[#allocation9] sm:$0xff] }
 0xa5c   :  { %3794 = vmatprep.subr.bf16.mxu1 %v6276_v19 }
 0xa60   :  { %v3172_v32 = vld [vmem:[#allocation9 + $0x38] sm:$0xff] }
 0xa61   :  { %v6279_v33 = vpack.c.bf16 %v3172_v32, %v3165_v59 }
 0xa63   :  { %3284 = vrot.lane.b32.xlu0 %v6279_v33, %s4727_s15  ;;  %3222 = vrot.lane.b32.xlu1 %v6279_v33, %s4726_s1 }
 0xa64   :  { %3795 = vmatpush1.bf16.msra.mxu1 %v6279_v33 }
 0xa67   :  { %3408 = vrot.lane.b32.xlu0 %v6279_v33, %s4738_s28  ;;  %3346 = vrot.lane.b32.xlu1 %v6279_v33, %s4730_s3 }
 0xa6b   :  { %3532 = vrot.lane.b32.xlu0 %v6279_v33, %s4741_s5  ;;  %3470 = vrot.lane.b32.xlu1 %v6279_v33, %s4739_s30 }
 0xa6f   :  { %3286 = vrot.lane.b32.xlu0 %v6276_v19, %s4727_s15  ;;  %3224 = vrot.lane.b32.xlu1 %v6276_v19, %s4726_s1 }
 0xa73   :  { %3410 = vrot.lane.b32.xlu0 %v6276_v19, %s4738_s28  ;;  %3348 = vrot.lane.b32.xlu1 %v6276_v19, %s4730_s3 }
 0xa77   :  { %3534 = vrot.lane.b32.xlu0 %v6276_v19, %s4741_s5  ;;  %3472 = vrot.lane.b32.xlu1 %v6276_v19, %s4739_s30 }
 0xa87   :  { %v3100_v13 = vpop.permute.xlu1 %3099 }
 0xa88   :  { %v3124_v41 = vsel %vm3075_vm3, %v3098_v36, %v3100_v13 }
 0xa89   :  { %v3114_v60 = vpop.permute.xlu0 %3113 }
 0xa8a   :  { %v3130_v9 = vsel %vm3075_vm3, %v3112_v58, %v3114_v60 }
 0xa8b   :  { %v6308_v21 = vpack.c.bf16 %v3130_v9, %v3124_v41  ;;  %v3102_v8 = vpop.permute.xlu1 %3101 }
 0xa8c   :  { %v3125_v43 = vsel %vm3075_vm3, %v3100_v13, %v3102_v8 }
 0xa8d   :  { %3226 = vrot.lane.b32.xlu0 %v6308_v21, %s4726_s1  ;;  %3288 = vrot.lane.b32.xlu1 %v6308_v21, %s4727_s15 }
 0xa8f   :  { %v3116_v11 = vpop.permute.xlu1 %3115 }
 0xa90   :  { %v3131_v7 = vsel %vm3075_vm3, %v3114_v60, %v3116_v11 }
 0xa91   :  { %3350 = vrot.lane.b32.xlu0 %v6308_v21, %s4730_s3  ;;  %3412 = vrot.lane.b32.xlu1 %v6308_v21, %s4738_s28  ;;  %v6320_v44 = vpack.c.bf16 %v3131_v7, %v3125_v43 }
 0xa93   :  { %3835 = vmatprep.subr.bf16.mxu0 %v6320_v44 }
 0xa94   :  { %3836 = vmatpush1.bf16.msra.mxu0 %v6308_v21 }
 0xa95   :  { %3474 = vrot.lane.b32.xlu0 %v6308_v21, %s4739_s30  ;;  %3536 = vrot.lane.b32.xlu1 %v6308_v21, %s4741_s5 }
 0xa99   :  { %3228 = vrot.lane.b32.xlu0 %v6320_v44, %s4726_s1  ;;  %3290 = vrot.lane.b32.xlu1 %v6320_v44, %s4727_s15 }
 0xa9d   :  { %3352 = vrot.lane.b32.xlu0 %v6320_v44, %s4730_s3  ;;  %3414 = vrot.lane.b32.xlu1 %v6320_v44, %s4738_s28 }
 0xaa1   :  { %3476 = vrot.lane.b32.xlu0 %v6320_v44, %s4739_s30  ;;  %3538 = vrot.lane.b32.xlu1 %v6320_v44, %s4741_s5 }
 0xaa5   :  { %3599 = vrot.lane.b32.xlu0 %v6308_v21, %s4742_s6 }
 0xabb   :  { %v3104_v20 = vpop.permute.xlu0 %3103 }
 0xabc   :  { %v3126_v31 = vsel %vm3075_vm3, %v3102_v8, %v3104_v20  ;;  %v3106_v35 = vpop.permute.xlu1 %3105 }
 0xabd   :  { %v3127_v5 = vsel %vm3075_vm3, %v3104_v20, %v3106_v35 }
 0xabf   :  { %v3118_v26 = vpop.permute.xlu0 %3117 }
 0xac0   :  { %v3132_v3 = vsel %vm3075_vm3, %v3116_v11, %v3118_v26  ;;  %v3120_v27 = vpop.permute.xlu1 %3119 }
 0xac1   :  { %v6345_v38 = vpack.c.bf16 %v3132_v3, %v3126_v31  ;;  %v3133_v17 = vsel %vm3075_vm3, %v3118_v26, %v3120_v27 }
 0xac2   :  { %v6348_v2 = vpack.c.bf16 %v3133_v17, %v3127_v5 }
 0xac3   :  { %v3108_v12 = vpop.permute.xlu0 %3107  ;;  %3292 = vrot.lane.b32.xlu0 %v6345_v38, %s4727_s15  ;;  %3230 = vrot.lane.b32.xlu1 %v6345_v38, %s4726_s1 }
 0xac4   :  { %v3128_v16 = vsel %vm3075_vm3, %v3106_v35, %v3108_v12 }
 0xac5   :  { %3157 = vst.msk [vmem:[#allocation9 + $0x30] sm:$0xff] %vm3156_vm6, %v3128_v16 }
 0xac7   :  { %v3122_v40 = vpop.permute.xlu0 %3121  ;;  %3601 = vrot.lane.b32.xlu0 %v6320_v44, %s4742_s6  ;;  %3597 = vrot.lane.b32.xlu1 %v6276_v19, %s4742_s6 }
 0xac8   :  { %v3134_v61 = vsel %vm3075_vm3, %v3120_v27, %v3122_v40 }
 0xac9   :  { %3164 = vst.msk [vmem:[#allocation9 + $0x68] sm:$0xff] %vm3156_vm6, %v3134_v61 }
 0xacb   :  { %3416 = vrot.lane.b32.xlu0 %v6345_v38, %s4738_s28  ;;  %3354 = vrot.lane.b32.xlu1 %v6345_v38, %s4730_s3 }
 0xacc   :  { %v3171_v51 = vld [vmem:[#allocation9 + $0x30] sm:$0xff] }
 0xacf   :  { %3660 = vrot.lane.b32.xlu0 %v6276_v19, %s4744_s10  ;;  %3595 = vrot.lane.b32.xlu1 %v6279_v33, %s4742_s6 }
 0xad0   :  { %v3178_v57 = vld [vmem:[#allocation9 + $0x68] sm:$0xff] }
 0xad1   :  { %v3185_v4 = vpack.c.bf16 %v3178_v57, %v3171_v51 }
 0xad3   :  { %3540 = vrot.lane.b32.xlu0 %v6345_v38, %s4741_s5  ;;  %3478 = vrot.lane.b32.xlu1 %v6345_v38, %s4739_s30  ;;  %3193 = vst.msk [vmem:[#allocation10 + $0x30] sm:$0xff] %vm3192_vm7, %v3185_v4 }
 0xad5   :  { %v3285_v46 = vpop.permute.xlu0 %3284  ;;  %v3223_v45 = vpop.permute.xlu1 %3222 }
 0xad7   :  { %3658 = vrot.lane.b32.xlu0 %v6279_v33, %s4744_s10  ;;  %3662 = vrot.lane.b32.xlu1 %v6308_v21, %s4744_s10 }
 0xad9   :  { %v3409_v29 = vpop.permute.xlu0 %3408  ;;  %v3347_v25 = vpop.permute.xlu1 %3346 }
 0xadb   :  { %3666 = vrot.lane.b32.xlu0 %v6345_v38, %s4744_s10  ;;  %3603 = vrot.lane.b32.xlu1 %v6345_v38, %s4742_s6 }
 0xadd   :  { %v3533_v10 = vpop.permute.xlu0 %3532  ;;  %v3471_v55 = vpop.permute.xlu1 %3470 }
 0xadf   :  { %3664 = vrot.lane.b32.xlu1 %v6320_v44, %s4744_s10  ;;  %3234 = vrot.lane.b32.xlu0 %v3185_v4, %s4726_s1 }
 0xae1   :  { %v3287_v24 = vpop.permute.xlu0 %3286  ;;  %v3225_v28 = vpop.permute.xlu1 %3224 }
 0xae2   :  { %v3298_v48 = vsel %vm304_vm9, %v3285_v46, %v3287_v24  ;;  %v3236_v42 = vsel %vm208_vm8, %v3223_v45, %v3225_v28 }
 0xae3   :  { %3296 = vrot.lane.b32.xlu0 %v3185_v4, %s4727_s15  ;;  %3232 = vrot.lane.b32.xlu1 %v6348_v2, %s4726_s1 }
 0xae5   :  { %v3411_v49 = vpop.permute.xlu0 %3410  ;;  %v3349_v1 = vpop.permute.xlu1 %3348 }
 0xae6   :  { %v3422_v37 = vsel %vm1909_vm15, %v3409_v29, %v3411_v49  ;;  %v3360_v18 = vsel %vm592_vm12, %v3347_v25, %v3349_v1 }
 0xae7   :  { %3358 = vrot.lane.b32.xlu0 %v3185_v4, %s4730_s3  ;;  %3294 = vrot.lane.b32.xlu1 %v6348_v2, %s4727_s15 }
 0xae9   :  { %v3535_v56 = vpop.permute.xlu0 %3534  ;;  %v3473_v52 = vpop.permute.xlu1 %3472 }
 0xaea   :  { %v3547_v53 = vsel %vm3546_vm11, %v3533_v10, %v3535_v56  ;;  %v3484_v34 = vsel %vm1927_vm0, %v3471_v55, %v3473_v52 }
 0xaeb   :  { %3420 = vrot.lane.b32.xlu0 %v3185_v4, %s4738_s28  ;;  %3356 = vrot.lane.b32.xlu1 %v6348_v2, %s4730_s3 }
 0xaef   :  { %3482 = vrot.lane.b32.xlu0 %v3185_v4, %s4739_s30  ;;  %3418 = vrot.lane.b32.xlu1 %v6348_v2, %s4738_s28 }
 0xaf3   :  { %3544 = vrot.lane.b32.xlu0 %v3185_v4, %s4741_s5  ;;  %3480 = vrot.lane.b32.xlu1 %v6348_v2, %s4739_s30 }
 0xaf7   :  { %3607 = vrot.lane.b32.xlu0 %v3185_v4, %s4742_s6  ;;  %3542 = vrot.lane.b32.xlu1 %v6348_v2, %s4741_s5 }
 0xafb   :  { %3670 = vrot.lane.b32.xlu0 %v3185_v4, %s4744_s10  ;;  %3605 = vrot.lane.b32.xlu1 %v6348_v2, %s4742_s6 }
 0xaff   :  { %v3227_v63 = vpop.permute.xlu0 %3226  ;;  %3668 = vrot.lane.b32.xlu1 %v6348_v2, %s4744_s10  ;;  %v3289_v36 = vpop.permute.xlu1 %3288 }
 0xb00   :  { %v3237_v47 = vsel %vm208_vm8, %v3225_v28, %v3227_v63  ;;  %v3299_v58 = vsel %vm304_vm9, %v3287_v24, %v3289_v36 }
 0xb01   :  { %3796 = vmatprep.subr.bf16.mxu1 %v3237_v47 }
 0xb02   :  { %3797 = vmatpush1.bf16.msra.mxu1 %v3236_v42 }
 0xb03   :  { %v3351_v6 = vpop.permute.xlu0 %3350  ;;  %3760 = vperm.xlu1 %4341, %v3757_v30   ;;  %v3413_v19 = vpop.permute.xlu1 %3412  ;;  %3798 = vmatprep.subr.bf16.mxu1 %v3299_v58 }
 0xb04   :  { %v3361_v59 = vsel %vm592_vm12, %v3349_v1, %v3351_v6  ;;  %v3423_v32 = vsel %vm1909_vm15, %v3411_v49, %v3413_v19  ;;  %v6470_v49 = vrot.slane %v6363_v50, %v6368_v22 }
 0xb06   :  { %3799 = vmatpush1.bf16.msra.mxu1 %v3298_v48 }
 0xb07   :  { %v3475_v33 = vpop.permute.xlu0 %3474  ;;  %v3537_v13 = vpop.permute.xlu1 %3536  ;;  %3800 = vmatprep.subr.bf16.mxu1 %v3361_v59 }
 0xb08   :  { %v3485_v41 = vsel %vm1927_vm0, %v3473_v52, %v3475_v33  ;;  %v3548_v60 = vsel %vm3546_vm11, %v3535_v56, %v3537_v13 }
 0xb0a   :  { %3801 = vmatpush1.bf16.msra.mxu1 %v3360_v18 }
 0xb0b   :  { %v3229_v9 = vpop.permute.xlu0 %3228  ;;  %v3291_v21 = vpop.permute.xlu1 %3290  ;;  %3802 = vmatprep.subr.bf16.mxu1 %v3423_v32 }
 0xb0c   :  { %v3238_v8 = vsel %vm208_vm8, %v3227_v63, %v3229_v9  ;;  %v3300_v43 = vsel %vm304_vm9, %v3289_v36, %v3291_v21  ;;  %v3700_v36 = vld [vmem:[#allocation10 + $0x30] sm:$0xff] }
 0xb0e   :  { %3803 = vmatpush1.bf16.msra.mxu1 %v3422_v37 }
 0xb0f   :  { %v3353_v11 = vpop.permute.xlu0 %3352  ;;  %v3415_v7 = vpop.permute.xlu1 %3414  ;;  %3804 = vmatprep.subr.bf16.mxu1 %v3485_v41 }
 0xb10   :  { %v3362_v44 = vsel %vm592_vm12, %v3351_v6, %v3353_v11  ;;  %v3424_v20 = vsel %vm1909_vm15, %v3413_v19, %v3415_v7 }
 0xb12   :  { %3805 = vmatpush1.bf16.msra.mxu1 %v3484_v34 }
 0xb13   :  { %v3477_v31 = vpop.permute.xlu0 %3476  ;;  %v3539_v35 = vpop.permute.xlu1 %3538  ;;  %3806 = vmatprep.subr.bf16.mxu1 %v3548_v60 }
 0xb14   :  { %v3486_v5 = vsel %vm1927_vm0, %v3475_v33, %v3477_v31  ;;  %v3549_v26 = vsel %vm3546_vm11, %v3537_v13, %v3539_v35 }
 0xb16   :  { %3807 = vmatpush1.bf16.msra.mxu1 %v3547_v53 }
 0xb17   :  { %v3600_v3 = vpop.permute.xlu0 %3599 }
 0xb35   :  { %v6442_v27 = vpop.permute.xlu0 %3292  ;;  %v3231_v17 = vpop.permute.xlu1 %3230 }
 0xb36   :  { %v3301_v12 = vsel %vm304_vm9, %v3291_v21, %v6442_v27  ;;  %v3239_v16 = vsel %vm208_vm8, %v3229_v9, %v3231_v17 }
 0xb37   :  { %3837 = vmatprep.subr.bf16.mxu0 %v3239_v16 }
 0xb38   :  { %3838 = vmatpush1.bf16.msra.mxu0 %v3238_v8 }
 0xb39   :  { %v3602_v15 = vpop.permute.xlu0 %3601  ;;  %v3598_v39 = vpop.permute.xlu1 %3597  ;;  %3839 = vmatprep.subr.bf16.mxu0 %v3301_v12 }
 0xb3a   :  { %v3612_v40 = vsel %vm3609_vm13, %v3600_v3, %v3602_v15  ;;  %v3611_v61 = vsel %vm3609_vm13, %v3598_v39, %v3600_v3 }
 0xb3b   :  { %3808 = vmatprep.subr.bf16.mxu1 %v3611_v61 }
 0xb3c   :  { %3840 = vmatpush1.bf16.msra.mxu0 %v3300_v43 }
 0xb3d   :  { %v6449_v54 = vpop.permute.xlu0 %3416  ;;  %v6451_v0 = vpop.permute.xlu1 %3354 }
 0xb3e   :  { %v3425_v51 = vsel %vm1909_vm15, %v3415_v7, %v6449_v54  ;;  %v3363_v57 = vsel %vm592_vm12, %v3353_v11, %v6451_v0 }
 0xb3f   :  { %3841 = vmatprep.subr.bf16.mxu0 %v3363_v57 }
 0xb40   :  { %3842 = vmatpush1.bf16.msra.mxu0 %v3362_v44 }
 0xb41   :  { %v3661_v4 = vpop.permute.xlu0 %3660  ;;  %v3596_v46 = vpop.permute.xlu1 %3595  ;;  %3843 = vmatprep.subr.bf16.mxu0 %v3425_v51 }
 0xb42   :  { %v3610_v45 = vsel %vm3609_vm13, %v3596_v46, %v3598_v39 }
 0xb43   :  { %3809 = vmatpush1.bf16.msra.mxu1 %v3610_v45 }
 0xb44   :  { %3844 = vmatpush1.bf16.msra.mxu0 %v3424_v20 }
 0xb45   :  { %v6458_v29 = vpop.permute.xlu0 %3540  ;;  %v6460_v25 = vpop.permute.xlu1 %3478 }
 0xb46   :  { %v3550_v10 = vsel %vm3546_vm11, %v3539_v35, %v6458_v29  ;;  %v3487_v55 = vsel %vm1927_vm0, %v3477_v31, %v6460_v25 }
 0xb47   :  { %3845 = vmatprep.subr.bf16.mxu0 %v3487_v55 }
 0xb48   :  { %3846 = vmatpush1.bf16.msra.mxu0 %v3486_v5 }
 0xb49   :  { %v3659_v24 = vpop.permute.xlu0 %3658  ;;  %v3663_v28 = vpop.permute.xlu1 %3662  ;;  %3847 = vmatprep.subr.bf16.mxu0 %v3550_v10 }
 0xb4a   :  { %v3673_v48 = vsel %vm3672_vm14, %v3659_v24, %v3661_v4  ;;  %v3674_v42 = vsel %vm3672_vm14, %v3661_v4, %v3663_v28 }
 0xb4b   :  { %3810 = vmatprep.subr.bf16.mxu1 %v3674_v42 }
 0xb4c   :  { %3811 = vmatpush1.bf16.msra.mxu1 %v3673_v48  ;;  %3848 = vmatpush1.bf16.msra.mxu0 %v3549_v26 }
 0xb4d   :  { %v6472_v1 = vpop.permute.xlu0 %3666  ;;  %v6474_v37 = vpop.permute.xlu1 %3603  ;;  %3876 = vmatprep.subr.bf16.mxu1 %v6348_v2 }
 0xb4e   :  { %v3613_v18 = vsel %vm3609_vm13, %v3602_v15, %v6474_v37 }
 0xb4f   :  { %3827 = vmatmul.mubr.bf16.vlgmr.msra.gmra.mrb[20].mxu1 %v6470_v49  ;;  %3849 = vmatprep.subr.bf16.mxu0 %v3613_v18 }
 0xb50   :  { %3850 = vmatpush1.bf16.msra.mxu0 %v3612_v40  ;;  %3877 = vmatpush1.bf16.msra.mxu1 %v6345_v38 }
 0xb51   :  { %v3235_v56 = vpop.permute.xlu0 %3234  ;;  %v3665_v50 = vpop.permute.xlu1 %3664  ;;  %4296 = vmatprep.mubr.msk.bf16.mxu1 %vm1964_vm10, %v6375_v23 }
 0xb52   :  { %3255 = vst.msk [vmem:[#allocation10 + $0x68] sm:$0xff] %vm3192_vm7, %v3235_v56  ;;  %v3675_v52 = vsel %vm3672_vm14, %v3663_v28, %v3665_v50  ;;  %v3676_v2 = vsel %vm3672_vm14, %v3665_v50, %v6472_v1 }
 0xb53   :  { %3851 = vmatprep.subr.bf16.mxu0 %v3676_v2 }
 0xb54   :  { %3852 = vmatpush1.bf16.msra.mxu0 %v3675_v52 }
 0xb55   :  { %v3297_v53 = vpop.permute.xlu0 %3296  ;;  %v3233_v34 = vpop.permute.xlu1 %3232  ;;  %3917 = vmatprep.subr.bf16.mxu0 %v6635_v14 }
 0xb56   :  { %3317 = vst.msk [vmem:[#allocation10 + $0xa0] sm:$0xff] %vm3192_vm7, %v3297_v53  ;;  %v3240_v38 = vsel %vm208_vm8, %v3231_v17, %v3233_v34  ;;  %v3241_v63 = vsel %vm208_vm8, %v3233_v34, %v3235_v56 }
 0xb57   :  { %3868 = vmatmul.mubr.bf16.vlgmr.msra.gmra.mrb[8].mxu0 %v6470_v49  ;;  %3878 = vmatprep.subr.bf16.mxu1 %v3241_v63 }
 0xb58   :  { %3879 = vmatpush1.bf16.msra.mxu1 %v3240_v38  ;;  %3918 = vmatpush1.bf16.msra.mxu0 %v3700_v36 }
 0xb59   :  { %v3359_v47 = vpop.permute.xlu0 %3358  ;;  %v3295_v58 = vpop.permute.xlu1 %3294  ;;  %3919 = vmatprep.subr.bf16.mxu0 %v6635_v14  ;;  %4297 = vmatprep.mubr.msk.bf16.mxu0 %vm1964_vm10, %v6375_v23  ;;  %v3707_v19 = vld [vmem:[#allocation10 + $0x68] sm:$0xff] }
 0xb5a   :  { %3379 = vst.msk [vmem:[#allocation10 + $0xd8] sm:$0xff] %vm3192_vm7, %v3359_v47  ;;  %v3302_v30 = vsel %vm304_vm9, %v6442_v27, %v3295_v58  ;;  %v3303_v6 = vsel %vm304_vm9, %v3295_v58, %v3297_v53 }
 0xb5b   :  { %3880 = vmatprep.subr.bf16.mxu1 %v3303_v6 }
 0xb5c   :  { %3881 = vmatpush1.bf16.msra.mxu1 %v3302_v30  ;;  %3920 = vmatpush1.bf16.msra.mxu0 %v3707_v19 }
 0xb5d   :  { %v3421_v59 = vpop.permute.xlu0 %3420  ;;  %v3357_v32 = vpop.permute.xlu1 %3356  ;;  %3921 = vmatprep.subr.bf16.mxu0 %v6635_v14  ;;  %v3714_v13 = vld [vmem:[#allocation10 + $0xa0] sm:$0xff] }
 0xb5e   :  { %3441 = vst.msk [vmem:[#allocation10 + $0x110] sm:$0xff] %vm3192_vm7, %v3421_v59  ;;  %v3364_v23 = vsel %vm592_vm12, %v6451_v0, %v3357_v32  ;;  %v3365_v33 = vsel %vm592_vm12, %v3357_v32, %v3359_v47 }
 0xb5f   :  { %3882 = vmatprep.subr.bf16.mxu1 %v3365_v33 }
 0xb60   :  { %3883 = vmatpush1.bf16.msra.mxu1 %v3364_v23  ;;  %3922 = vmatpush1.bf16.msra.mxu0 %v3714_v13 }
 0xb61   :  { %v3483_v41 = vpop.permute.xlu0 %3482  ;;  %v3419_v60 = vpop.permute.xlu1 %3418  ;;  %3923 = vmatprep.subr.bf16.mxu0 %v6635_v14  ;;  %v3721_v8 = vld [vmem:[#allocation10 + $0xd8] sm:$0xff] }
 0xb62   :  { %3503 = vst.msk [vmem:[#allocation10 + $0x148] sm:$0xff] %vm3192_vm7, %v3483_v41  ;;  %v3426_v9 = vsel %vm1909_vm15, %v6449_v54, %v3419_v60  ;;  %v3427_v21 = vsel %vm1909_vm15, %v3419_v60, %v3421_v59 }
 0xb63   :  { %3884 = vmatprep.subr.bf16.mxu1 %v3427_v21 }
 0xb64   :  { %3885 = vmatpush1.bf16.msra.mxu1 %v3426_v9  ;;  %3924 = vmatpush1.bf16.msra.mxu0 %v3721_v8 }
 0xb65   :  { %v3545_v43 = vpop.permute.xlu0 %3544  ;;  %v3481_v11 = vpop.permute.xlu1 %3480  ;;  %3925 = vmatprep.subr.bf16.mxu0 %v6635_v14  ;;  %v3728_v20 = vld [vmem:[#allocation10 + $0x110] sm:$0xff] }
 0xb66   :  { %3566 = vst.msk [vmem:[#allocation10 + $0x180] sm:$0xff] %vm3192_vm7, %v3545_v43  ;;  %v3488_v7 = vsel %vm1927_vm0, %v6460_v25, %v3481_v11  ;;  %v3489_v44 = vsel %vm1927_vm0, %v3481_v11, %v3483_v41 }
 0xb67   :  { %3886 = vmatprep.subr.bf16.mxu1 %v3489_v44 }
 0xb68   :  { %3887 = vmatpush1.bf16.msra.mxu1 %v3488_v7  ;;  %3926 = vmatpush1.bf16.msra.mxu0 %v3728_v20 }
 0xb69   :  { %v3608_v31 = vpop.permute.xlu0 %3607  ;;  %v3543_v35 = vpop.permute.xlu1 %3542  ;;  %3927 = vmatprep.subr.bf16.mxu0 %v6635_v14  ;;  %v3735_v3 = vld [vmem:[#allocation10 + $0x148] sm:$0xff] }
 0xb6a   :  { %3629 = vst.msk [vmem:[#allocation10 + $0x1b8] sm:$0xff] %vm3192_vm7, %v3608_v31  ;;  %v3551_v5 = vsel %vm3546_vm11, %v6458_v29, %v3543_v35  ;;  %v3552_v26 = vsel %vm3546_vm11, %v3543_v35, %v3545_v43 }
 0xb6b   :  { %3888 = vmatprep.subr.bf16.mxu1 %v3552_v26 }
 0xb6c   :  { %3889 = vmatpush1.bf16.msra.mxu1 %v3551_v5  ;;  %3928 = vmatpush1.bf16.msra.mxu0 %v3735_v3 }
 0xb6d   :  { %v3671_v27 = vpop.permute.xlu0 %3670  ;;  %v3606_v17 = vpop.permute.xlu1 %3605  ;;  %3929 = vmatprep.subr.bf16.mxu0 %v6635_v14  ;;  %v3742_v15 = vld [vmem:[#allocation10 + $0x180] sm:$0xff] }
 0xb6e   :  { %3692 = vst.msk [vmem:[#allocation10 + $0x1f0] sm:$0xff] %vm3192_vm7, %v3671_v27  ;;  %v3614_v12 = vsel %vm3609_vm13, %v6474_v37, %v3606_v17  ;;  %v3615_v16 = vsel %vm3609_vm13, %v3606_v17, %v3608_v31 }
 0xb6f   :  { %3890 = vmatprep.subr.bf16.mxu1 %v3615_v16 }
 0xb70   :  { %3891 = vmatpush1.bf16.msra.mxu1 %v3614_v12  ;;  %3930 = vmatpush1.bf16.msra.mxu0 %v3742_v15 }
 0xb71   :  { %v3669_v39 = vpop.permute.xlu1 %3668  ;;  %3931 = vmatprep.subr.bf16.mxu0 %v6635_v14  ;;  %v3749_v54 = vld [vmem:[#allocation10 + $0x1b8] sm:$0xff] }
 0xb72   :  { %v3677_v40 = vsel %vm3672_vm14, %v6472_v1, %v3669_v39  ;;  %v3678_v61 = vsel %vm3672_vm14, %v3669_v39, %v3671_v27 }
 0xb73   :  { %3892 = vmatprep.subr.bf16.mxu1 %v3678_v61 }
 0xb74   :  { %3893 = vmatpush1.bf16.msra.mxu1 %v3677_v40  ;;  %3932 = vmatpush1.bf16.msra.mxu0 %v3749_v54 }
 0xb75   :  { %3933 = vmatprep.subr.bf16.mxu0 %v6635_v14  ;;  %v3756_v0 = vld [vmem:[#allocation10 + $0x1f0] sm:$0xff] }
 0xb77   :  { %3909 = vmatmul.mubr.bf16.vlgmr.msra.gmra.mrb[24].mxu1 %v6470_v49 }
 0xb78   :  { %3934 = vmatpush1.bf16.msra.mxu0 %v3756_v0 }
 0xb7b   :  { %3950 = vmatmul.mubr.bf16.vlgmr.msra.gmra.mrb[12].mxu0 %v6470_v49 }
 0xb82   :  { %v3761_v51 = vpop.permute.xlu1 %3760 }
 0xb83   :  { %v3766_v57 = vrot.slane %v3761_v51, %v6638_v62 }
 0xc22   :  { %v3828_v4 = vpop.f32.mrb[20].mxu1 }
 0xc23   :  { %v3829_v46 = vadd.f32 %v3828_v4, %v3766_v57  ;;  %v3830_v45 = vpop.f32.mrb[21].mxu1 }
 0xc24   :  { %v3831_v29 = vadd.f32 %v3830_v45, %v3766_v57  ;;  %v3832_v25 = vpop.f32.mrb[22].mxu1 }
 0xc25   :  { %v3957_v10 = vsub.f32 0.0, %v3829_v46  ;;  %v3833_v55 = vpop.f32.mrb[23].mxu1 }
 0xc26   :  { %v3958_v24 = vsub.f32 0.0, %v3831_v29 }
 0xc27   :  { %v3964_v28 = vmul.f32 1.442695, %v3957_v10 }
 0xc28   :  { %v3966_v48 = vmul.f32 1.442695, %v3958_v24 }
 0xc29   :  { %4668 = vpow2.f32 %v3964_v28 }
 0xc2a   :  { %4670 = vpow2.f32 %v3966_v48  ;;  %v3869_v14 = vpop.f32.mrb[8].mxu0 }
 0xc2b   :  { %v3870_v42 = vadd.f32 %v3869_v14, %v3766_v57  ;;  %v3871_v1 = vpop.f32.mrb[9].mxu0 }
 0xc2c   :  { %v3872_v37 = vadd.f32 %v3871_v1, %v3766_v57  ;;  %v3873_v49 = vpop.f32.mrb[10].mxu0 }
 0xc2d   :  { %v3959_v18 = vsub.f32 0.0, %v3870_v42  ;;  %v3874_v56 = vpop.f32.mrb[11].mxu0 }
 0xc2e   :  { %v3960_v62 = vsub.f32 0.0, %v3872_v37 }
 0xc2f   :  { %v3968_v50 = vmul.f32 1.442695, %v3959_v18 }
 0xc30   :  { %v3970_v52 = vmul.f32 1.442695, %v3960_v62 }
 0xc31   :  { %4672 = vpow2.f32 %v3968_v50 }
 0xc32   :  { %4674 = vpow2.f32 %v3970_v52 }
 0xc33   :  { %v4669_v2 = vpop.eup %4668 }
 0xc34   :  { %v4671_v53 = vpop.eup %4670  ;;  %v3978_v34 = vadd.f32 1.0, %v4669_v2  ;;  %v6641_v2 = vlaneseq }
 0xc35   :  { %v3979_v38 = vadd.f32 1.0, %v4671_v53 }
 0xc36   :  { %4676 = vrcp.f32 %v3978_v34  ;;  %vm4062_vm8 = vcmp.lt.s32.totalorder %v6641_v2, 800 }
 0xc37   :  { %4678 = vrcp.f32 %v3979_v38 }
 0xc3b   :  { %v4673_v63 = vpop.eup %4672 }
 0xc3c   :  { %v4675_v36 = vpop.eup %4674  ;;  %v3980_v47 = vadd.f32 1.0, %v4673_v63 }
 0xc3d   :  { %v3981_v58 = vadd.f32 1.0, %v4675_v36 }
 0xc3e   :  { %4680 = vrcp.f32 %v3980_v47 }
 0xc3f   :  { %4682 = vrcp.f32 %v3981_v58 }
 0xc40   :  { %v4677_v30 = vpop.eup %4676 }
 0xc41   :  { %v4679_v6 = vpop.eup %4678  ;;  %v3992_v19 = vmax.f32 %v4677_v30, 0.0 }
 0xc42   :  { %v3993_v59 = vmax.f32 %v4679_v6, 0.0 }
 0xc43   :  { %v3999_v32 = vmin.f32 %v3992_v19, 1.0 }
 0xc44   :  { %v4000_v23 = vmin.f32 %v3993_v59, 1.0 }
 0xc46   :  { %v4013_v33 = vcombine.low %v3999_v32, %v4000_v23 }
 0xc48   :  { %v4681_v13 = vpop.eup %4680  ;;  %v4022_v16 = vrot.slane %v4013_v33, %v6368_v22 }
 0xc49   :  { %v4683_v41 = vpop.eup %4682  ;;  %v3994_v60 = vmax.f32 %v4681_v13, 0.0 }
 0xc4a   :  { %v3995_v9 = vmax.f32 %v4683_v41, 0.0  ;;  %v3910_v21 = vpop.f32.mrb[24].mxu1 }
 0xc4b   :  { %v4001_v8 = vmin.f32 %v3994_v60, 1.0  ;;  %v3911_v43 = vadd.f32 %v3910_v21, %v3766_v57  ;;  %v3912_v11 = vpop.f32.mrb[25].mxu1 }
 0xc4c   :  { %v4002_v7 = vmin.f32 %v3995_v9, 1.0  ;;  %v3913_v44 = vadd.f32 %v3912_v11, %v3766_v57  ;;  %v3914_v20 = vpop.f32.mrb[26].mxu1 }
 0xc4d   :  { %v3961_v31 = vsub.f32 0.0, %v3911_v43  ;;  %v3915_v35 = vpop.f32.mrb[27].mxu1 }
 0xc4e   :  { %v4014_v5 = vcombine.low %v4001_v8, %v4002_v7  ;;  %v3962_v26 = vsub.f32 0.0, %v3913_v44  ;;  %v3951_v3 = vpop.f32.mrb[12].mxu0 }
 0xc4f   :  { %v3972_v27 = vmul.f32 1.442695, %v3961_v31  ;;  %v3952_v17 = vadd.f32 %v3951_v3, %v3766_v57  ;;  %v3953_v12 = vpop.f32.mrb[13].mxu0 }
 0xc50   :  { %v4029_v15 = vrot.slane %v4014_v5, %v6368_v22  ;;  %v3974_v39 = vmul.f32 1.442695, %v3962_v26  ;;  %v3954_v40 = vpop.f32.mrb[14].mxu0 }
 0xc51   :  { %4684 = vpow2.f32 %v3972_v27  ;;  %v3963_v61 = vsub.f32 0.0, %v3952_v17  ;;  %v3955_v54 = vpop.f32.mrb[15].mxu0 }
 0xc52   :  { %v4044_v0 = vcombine.low %v4022_v16, %v4029_v15  ;;  %4686 = vpow2.f32 %v3974_v39 }
 0xc53   :  { %v3976_v51 = vmul.f32 1.442695, %v3963_v61 }
 0xc54   :  { %v4052_v50 = vrot.slane %v4044_v0, %v6368_v22 }
 0xc55   :  { %4688 = vpow2.f32 %v3976_v51 }
 0xc5b   :  { %v4685_v4 = vpop.eup %4684 }
 0xc5c   :  { %v4687_v46 = vpop.eup %4686  ;;  %v3982_v45 = vadd.f32 1.0, %v4685_v4 }
 0xc5d   :  { %v3983_v29 = vadd.f32 1.0, %v4687_v46 }
 0xc5e   :  { %4690 = vrcp.f32 %v3982_v45 }
 0xc5f   :  { %v4689_v57 = vpop.eup %4688  ;;  %4692 = vrcp.f32 %v3983_v29 }
 0xc60   :  { %v3984_v25 = vadd.f32 1.0, %v4689_v57 }
 0xc62   :  { %4694 = vrcp.f32 %v3984_v25 }
 0xc68   :  { %v4691_v10 = vpop.eup %4690 }
 0xc69   :  { %v4693_v55 = vpop.eup %4692  ;;  %v3996_v24 = vmax.f32 %v4691_v10, 0.0 }
 0xc6a   :  { %v3997_v28 = vmax.f32 %v4693_v55, 0.0 }
 0xc6b   :  { %v4003_v48 = vmin.f32 %v3996_v24, 1.0 }
 0xc6c   :  { %v4695_v14 = vpop.eup %4694  ;;  %v4004_v42 = vmin.f32 %v3997_v28, 1.0 }
 0xc6d   :  { %v3998_v1 = vmax.f32 %v4695_v14, 0.0 }
 0xc6e   :  { %v4015_v37 = vcombine.low %v4003_v48, %v4004_v42 }
 0xc6f   :  { %v4005_v49 = vmin.f32 %v3998_v1, 1.0 }
 0xc70   :  { %v4036_v18 = vrot.slane %v4015_v37, %v6368_v22 }
 0xc71   :  { %v4043_v56 = vrot.slane %v4005_v49, %v6368_v22 }
 0xc73   :  { %v4045_v62 = vcombine.low %v4036_v18, %v4043_v56 }
 0xc75   :  { %v4059_v52 = vrot.slane %v4045_v62, %v6368_v22 }
 0xc77   :  { %v4060_v53 = vcombine.low %v4052_v50, %v4059_v52 }
 0xc79   :  { %4064 = vst.msk [vmem:[%s6554_s12] sm:$0x7f] %vm4062_vm8, %v4060_v53 }
 0xc7a   :  { %4069 = vsyncpa [#allocation13], 1 }

</bundles_post_ra>
